<compile_context>
chip_gen: v6e
topology: v6e:2x2x1
jax: 0.10.0
libtpu: 0.0.40
codegen_flags: <defaults>
</compile_context>

<pallas_src>
import functools

import jax
import jax.numpy as jnp
from jax.experimental import pallas as pl
from jax.experimental.pallas import tpu as pltpu

BN_EPS = 1e-5
LANE = 128
SUBLANE = 8
VMEM_LIMIT = 32 * 1024 * 1024  # safe on v5e/v6e/v7x; blocks below use ~1-2 MiB


def _round_up(x, m):
    return ((x + m - 1) // m) * m


def _pick_tile(dim, preferred, granule):
    """Return (tile, padded_dim).

    If dim <= preferred -> one full-extent block (always legal, no padding).
    Else pad dim to a multiple of `granule` and take the largest granule-multiple
    tile <= preferred that divides the padded dim.
    """
    if dim <= preferred:
        return dim, dim
    padded = _round_up(dim, granule)
    tile = (preferred // granule) * granule
    while padded % tile:
        tile -= granule
    return tile, padded


# ---------------------------------------------------------------------------
# Pallas kernel 1: tiled fused  out = act(A @ W + shift)
# ---------------------------------------------------------------------------
def _fused_matmul_kernel(a_ref, w_ref, t_ref, o_ref, acc_ref, *, leaky):
    k = pl.program_id(2)

    @pl.when(k == 0)
    def _init():
        acc_ref[...] = jnp.zeros_like(acc_ref)

    acc_ref[...] += jnp.dot(a_ref[...], w_ref[...],
                            preferred_element_type=jnp.float32)

    @pl.when(k == pl.num_programs(2) - 1)
    def _finalize():
        r = acc_ref[...] + t_ref[...]
        if leaky:
            r = jnp.where(r >= 0.0, r, 0.2 * r)          # LeakyReLU(0.2)
        o_ref[...] = r.astype(o_ref.dtype)


def fused_matmul(a, w, shift, *, leaky, tm_pref=128, tn_pref=256, tk_pref=512):
    """a: (M, K) float; w: (K, N_pad) bf16 (N_pad % 128 == 0); shift: (1, N_pad) f32.

    Returns (M, N_pad) f32 (caller slices off the N padding).
    """
    M, K = a.shape
    Kw, Np = w.shape
    assert Kw == K and Np % LANE == 0 and shift.shape == (1, Np)

    tm, Mp = _pick_tile(M, tm_pref, SUBLANE)
    tk, Kp = _pick_tile(K, tk_pref, LANE)
    tn, _ = _pick_tile(Np, tn_pref, LANE)

    if Mp != M:
        a = jnp.pad(a, ((0, Mp - M), (0, 0)))
    if Kp != K:                                  # zero-pad K (correct for reduction)
        a = jnp.pad(a, ((0, 0), (0, Kp - K)))
        w = jnp.pad(w, ((0, Kp - K), (0, 0)))

    a = a.astype(jnp.bfloat16)
    w = w.astype(jnp.bfloat16)

    grid = (Mp // tm, Np // tn, Kp // tk)
    kernel = functools.partial(_fused_matmul_kernel, leaky=leaky)
    out = pl.pallas_call(
        kernel,
        out_shape=jax.ShapeDtypeStruct((Mp, Np), jnp.float32),
        grid=grid,
        in_specs=[
            pl.BlockSpec((tm, tk), lambda i, j, k: (i, k)),
            pl.BlockSpec((tk, tn), lambda i, j, k: (k, j)),
            pl.BlockSpec((1, tn), lambda i, j, k: (0, j)),
        ],
        out_specs=pl.BlockSpec((tm, tn), lambda i, j, k: (i, j)),
        scratch_shapes=[pltpu.VMEM((tm, tn), jnp.float32)],
        compiler_params=pltpu.CompilerParams(
            dimension_semantics=("parallel", "parallel", "arbitrary"),
            vmem_limit_bytes=VMEM_LIMIT),
    )(a, w, shift)
    if Mp != M:
        out = out[:M]
    return out


# ---------------------------------------------------------------------------
# Pallas kernel 2: fused FC head  out = leaky(A @ W1 + t1) @ W2 + t2
#   (fc1 + BN1d + LeakyReLU + fc2 in one kernel; K of fc1 streamed over the grid)
# ---------------------------------------------------------------------------
def _fc_head_kernel(a_ref, w1_ref, t1_ref, w2_ref, t2_ref, o_ref, h_ref):
    k = pl.program_id(0)

    @pl.when(k == 0)
    def _init():
        h_ref[...] = jnp.zeros_like(h_ref)

    h_ref[...] += jnp.dot(a_ref[...], w1_ref[...],
                          preferred_element_type=jnp.float32)

    @pl.when(k == pl.num_programs(0) - 1)
    def _finalize():
        h = h_ref[...] + t1_ref[...]
        h = jnp.where(h >= 0.0, h, 0.2 * h)               # LeakyReLU(0.2)
        out = jnp.dot(h.astype(w2_ref.dtype), w2_ref[...],
                      preferred_element_type=jnp.float32)
        o_ref[...] = (out + t2_ref[...]).astype(o_ref.dtype)


def fused_fc_head(a, w1, t1, w2, t2, *, tk_pref=512):
    """a: (M, K); w1: (K, N1) bf16; t1: (1, N1) f32; w2: (N1, N2_pad) bf16; t2: (1, N2_pad) f32."""
    M, K = a.shape
    K1, N1 = w1.shape
    N1b, N2 = w2.shape
    assert K1 == K and N1b == N1 and N2 % LANE == 0

    tk, Kp = _pick_tile(K, tk_pref, LANE)
    if Kp != K:
        a = jnp.pad(a, ((0, 0), (0, Kp - K)))
        w1 = jnp.pad(w1, ((0, Kp - K), (0, 0)))
    a = a.astype(jnp.bfloat16)
    w1 = w1.astype(jnp.bfloat16)
    w2 = w2.astype(jnp.bfloat16)

    return pl.pallas_call(
        _fc_head_kernel,
        out_shape=jax.ShapeDtypeStruct((M, N2), jnp.float32),
        grid=(Kp // tk,),
        in_specs=[
            pl.BlockSpec((M, tk), lambda k: (0, k)),
            pl.BlockSpec((tk, N1), lambda k: (k, 0)),
            pl.BlockSpec((1, N1), lambda k: (0, 0)),
            pl.BlockSpec((N1, N2), lambda k: (0, 0)),
            pl.BlockSpec((1, N2), lambda k: (0, 0)),
        ],
        out_specs=pl.BlockSpec((M, N2), lambda k: (0, 0)),
        scratch_shapes=[pltpu.VMEM((M, N1), jnp.float32)],
        compiler_params=pltpu.CompilerParams(
            dimension_semantics=("arbitrary",),
            vmem_limit_bytes=VMEM_LIMIT),
    )(a, w1, t1, w2, t2)


# ---------------------------------------------------------------------------
# Glue: channel-last im2col and conv wrapper (no NCHW round-trips)
# ---------------------------------------------------------------------------
def im2col_nhwc(x, kh, kw, stride, pad):
    """x: (N, H, W, C) -> (N*OH*OW, KH*KW*C); column order (kh, kw, c)."""
    N, H, W, C = x.shape
    xp = jnp.pad(x, ((0, 0), (pad, pad), (pad, pad), (0, 0)))
    OH = (H + 2 * pad - kh) // stride + 1
    OW = (W + 2 * pad - kw) // stride + 1
    cols = []
    for i in range(kh):
        for j in range(kw):
            cols.append(xp[:, i:i + stride * OH:stride, j:j + stride * OW:stride, :])
    patches = jnp.concatenate(cols, axis=-1)               # (N, OH, OW, KH*KW*C)
    return patches.reshape(N * OH * OW, kh * kw * C), OH, OW


def conv2d_fused(x_nhwc, w_mat, shift, out_channels, *, kh, kw, stride, pad, leaky):
    """NHWC conv via im2col + fused matmul.  Returns NHWC (N, OH, OW, out_channels)."""
    N = x_nhwc.shape[0]
    patches, OH, OW = im2col_nhwc(x_nhwc, kh, kw, stride, pad)
    out = fused_matmul(patches, w_mat, shift, leaky=leaky)
    return out[:, :out_channels].reshape(N, OH, OW, out_channels)


# ---------------------------------------------------------------------------
# One-time parameter preparation (weight re-layout, BN folding, N padding, bf16)
# ---------------------------------------------------------------------------
def _bn_fold_scale(gamma):
    # eval-mode BN with running_mean = 0, running_var = 1
    return gamma / jnp.sqrt(1.0 + BN_EPS)


def _prep_conv(w_oihw, bias, gamma, beta):
    O, C, KH, KW = w_oihw.shape
    scale = _bn_fold_scale(gamma) if gamma is not None else jnp.ones((O,), jnp.float32)
    beta = beta if beta is not None else jnp.zeros((O,), jnp.float32)
    bias = bias if bias is not None else jnp.zeros((O,), jnp.float32)
    # (O,C,KH,KW) -> (KH,KW,C,O) -> (KH*KW*C, O); fold BN scale into columns.
    w_mat = w_oihw.transpose(2, 3, 1, 0).reshape(KH * KW * C, O) * scale[None, :]
    shift = bias * scale + beta
    O_pad = _round_up(O, LANE)
    w_mat = jnp.pad(w_mat, ((0, 0), (0, O_pad - O))).astype(jnp.bfloat16)
    shift = jnp.pad(shift, (0, O_pad - O)).reshape(1, O_pad).astype(jnp.float32)
    return w_mat, shift


def _prep_fc_head(fc1_w, fc1_b, gamma, beta, fc2_w, fc2_b, c_last, h_sp, w_sp):
    n1, flat = fc1_w.shape
    # torch flatten order is (c, h, w); our activations are NHWC -> permute K rows to (h, w, c)
    w1 = fc1_w.reshape(n1, c_last, h_sp, w_sp).transpose(2, 3, 1, 0).reshape(flat, n1)
    s = _bn_fold_scale(gamma)
    w1 = (w1 * s[None, :]).astype(jnp.bfloat16)
    t1 = (fc1_b * s + beta).reshape(1, n1).astype(jnp.float32)
    n2 = fc2_w.shape[0]
    n2_pad = _round_up(n2, LANE)
    w2 = jnp.pad(fc2_w.T, ((0, 0), (0, n2_pad - n2))).astype(jnp.bfloat16)
    t2 = jnp.pad(fc2_b, (0, n2_pad - n2)).reshape(1, n2_pad).astype(jnp.float32)
    return w1, t1, w2, t2


def prepare_params(p, size_x, dim_h=64):
    sp = size_x // 4
    c1_wm, c1_t = _prep_conv(p["conv1_w"], None, None, None)
    c2_wm, c2_t = _prep_conv(p["conv2_w"], p["conv2_b"], p["bn2_gamma"], p["bn2_beta"])
    m_wm, m_t = _prep_conv(p["map_w"], p["map_b"], None, None)
    w1, t1, w2, t2 = _prep_fc_head(p["fc1_w"], p["fc1_b"], p["bnf_gamma"], p["bnf_beta"],
                                   p["fc2_w"], p["fc2_b"], dim_h * 2, sp, sp)
    return {
        "conv1_wm": c1_wm, "conv1_t": c1_t,
        "conv2_wm": c2_wm, "conv2_t": c2_t,
        "map_wm": m_wm, "map_t": m_t,
        "fc1_wm": w1, "fc1_t": t1, "fc2_wm": w2, "fc2_t": t2,
    }


# ---------------------------------------------------------------------------
# Model: AdversaryCNN + mapping_yx (JointAdversary forward), channel-last
# ---------------------------------------------------------------------------
def adversary_cnn_forward(x_nhwc, prep, dim_adv, dim_h=64):
    N = x_nhwc.shape[0]
    # conv1: Conv2d(C, 64, 4, 2, 1, bias=False) + LeakyReLU(0.2)
    h = conv2d_fused(x_nhwc, prep["conv1_wm"], prep["conv1_t"], dim_h,
                     kh=4, kw=4, stride=2, pad=1, leaky=True)
    # conv2: Conv2d(64, 128, 4, 2, 1) + BatchNorm2d(eval) + LeakyReLU(0.2)
    h = conv2d_fused(h, prep["conv2_wm"], prep["conv2_t"], dim_h * 2,
                     kh=4, kw=4, stride=2, pad=1, leaky=True)
    # flatten (NHWC order; fc1 weight rows were permuted to match torch's NCHW .view)
    flat = h.reshape(N, -1)
    # fc1 + BN1d + LeakyReLU + fc2 fused into a single kernel
    out = fused_fc_head(flat, prep["fc1_wm"], prep["fc1_t"],
                        prep["fc2_wm"], prep["fc2_t"])
    return out[:, :dim_adv]


def joint_adversary_forward(x, y, prep, *, dim_adv, channel_x, dim_h=64):
    # NCHW -> NHWC once at the boundary
    x_nhwc = x.transpose(0, 2, 3, 1)
    y_nhwc = y.transpose(0, 2, 3, 1)
    # mapping_yx: Conv2d(channel_y, channel_x, 3, 1, 1) + LeakyReLU(0.2)
    y_mapped = conv2d_fused(y_nhwc, prep["map_wm"], prep["map_t"], channel_x,
                            kh=3, kw=3, stride=1, pad=1, leaky=True)
    if y_mapped.shape[1:3] == x_nhwc.shape[1:3]:
        # batch the two adversary branches into a single pass
        B = x_nhwc.shape[0]
        f = adversary_cnn_forward(jnp.concatenate([x_nhwc, y_mapped], axis=0),
                                  prep, dim_adv, dim_h)
        return f[:B], f[B:]
    f_x = adversary_cnn_forward(x_nhwc, prep, dim_adv, dim_h)
    f_y = adversary_cnn_forward(y_mapped, prep, dim_adv, dim_h)
    return f_x, f_y


# ---------------------------------------------------------------------------
# Deterministic parameter init (synthetic, PyTorch layouts, no checkpoint)
# ---------------------------------------------------------------------------
def init_params(key, channel_x, channel_y, size_x, dim_adv, dim_h=64):
    flat = dim_h * 2 * (size_x // 4) * (size_x // 4)
    ks = jax.random.split(key, 13)
    return {
        "conv1_w": jax.random.normal(ks[0], (dim_h, channel_x, 4, 4), jnp.float32) * 0.05,
        "conv2_w": jax.random.normal(ks[1], (dim_h * 2, dim_h, 4, 4), jnp.float32) * 0.05,
        "conv2_b": jax.random.normal(ks[2], (dim_h * 2,), jnp.float32) * 0.05,
        "bn2_gamma": 1.0 + 0.1 * jax.random.normal(ks[3], (dim_h * 2,), jnp.float32),
        "bn2_beta": 0.1 * jax.random.normal(ks[4], (dim_h * 2,), jnp.float32),
        "fc1_w": jax.random.normal(ks[5], (1024, flat), jnp.float32) * 0.02,
        "fc1_b": jax.random.normal(ks[6], (1024,), jnp.float32) * 0.02,
        "bnf_gamma": 1.0 + 0.1 * jax.random.normal(ks[7], (1024,), jnp.float32),
        "bnf_beta": 0.1 * jax.random.normal(ks[8], (1024,), jnp.float32),
        "fc2_w": jax.random.normal(ks[9], (dim_adv, 1024), jnp.float32) * 0.02,
        "fc2_b": jax.random.normal(ks[10], (dim_adv,), jnp.float32) * 0.02,
        "map_w": jax.random.normal(ks[11], (channel_x, channel_y, 3, 3), jnp.float32) * 0.05,
        "map_b": jax.random.normal(ks[12], (channel_x,), jnp.float32) * 0.05,
    }


if __name__ == "__main__":
    # args.size_x = 16, args.channel_x = 4, args.size_y = 16, args.channel_y = 3, args.dim_adv = 8
    batch, channel_x, channel_y, size_x, size_y, dim_adv = 2, 4, 3, 16, 16, 8

    key = jax.random.PRNGKey(0)
    kx, ky, kp = jax.random.split(key, 3)
    x = jax.random.normal(kx, (batch, channel_x, size_x, size_x), jnp.float32)
    y = jax.random.normal(ky, (batch, channel_y, size_y, size_y), jnp.float32)
    params = init_params(kp, channel_x, channel_y, size_x, dim_adv)

    # Weight re-layout / BN folding done once, outside the jitted forward.
    prep = prepare_params(params, size_x)

    fwd = jax.jit(functools.partial(joint_adversary_forward,
                                    dim_adv=dim_adv, channel_x=channel_x))
    f_x, f_y = fwd(x, y, prep)
    jax.block_until_ready((f_x, f_y))
    assert f_x.shape == (batch, dim_adv) and f_y.shape == (batch, dim_adv)
    print("KERNEL_OK")
</pallas_src>

<mosaic_0001>
module attributes {stable_mosaic.version = 11 : i64} {
  func.func @_fused_matmul_kernel(%arg0: i32, %arg1: i32, %arg2: i32, %arg3: memref<128x27xbf16, #tpu.memory_space<vmem>>, %arg4: memref<27x128xbf16, #tpu.memory_space<vmem>>, %arg5: memref<1x128xf32, #tpu.memory_space<vmem>>, %arg6: memref<128x128xf32, #tpu.memory_space<vmem>>, %arg7: memref<128x128xf32, #tpu.memory_space<vmem>>) attributes {dimension_semantics = [#tpu.dimension_semantics<parallel>, #tpu.dimension_semantics<parallel>, #tpu.dimension_semantics<arbitrary>], iteration_bounds = array<i64: 4, 1, 1>, scalar_prefetch = 0 : i64, scratch_operands = 1 : i64, tpu.core_type = #tpu.core_type<tc>, window_params = [{transform_indices = @transform_0, window_bounds = array<i64: 128, 27>}, {transform_indices = @transform_1, window_bounds = array<i64: 27, 128>}, {transform_indices = @transform_2, window_bounds = array<i64: 1, 128>}, {transform_indices = @transform_3, window_bounds = array<i64: 128, 128>}]} {
    %c0_i32 = arith.constant 0 : i32
    %0 = arith.cmpi eq, %arg2, %c0_i32 : i32
    %1 = arith.extui %0 : i1 to i32
    %c0_i32_0 = arith.constant 0 : i32
    %2 = arith.cmpi ne, %1, %c0_i32_0 : i32
    scf.if %2 {
      %cst_10 = arith.constant 0.000000e+00 : f32
      %12 = vector.broadcast %cst_10 : f32 to vector<128x128xf32>
      %c0_11 = arith.constant 0 : index
      %c0_12 = arith.constant 0 : index
      %13 = vector.load %arg7[%c0_11, %c0_12] : memref<128x128xf32, #tpu.memory_space<vmem>>, vector<128x128xf32>
      tpu.vector_store %arg7[%c0_11, %c0_12], %12 {strides = array<i32>} : memref<128x128xf32, #tpu.memory_space<vmem>>, vector<128x128xf32>,
    } else {
    }
    %c0 = arith.constant 0 : index
    %c0_1 = arith.constant 0 : index
    %3 = vector.load %arg7[%c0, %c0_1] : memref<128x128xf32, #tpu.memory_space<vmem>>, vector<128x128xf32>
    %c0_2 = arith.constant 0 : index
    %c0_3 = arith.constant 0 : index
    %4 = vector.load %arg3[%c0_2, %c0_3] : memref<128x27xbf16, #tpu.memory_space<vmem>>, vector<128x27xbf16>
    %c0_4 = arith.constant 0 : index
    %c0_5 = arith.constant 0 : index
    %5 = vector.load %arg4[%c0_4, %c0_5] : memref<27x128xbf16, #tpu.memory_space<vmem>>, vector<27x128xbf16>
    %cst = arith.constant dense<0.000000e+00> : vector<128x128xf32>
    %6 = tpu.matmul %4, %5, %cst {dimension_numbers = #tpu.dot_dimension_numbers<[1], [0], [0], [1], [0, 0, 1, 1], [], []>} : vector<128x27xbf16>, vector<27x128xbf16>, vector<128x128xf32> -> vector<128x128xf32>
    %7 = arith.addf %3, %6 : vector<128x128xf32>
    %c0_6 = arith.constant 0 : index
    %c0_7 = arith.constant 0 : index
    %8 = vector.load %arg7[%c0_6, %c0_7] : memref<128x128xf32, #tpu.memory_space<vmem>>, vector<128x128xf32>
    tpu.vector_store %arg7[%c0_6, %c0_7], %7 {strides = array<i32>} : memref<128x128xf32, #tpu.memory_space<vmem>>, vector<128x128xf32>,
    %c0_i32_8 = arith.constant 0 : i32
    %9 = arith.cmpi eq, %arg2, %c0_i32_8 : i32
    %10 = arith.extui %9 : i1 to i32
    %c0_i32_9 = arith.constant 0 : i32
    %11 = arith.cmpi ne, %10, %c0_i32_9 : i32
    scf.if %11 {
      %c0_10 = arith.constant 0 : index
      %c0_11 = arith.constant 0 : index
      %12 = vector.load %arg7[%c0_10, %c0_11] : memref<128x128xf32, #tpu.memory_space<vmem>>, vector<128x128xf32>
      %c0_12 = arith.constant 0 : index
      %c0_13 = arith.constant 0 : index
      %13 = vector.load %arg5[%c0_12, %c0_13] : memref<1x128xf32, #tpu.memory_space<vmem>>, vector<1x128xf32>
      %14 = vector.broadcast %13 : vector<1x128xf32> to vector<128x128xf32>
      %15 = arith.addf %12, %14 : vector<128x128xf32>
      %cst_14 = arith.constant 0.000000e+00 : f32
      %16 = vector.broadcast %cst_14 : f32 to vector<128x128xf32>
      %17 = arith.cmpf oge, %15, %16 : vector<128x128xf32>
      %cst_15 = arith.constant 2.000000e-01 : f32
      %18 = vector.broadcast %cst_15 : f32 to vector<128x128xf32>
      %19 = arith.mulf %18, %15 : vector<128x128xf32>
      %20 = arith.select %17, %15, %19 : vector<128x128xi1>, vector<128x128xf32>
      %c0_16 = arith.constant 0 : index
      %c0_17 = arith.constant 0 : index
      %21 = vector.load %arg6[%c0_16, %c0_17] : memref<128x128xf32, #tpu.memory_space<vmem>>, vector<128x128xf32>
      tpu.vector_store %arg6[%c0_16, %c0_17], %20 {strides = array<i32>} : memref<128x128xf32, #tpu.memory_space<vmem>>, vector<128x128xf32>,
    } else {
    }
    return
  }
  func.func @transform_0(%arg0: i32, %arg1: i32, %arg2: i32) -> (i32, i32) {
    %c0_i32 = arith.constant 0 : i32
    return %arg0, %arg2 : i32, i32
  }
  func.func @transform_1(%arg0: i32, %arg1: i32, %arg2: i32) -> (i32, i32) {
    %c0_i32 = arith.constant 0 : i32
    return %arg2, %arg1 : i32, i32
  }
  func.func @transform_2(%arg0: i32, %arg1: i32, %arg2: i32) -> (i32, i32) {
    %c0_i32 = arith.constant 0 : i32
    %c0_i32_0 = arith.constant 0 : i32
    return %c0_i32, %arg1 : i32, i32
  }
  func.func @transform_3(%arg0: i32, %arg1: i32, %arg2: i32) -> (i32, i32) {
    %c0_i32 = arith.constant 0 : i32
    return %arg0, %arg1 : i32, i32
  }
}

module attributes {stable_mosaic.version = 11 : i64} {
  func.func @_fused_matmul_kernel(%arg0: i32, %arg1: i32, %arg2: i32, %arg3: memref<128x64xbf16, #tpu.memory_space<vmem>>, %arg4: memref<64x128xbf16, #tpu.memory_space<vmem>>, %arg5: memref<1x128xf32, #tpu.memory_space<vmem>>, %arg6: memref<128x128xf32, #tpu.memory_space<vmem>>, %arg7: memref<128x128xf32, #tpu.memory_space<vmem>>) attributes {dimension_semantics = [#tpu.dimension_semantics<parallel>, #tpu.dimension_semantics<parallel>, #tpu.dimension_semantics<arbitrary>], iteration_bounds = array<i64: 2, 1, 1>, scalar_prefetch = 0 : i64, scratch_operands = 1 : i64, tpu.core_type = #tpu.core_type<tc>, window_params = [{transform_indices = @transform_0, window_bounds = array<i64: 128, 64>}, {transform_indices = @transform_1, window_bounds = array<i64: 64, 128>}, {transform_indices = @transform_2, window_bounds = array<i64: 1, 128>}, {transform_indices = @transform_3, window_bounds = array<i64: 128, 128>}]} {
    %c0_i32 = arith.constant 0 : i32
    %0 = arith.cmpi eq, %arg2, %c0_i32 : i32
    %1 = arith.extui %0 : i1 to i32
    %c0_i32_0 = arith.constant 0 : i32
    %2 = arith.cmpi ne, %1, %c0_i32_0 : i32
    scf.if %2 {
      %cst_10 = arith.constant 0.000000e+00 : f32
      %12 = vector.broadcast %cst_10 : f32 to vector<128x128xf32>
      %c0_11 = arith.constant 0 : index
      %c0_12 = arith.constant 0 : index
      %13 = vector.load %arg7[%c0_11, %c0_12] : memref<128x128xf32, #tpu.memory_space<vmem>>, vector<128x128xf32>
      tpu.vector_store %arg7[%c0_11, %c0_12], %12 {strides = array<i32>} : memref<128x128xf32, #tpu.memory_space<vmem>>, vector<128x128xf32>,
    } else {
    }
    %c0 = arith.constant 0 : index
    %c0_1 = arith.constant 0 : index
    %3 = vector.load %arg7[%c0, %c0_1] : memref<128x128xf32, #tpu.memory_space<vmem>>, vector<128x128xf32>
    %c0_2 = arith.constant 0 : index
    %c0_3 = arith.constant 0 : index
    %4 = vector.load %arg3[%c0_2, %c0_3] : memref<128x64xbf16, #tpu.memory_space<vmem>>, vector<128x64xbf16>
    %c0_4 = arith.constant 0 : index
    %c0_5 = arith.constant 0 : index
    %5 = vector.load %arg4[%c0_4, %c0_5] : memref<64x128xbf16, #tpu.memory_space<vmem>>, vector<64x128xbf16>
    %cst = arith.constant dense<0.000000e+00> : vector<128x128xf32>
    %6 = tpu.matmul %4, %5, %cst {dimension_numbers = #tpu.dot_dimension_numbers<[1], [0], [0], [1], [0, 0, 1, 1], [], []>} : vector<128x64xbf16>, vector<64x128xbf16>, vector<128x128xf32> -> vector<128x128xf32>
    %7 = arith.addf %3, %6 : vector<128x128xf32>
    %c0_6 = arith.constant 0 : index
    %c0_7 = arith.constant 0 : index
    %8 = vector.load %arg7[%c0_6, %c0_7] : memref<128x128xf32, #tpu.memory_space<vmem>>, vector<128x128xf32>
    tpu.vector_store %arg7[%c0_6, %c0_7], %7 {strides = array<i32>} : memref<128x128xf32, #tpu.memory_space<vmem>>, vector<128x128xf32>,
    %c0_i32_8 = arith.constant 0 : i32
    %9 = arith.cmpi eq, %arg2, %c0_i32_8 : i32
    %10 = arith.extui %9 : i1 to i32
    %c0_i32_9 = arith.constant 0 : i32
    %11 = arith.cmpi ne, %10, %c0_i32_9 : i32
    scf.if %11 {
      %c0_10 = arith.constant 0 : index
      %c0_11 = arith.constant 0 : index
      %12 = vector.load %arg7[%c0_10, %c0_11] : memref<128x128xf32, #tpu.memory_space<vmem>>, vector<128x128xf32>
      %c0_12 = arith.constant 0 : index
      %c0_13 = arith.constant 0 : index
      %13 = vector.load %arg5[%c0_12, %c0_13] : memref<1x128xf32, #tpu.memory_space<vmem>>, vector<1x128xf32>
      %14 = vector.broadcast %13 : vector<1x128xf32> to vector<128x128xf32>
      %15 = arith.addf %12, %14 : vector<128x128xf32>
      %cst_14 = arith.constant 0.000000e+00 : f32
      %16 = vector.broadcast %cst_14 : f32 to vector<128x128xf32>
      %17 = arith.cmpf oge, %15, %16 : vector<128x128xf32>
      %cst_15 = arith.constant 2.000000e-01 : f32
      %18 = vector.broadcast %cst_15 : f32 to vector<128x128xf32>
      %19 = arith.mulf %18, %15 : vector<128x128xf32>
      %20 = arith.select %17, %15, %19 : vector<128x128xi1>, vector<128x128xf32>
      %c0_16 = arith.constant 0 : index
      %c0_17 = arith.constant 0 : index
      %21 = vector.load %arg6[%c0_16, %c0_17] : memref<128x128xf32, #tpu.memory_space<vmem>>, vector<128x128xf32>
      tpu.vector_store %arg6[%c0_16, %c0_17], %20 {strides = array<i32>} : memref<128x128xf32, #tpu.memory_space<vmem>>, vector<128x128xf32>,
    } else {
    }
    return
  }
  func.func @transform_0(%arg0: i32, %arg1: i32, %arg2: i32) -> (i32, i32) {
    %c0_i32 = arith.constant 0 : i32
    return %arg0, %arg2 : i32, i32
  }
  func.func @transform_1(%arg0: i32, %arg1: i32, %arg2: i32) -> (i32, i32) {
    %c0_i32 = arith.constant 0 : i32
    return %arg2, %arg1 : i32, i32
  }
  func.func @transform_2(%arg0: i32, %arg1: i32, %arg2: i32) -> (i32, i32) {
    %c0_i32 = arith.constant 0 : i32
    %c0_i32_0 = arith.constant 0 : i32
    return %c0_i32, %arg1 : i32, i32
  }
  func.func @transform_3(%arg0: i32, %arg1: i32, %arg2: i32) -> (i32, i32) {
    %c0_i32 = arith.constant 0 : i32
    return %arg0, %arg1 : i32, i32
  }
}

module attributes {stable_mosaic.version = 11 : i64} {
  func.func @_fused_matmul_kernel(%arg0: i32, %arg1: i32, %arg2: i32, %arg3: memref<64x512xbf16, #tpu.memory_space<vmem>>, %arg4: memref<512x128xbf16, #tpu.memory_space<vmem>>, %arg5: memref<1x128xf32, #tpu.memory_space<vmem>>, %arg6: memref<64x128xf32, #tpu.memory_space<vmem>>, %arg7: memref<64x128xf32, #tpu.memory_space<vmem>>) attributes {dimension_semantics = [#tpu.dimension_semantics<parallel>, #tpu.dimension_semantics<parallel>, #tpu.dimension_semantics<arbitrary>], iteration_bounds = array<i64: 1, 1, 2>, scalar_prefetch = 0 : i64, scratch_operands = 1 : i64, tpu.core_type = #tpu.core_type<tc>, window_params = [{transform_indices = @transform_0, window_bounds = array<i64: 64, 512>}, {transform_indices = @transform_1, window_bounds = array<i64: 512, 128>}, {transform_indices = @transform_2, window_bounds = array<i64: 1, 128>}, {transform_indices = @transform_3, window_bounds = array<i64: 64, 128>}]} {
    %c0_i32 = arith.constant 0 : i32
    %0 = arith.cmpi eq, %arg2, %c0_i32 : i32
    %1 = arith.extui %0 : i1 to i32
    %c0_i32_0 = arith.constant 0 : i32
    %2 = arith.cmpi ne, %1, %c0_i32_0 : i32
    scf.if %2 {
      %cst_9 = arith.constant 0.000000e+00 : f32
      %12 = vector.broadcast %cst_9 : f32 to vector<64x128xf32>
      %c0_10 = arith.constant 0 : index
      %c0_11 = arith.constant 0 : index
      %13 = vector.load %arg7[%c0_10, %c0_11] : memref<64x128xf32, #tpu.memory_space<vmem>>, vector<64x128xf32>
      tpu.vector_store %arg7[%c0_10, %c0_11], %12 {strides = array<i32>} : memref<64x128xf32, #tpu.memory_space<vmem>>, vector<64x128xf32>,
    } else {
    }
    %c0 = arith.constant 0 : index
    %c0_1 = arith.constant 0 : index
    %3 = vector.load %arg7[%c0, %c0_1] : memref<64x128xf32, #tpu.memory_space<vmem>>, vector<64x128xf32>
    %c0_2 = arith.constant 0 : index
    %c0_3 = arith.constant 0 : index
    %4 = vector.load %arg3[%c0_2, %c0_3] : memref<64x512xbf16, #tpu.memory_space<vmem>>, vector<64x512xbf16>
    %c0_4 = arith.constant 0 : index
    %c0_5 = arith.constant 0 : index
    %5 = vector.load %arg4[%c0_4, %c0_5] : memref<512x128xbf16, #tpu.memory_space<vmem>>, vector<512x128xbf16>
    %cst = arith.constant dense<0.000000e+00> : vector<64x128xf32>
    %6 = tpu.matmul %4, %5, %cst {dimension_numbers = #tpu.dot_dimension_numbers<[1], [0], [0], [1], [0, 0, 1, 1], [], []>} : vector<64x512xbf16>, vector<512x128xbf16>, vector<64x128xf32> -> vector<64x128xf32>
    %7 = arith.addf %3, %6 : vector<64x128xf32>
    %c0_6 = arith.constant 0 : index
    %c0_7 = arith.constant 0 : index
    %8 = vector.load %arg7[%c0_6, %c0_7] : memref<64x128xf32, #tpu.memory_space<vmem>>, vector<64x128xf32>
    tpu.vector_store %arg7[%c0_6, %c0_7], %7 {strides = array<i32>} : memref<64x128xf32, #tpu.memory_space<vmem>>, vector<64x128xf32>,
    %c1_i32 = arith.constant 1 : i32
    %9 = arith.cmpi eq, %arg2, %c1_i32 : i32
    %10 = arith.extui %9 : i1 to i32
    %c0_i32_8 = arith.constant 0 : i32
    %11 = arith.cmpi ne, %10, %c0_i32_8 : i32
    scf.if %11 {
      %c0_9 = arith.constant 0 : index
      %c0_10 = arith.constant 0 : index
      %12 = vector.load %arg7[%c0_9, %c0_10] : memref<64x128xf32, #tpu.memory_space<vmem>>, vector<64x128xf32>
      %c0_11 = arith.constant 0 : index
      %c0_12 = arith.constant 0 : index
      %13 = vector.load %arg5[%c0_11, %c0_12] : memref<1x128xf32, #tpu.memory_space<vmem>>, vector<1x128xf32>
      %14 = vector.broadcast %13 : vector<1x128xf32> to vector<64x128xf32>
      %15 = arith.addf %12, %14 : vector<64x128xf32>
      %cst_13 = arith.constant 0.000000e+00 : f32
      %16 = vector.broadcast %cst_13 : f32 to vector<64x128xf32>
      %17 = arith.cmpf oge, %15, %16 : vector<64x128xf32>
      %cst_14 = arith.constant 2.000000e-01 : f32
      %18 = vector.broadcast %cst_14 : f32 to vector<64x128xf32>
      %19 = arith.mulf %18, %15 : vector<64x128xf32>
      %20 = arith.select %17, %15, %19 : vector<64x128xi1>, vector<64x128xf32>
      %c0_15 = arith.constant 0 : index
      %c0_16 = arith.constant 0 : index
      %21 = vector.load %arg6[%c0_15, %c0_16] : memref<64x128xf32, #tpu.memory_space<vmem>>, vector<64x128xf32>
      tpu.vector_store %arg6[%c0_15, %c0_16], %20 {strides = array<i32>} : memref<64x128xf32, #tpu.memory_space<vmem>>, vector<64x128xf32>,
    } else {
    }
    return
  }
  func.func @transform_0(%arg0: i32, %arg1: i32, %arg2: i32) -> (i32, i32) {
    %c0_i32 = arith.constant 0 : i32
    return %arg0, %arg2 : i32, i32
  }
  func.func @transform_1(%arg0: i32, %arg1: i32, %arg2: i32) -> (i32, i32) {
    %c0_i32 = arith.constant 0 : i32
    return %arg2, %arg1 : i32, i32
  }
  func.func @transform_2(%arg0: i32, %arg1: i32, %arg2: i32) -> (i32, i32) {
    %c0_i32 = arith.constant 0 : i32
    %c0_i32_0 = arith.constant 0 : i32
    return %c0_i32, %arg1 : i32, i32
  }
  func.func @transform_3(%arg0: i32, %arg1: i32, %arg2: i32) -> (i32, i32) {
    %c0_i32 = arith.constant 0 : i32
    return %arg0, %arg1 : i32, i32
  }
}

module attributes {stable_mosaic.version = 11 : i64} {
  func.func @_fc_head_kernel(%arg0: i32, %arg1: memref<4x512xbf16, #tpu.memory_space<vmem>>, %arg2: memref<512x1024xbf16, #tpu.memory_space<vmem>>, %arg3: memref<1x1024xf32, #tpu.memory_space<vmem>>, %arg4: memref<1024x128xbf16, #tpu.memory_space<vmem>>, %arg5: memref<1x128xf32, #tpu.memory_space<vmem>>, %arg6: memref<4x128xf32, #tpu.memory_space<vmem>>, %arg7: memref<4x1024xf32, #tpu.memory_space<vmem>>) attributes {dimension_semantics = [#tpu.dimension_semantics<arbitrary>], iteration_bounds = array<i64: 4>, scalar_prefetch = 0 : i64, scratch_operands = 1 : i64, tpu.core_type = #tpu.core_type<tc>, window_params = [{transform_indices = @transform_0, window_bounds = array<i64: 4, 512>}, {transform_indices = @transform_1, window_bounds = array<i64: 512, 1024>}, {pipeline_mode = #tpu.pipeline_mode<synchronous>, transform_indices = @transform_2, window_bounds = array<i64: 1, 1024>}, {pipeline_mode = #tpu.pipeline_mode<synchronous>, transform_indices = @transform_3, window_bounds = array<i64: 1024, 128>}, {pipeline_mode = #tpu.pipeline_mode<synchronous>, transform_indices = @transform_4, window_bounds = array<i64: 1, 128>}, {pipeline_mode = #tpu.pipeline_mode<synchronous>, transform_indices = @transform_5, window_bounds = array<i64: 4, 128>}]} {
    %c0_i32 = arith.constant 0 : i32
    %0 = arith.cmpi eq, %arg0, %c0_i32 : i32
    %1 = arith.extui %0 : i1 to i32
    %c0_i32_0 = arith.constant 0 : i32
    %2 = arith.cmpi ne, %1, %c0_i32_0 : i32
    scf.if %2 {
      %cst_9 = arith.constant 0.000000e+00 : f32
      %12 = vector.broadcast %cst_9 : f32 to vector<4x1024xf32>
      %c0_10 = arith.constant 0 : index
      %c0_11 = arith.constant 0 : index
      %13 = vector.load %arg7[%c0_10, %c0_11] : memref<4x1024xf32, #tpu.memory_space<vmem>>, vector<4x1024xf32>
      tpu.vector_store %arg7[%c0_10, %c0_11], %12 {strides = array<i32>} : memref<4x1024xf32, #tpu.memory_space<vmem>>, vector<4x1024xf32>,
    } else {
    }
    %c0 = arith.constant 0 : index
    %c0_1 = arith.constant 0 : index
    %3 = vector.load %arg7[%c0, %c0_1] : memref<4x1024xf32, #tpu.memory_space<vmem>>, vector<4x1024xf32>
    %c0_2 = arith.constant 0 : index
    %c0_3 = arith.constant 0 : index
    %4 = vector.load %arg1[%c0_2, %c0_3] : memref<4x512xbf16, #tpu.memory_space<vmem>>, vector<4x512xbf16>
    %c0_4 = arith.constant 0 : index
    %c0_5 = arith.constant 0 : index
    %5 = vector.load %arg2[%c0_4, %c0_5] : memref<512x1024xbf16, #tpu.memory_space<vmem>>, vector<512x1024xbf16>
    %cst = arith.constant dense<0.000000e+00> : vector<4x1024xf32>
    %6 = tpu.matmul %4, %5, %cst {dimension_numbers = #tpu.dot_dimension_numbers<[1], [0], [0], [1], [0, 0, 1, 1], [], []>} : vector<4x512xbf16>, vector<512x1024xbf16>, vector<4x1024xf32> -> vector<4x1024xf32>
    %7 = arith.addf %3, %6 : vector<4x1024xf32>
    %c0_6 = arith.constant 0 : index
    %c0_7 = arith.constant 0 : index
    %8 = vector.load %arg7[%c0_6, %c0_7] : memref<4x1024xf32, #tpu.memory_space<vmem>>, vector<4x1024xf32>
    tpu.vector_store %arg7[%c0_6, %c0_7], %7 {strides = array<i32>} : memref<4x1024xf32, #tpu.memory_space<vmem>>, vector<4x1024xf32>,
    %c3_i32 = arith.constant 3 : i32
    %9 = arith.cmpi eq, %arg0, %c3_i32 : i32
    %10 = arith.extui %9 : i1 to i32
    %c0_i32_8 = arith.constant 0 : i32
    %11 = arith.cmpi ne, %10, %c0_i32_8 : i32
    scf.if %11 {
      %c0_9 = arith.constant 0 : index
      %c0_10 = arith.constant 0 : index
      %12 = vector.load %arg7[%c0_9, %c0_10] : memref<4x1024xf32, #tpu.memory_space<vmem>>, vector<4x1024xf32>
      %c0_11 = arith.constant 0 : index
      %c0_12 = arith.constant 0 : index
      %13 = vector.load %arg3[%c0_11, %c0_12] : memref<1x1024xf32, #tpu.memory_space<vmem>>, vector<1x1024xf32>
      %14 = vector.broadcast %13 : vector<1x1024xf32> to vector<4x1024xf32>
      %15 = arith.addf %12, %14 : vector<4x1024xf32>
      %cst_13 = arith.constant 0.000000e+00 : f32
      %16 = vector.broadcast %cst_13 : f32 to vector<4x1024xf32>
      %17 = arith.cmpf oge, %15, %16 : vector<4x1024xf32>
      %cst_14 = arith.constant 2.000000e-01 : f32
      %18 = vector.broadcast %cst_14 : f32 to vector<4x1024xf32>
      %19 = arith.mulf %18, %15 : vector<4x1024xf32>
      %20 = arith.select %17, %15, %19 : vector<4x1024xi1>, vector<4x1024xf32>
      %21 = arith.truncf %20 : vector<4x1024xf32> to vector<4x1024xbf16>
      %c0_15 = arith.constant 0 : index
      %c0_16 = arith.constant 0 : index
      %22 = vector.load %arg4[%c0_15, %c0_16] : memref<1024x128xbf16, #tpu.memory_space<vmem>>, vector<1024x128xbf16>
      %cst_17 = arith.constant dense<0.000000e+00> : vector<4x128xf32>
      %23 = tpu.matmul %21, %22, %cst_17 {dimension_numbers = #tpu.dot_dimension_numbers<[1], [0], [0], [1], [0, 0, 1, 1], [], []>} : vector<4x1024xbf16>, vector<1024x128xbf16>, vector<4x128xf32> -> vector<4x128xf32>
      %c0_18 = arith.constant 0 : index
      %c0_19 = arith.constant 0 : index
      %24 = vector.load %arg5[%c0_18, %c0_19] : memref<1x128xf32, #tpu.memory_space<vmem>>, vector<1x128xf32>
      %25 = vector.broadcast %24 : vector<1x128xf32> to vector<4x128xf32>
      %26 = arith.addf %23, %25 : vector<4x128xf32>
      %c0_20 = arith.constant 0 : index
      %c0_21 = arith.constant 0 : index
      %27 = vector.load %arg6[%c0_20, %c0_21] : memref<4x128xf32, #tpu.memory_space<vmem>>, vector<4x128xf32>
      tpu.vector_store %arg6[%c0_20, %c0_21], %26 {strides = array<i32>} : memref<4x128xf32, #tpu.memory_space<vmem>>, vector<4x128xf32>,
    } else {
    }
    return
  }
  func.func @transform_0(%arg0: i32) -> (i32, i32) {
    %c0_i32 = arith.constant 0 : i32
    %c0_i32_0 = arith.constant 0 : i32
    return %c0_i32, %arg0 : i32, i32
  }
  func.func @transform_1(%arg0: i32) -> (i32, i32) {
    %c0_i32 = arith.constant 0 : i32
    %c0_i32_0 = arith.constant 0 : i32
    return %arg0, %c0_i32 : i32, i32
  }
  func.func @transform_2(%arg0: i32) -> (i32, i32) {
    %c0_i32 = arith.constant 0 : i32
    %c0_i32_0 = arith.constant 0 : i32
    %c0_i32_1 = arith.constant 0 : i32
    return %c0_i32, %c0_i32_0 : i32, i32
  }
  func.func @transform_3(%arg0: i32) -> (i32, i32) {
    %c0_i32 = arith.constant 0 : i32
    %c0_i32_0 = arith.constant 0 : i32
    %c0_i32_1 = arith.constant 0 : i32
    return %c0_i32, %c0_i32_0 : i32, i32
  }
  func.func @transform_4(%arg0: i32) -> (i32, i32) {
    %c0_i32 = arith.constant 0 : i32
    %c0_i32_0 = arith.constant 0 : i32
    %c0_i32_1 = arith.constant 0 : i32
    return %c0_i32, %c0_i32_0 : i32, i32
  }
  func.func @transform_5(%arg0: i32) -> (i32, i32) {
    %c0_i32 = arith.constant 0 : i32
    %c0_i32_0 = arith.constant 0 : i32
    %c0_i32_1 = arith.constant 0 : i32
    return %c0_i32, %c0_i32_0 : i32, i32
  }
}

</mosaic_0001>

<bundles_post_ra>
// kernel: joint_adversary_forward.4
= control target key start
LH: loop header
LB: loop body
LE: loop exit
PB: predicated region body
PF: predicated region fallthrough
CT: control target
= control target key end

     0   :  { %8 = vsyncpa [#allocation4], 0  ;;  %s1107_s0 = inlined_call_operand.vmem [shape: bf16[512,27], index: 0, kind: input, shape index: {}]   ;;  %s1108_s1 = inlined_call_operand.hbm [shape: bf16[27,128], index: 1, kind: input, shape index: {}]   ;;  %s1109_s2 = inlined_call_operand.hbm [shape: f32[1,128], index: 2, kind: input, shape index: {}]   ;;  %s1110_s3 = inlined_call_operand.vmem [shape: f32[512,128], index: 3, kind: output, shape index: {}]  }
   0x1   :  { %9 = vsyncpa [#allocation6], 0  ;;  %s978_s12 = smov 0   ;;  %s980_s13 = smov 0  }
   0x2   :  { %s982_s14 = smov 0  }
   0x3 LB: > { %s743_s15 = sadd.s32 4294967295, %s951_s14   ;;  %s34_s16 = sadd.s32 1, %s947_s13  ;;  %s951_s14 = sphi %s982_s14, %s15_s14   ;;  %s947_s13 = sphi %s980_s13, %s1115_s13   ;;  %s943_s12 = sphi %s978_s12, %s1114_s12  }
   0x4   : > { %p36_p0 = scmp.ge.s32.totalorder %s34_s16, 4  ;;  %p745_p1 = scmp.ge.s32.totalorder %s951_s14, 1 }
   0x5   : > { %p149_p2 = scmp.lt.s32.totalorder %s951_s14, 5  ;;  %p1003_p4 = scmp.eq.s32.totalorder %s743_s15, 0 }
   0x6   : > { %s1117_s16 = smov (%p36_p0, %s34_s16), 0  ;;  %s953_s19 = smov [#allocation3]  }
   0x7   : > { %p999_p3 = pnand %p745_p1, %p149_p2  ;;  %s165_s20 = sshll.u32 %s953_s19, 4  ;;  %s166_s20 = int_to_ptr.vmem [resolvable:$true] %s165_s20 }
   0x8   : > { %s954_s22 = smov [#allocation5]   ;;  %s880_s24 = scalar_lea.vmem %s166_s20, 256 }
   0x9   : > { %p819_p5 = pneg %p999_p3  ;;  %s181_s23 = sshll.u32 %s954_s22, 4  ;;  %s182_s23 = int_to_ptr.vmem [resolvable:$true] %s181_s23 }
   0xa   : > { %p881_p8 = scmp.ne.s32.totalorder %s166_s20, %s880_s24  ;;  %p888_p11 = scmp.lt.s32.totalorder %s166_s20, %s166_s20 }
   0xb   : > { %p1011_p6 = pnand %p1003_p4, %p819_p5  ;;  %p889_p12 = scmp.lt.s32.totalorder %s880_s24, %s880_s24 }
   0xd   : > { %p871_p7 = pneg %p1011_p6  ;;  %p890_p13 = por %p889_p12, %p888_p11 }
   0xf   : > { %p883_p9 = pnand %p881_p8, %p871_p7 }
  0x11   : > { %p884_p10 = pneg %p883_p9 }
  0x13   : > { %p891_p0 = pnand %p890_p13, %p884_p10 }
  0x15   : > { %894 = shalt.err (!%p891_p0)
}
  0x16   : > { %s955_s25 = smov 64   ;;  %s956_s26 = smov 4  }
  0x17   : > { %822 = dma.hbm_to_vmem [thread:$0]  (!%p1011_p6), %s1108_s1, 256, %s166_s20, [#allocation4], %s955_s25, %s955_s25, %s956_s26  }
  0x18   : > { %s906_s29 = scalar_lea.vmem %s182_s23, 16  ;;  %s913_s30 = scalar_lea.vmem %s182_s23, 32 }
  0x19   : > { %p907_p1 = scmp.ne.s32.totalorder %s182_s23, %s906_s29  ;;  %p914_p8 = scmp.lt.s32.totalorder %s182_s23, %s182_s23 }
  0x1a   : > { %p915_p9 = scmp.lt.s32.totalorder %s913_s30, %s906_s29 }
  0x1b   : > { %p909_p2 = pnand %p907_p1, %p871_p7 }
  0x1c   : > { %p916_p10 = por %p915_p9, %p914_p8 }
  0x1d   : > { %p910_p5 = pneg %p909_p2 }
  0x1f   : > { %p917_p11 = pnand %p916_p10, %p910_p5 }
  0x21   : > { %920 = shalt.err (!%p917_p11)
}
  0x22   : > { %825 = dma.hbm_to_vmem [thread:$0]  (!%p1011_p6), %s1109_s2, 16, %s182_s23, [#allocation6]  }
  0x23   : > { %206 = sbr.rel (%p999_p3) target bundleno = 270 (0x10e), region = 32 }
  0x28   : > { %934 = dma.done.wait (%p1003_p4), [#allocation4], 256  }
  0x29   : > { %936 = vsyncadd (%p1003_p4), [#allocation4], 4294967040 }
  0x2a   : > { %938 = dma.done.wait (%p1003_p4), [#allocation6], 16  }
  0x2b   : > { %940 = vsyncadd (%p1003_p4), [#allocation6], 4294967280  ;;  %vm392_vm0 = vcmask 1044480   ;;  %s752_s6 = sshll.u32 %s943_s12, 4  ;;  %vm393_vm1 = vcmask 1045504   ;;  %v957_v0 = vmov 65535  }
  0x2c   : > { %p241_p7 = scmp.lt.s32.totalorder %s752_s6, 63  ;;  %v394_v1 = vsel %vm392_vm0, 4294967295, %v957_v0  ;;  %v859_v3 = vld [vmem:[#allocation3 + $0x8] sm:$0x3f]   ;;  %v860_v4 = vld [vmem:[#allocation3] sm:$0xff]   ;;  %vm367_vm2 = vcmask 220160  }
  0x2d   : > { %v395_v2 = vsel %vm393_vm1, %v394_v1, 0  ;;  %v1058_v14 = vld [vmem:[#allocation5] ss:$0 sm:$0xff] }
  0x2e   : > { %s1119_s6 = smov (!%p241_p7, %s752_s6), 63  ;;  %v397_v5 = vand.u32 %v859_v3, %v395_v2 }
  0x2f   : > { %s753_s7 = sshll.u32 %s1119_s6, 2  ;;  %s755_s11 = sshll.u32 %s1119_s6, 3 }
  0x30   : > { %s247_s10 = scalar_lea.vmem %s1107_s0, %s753_s7  ;;  %787 = vmatprep.subr.bf16.mxu0 %v397_v5  ;;  %807 = vmatprep.subr.bf16.mxu1 %v397_v5  ;;  %s1066_s17 = scalar_lea.vmem %s1110_s3, %s755_s11 }
  0x31   : > { %v861_v6 = vld [vmem:[%s247_s10] sm:$0xff]   ;;  %788 = vmatpush3.bf16.msra.mxu0 %v397_v5  ;;  %809 = vmatpush3.bf16.msra.mxu1 %v397_v5  ;;  %v863_v8 = vld [vmem:[%s247_s10 + $0x8] sm:$0xff]   ;;  %v865_v10 = vld [vmem:[%s247_s10 + $0x10] sm:$0xff]  }
  0x32   : > { %v862_v7 = vld [vmem:[%s247_s10 + $0x20] sm:$0xff]   ;;  %789 = vmatprep.subr.bf16.mxu0 %v860_v4  ;;  %808 = vmatprep.subr.bf16.mxu1 %v860_v4  ;;  %v864_v9 = vld [vmem:[%s247_s10 + $0x28] sm:$0xff]   ;;  %v866_v11 = vld [vmem:[%s247_s10 + $0x30] sm:$0xff]  }
  0x33   : > { %791 = vmatprep.mubr.msk.bf16.mxu0 %vm367_vm2, %v861_v6  ;;  %799 = vmatprep.mubr.msk.bf16.mxu1 %vm367_vm2, %v862_v7  ;;  %v867_v12 = vld [vmem:[%s247_s10 + $0x18] sm:$0xff]  }
  0x34   : > { %v868_v13 = vld [vmem:[%s247_s10 + $0x38] sm:$0xff]  }
  0x35   : > { %790 = vmatpush3.bf16.msra.mxu0 %v860_v4  ;;  %810 = vmatpush3.bf16.msra.mxu1 %v860_v4 }
  0x38   : > { %792 = vmatmul.mubr.msk.bf16.vlgmr.msra.gmra.mxu0 %vm367_vm2, %v863_v8  ;;  %800 = vmatmul.mubr.msk.bf16.vlgmr.msra.gmra.mxu1 %vm367_vm2, %v864_v9 }
  0x39   : > { %795 = vmatprep.mubr.msk.bf16.mxu0 %vm367_vm2, %v865_v10  ;;  %803 = vmatprep.mubr.msk.bf16.mxu1 %vm367_vm2, %v866_v11 }
  0x40   : > { %796 = vmatmul.mubr.msk.bf16.gmra.mxu0 %vm367_vm2, %v867_v12  ;;  %804 = vmatmul.mubr.msk.bf16.gmra.mxu1 %vm367_vm2, %v868_v13 }
  0xf8   : > { %v793_v15 = vpop.f32.mrf.mxu0  ;;  %v801_v16 = vpop.f32.mrf.mxu1 }
  0xf9   : > { %v556_v17 = vadd.f32 %v793_v15, %v1058_v14  ;;  %v564_v18 = vadd.f32 %v801_v16, %v1058_v14 }
  0xfa   : > { %v433_v19 = vpop.f32.mrf.mxu0  ;;  %v465_v20 = vpop.f32.mrf.mxu1 }
  0xfb   : > { %vm572_vm3 = vcmp.ge.f32.partialorder %v556_v17, 0.0  ;;  %v588_v21 = vmul.f32 0.2, %v556_v17  ;;  %vm580_vm4 = vcmp.ge.f32.partialorder %v564_v18, 0.0  ;;  %v596_v22 = vmul.f32 0.2, %v564_v18 }
  0xfc   : > { %v554_v23 = vadd.f32 %v1058_v14, %v433_v19  ;;  %v562_v24 = vadd.f32 %v1058_v14, %v465_v20  ;;  %v794_v25 = vpop.f32.mrf.mxu0  ;;  %v802_v26 = vpop.f32.mrf.mxu1 }
  0xfd   : > { %v604_v27 = vsel %vm572_vm3, %v556_v17, %v588_v21  ;;  %v612_v28 = vsel %vm580_vm4, %v564_v18, %v596_v22  ;;  %v557_v29 = vadd.f32 %v794_v25, %v1058_v14  ;;  %v565_v30 = vadd.f32 %v802_v26, %v1058_v14 }
  0xfe   : > { %620 = vst [vmem:[%s1066_s17 + $0x10] sm:$0xff] %v604_v27  ;;  %628 = vst [vmem:[%s1066_s17 + $0x50] sm:$0xff] %v612_v28  ;;  %vm570_vm5 = vcmp.ge.f32.partialorder %v554_v23, 0.0  ;;  %v586_v31 = vmul.f32 0.2, %v554_v23  ;;  %vm578_vm6 = vcmp.ge.f32.partialorder %v562_v24, 0.0  ;;  %v436_v33 = vpop.f32.mrf.mxu0  ;;  %v468_v34 = vpop.f32.mrf.mxu1 }
  0xff   : > { %v594_v32 = vmul.f32 0.2, %v562_v24  ;;  %vm573_vm7 = vcmp.ge.f32.partialorder %v557_v29, 0.0  ;;  %v589_v35 = vmul.f32 0.2, %v557_v29  ;;  %vm581_vm8 = vcmp.ge.f32.partialorder %v565_v30, 0.0 }
 0x100   : > { %v597_v36 = vmul.f32 0.2, %v565_v30  ;;  %v602_v37 = vsel %vm570_vm5, %v554_v23, %v586_v31  ;;  %v555_v39 = vadd.f32 %v1058_v14, %v436_v33  ;;  %v563_v40 = vadd.f32 %v1058_v14, %v468_v34  ;;  %v797_v41 = vpop.f32.mrf.mxu0  ;;  %v805_v42 = vpop.f32.mrf.mxu1 }
 0x101   : > { %v610_v38 = vsel %vm578_vm6, %v562_v24, %v594_v32  ;;  %618 = vst [vmem:[%s1066_s17] sm:$0xff] %v602_v37  ;;  %v605_v43 = vsel %vm573_vm7, %v557_v29, %v589_v35  ;;  %v560_v45 = vadd.f32 %v797_v41, %v1058_v14  ;;  %v568_v46 = vadd.f32 %v805_v42, %v1058_v14 }
 0x102   : > { %626 = vst [vmem:[%s1066_s17 + $0x40] sm:$0xff] %v610_v38  ;;  %v613_v44 = vsel %vm581_vm8, %v565_v30, %v597_v36  ;;  %621 = vst [vmem:[%s1066_s17 + $0x18] sm:$0xff] %v605_v43  ;;  %vm571_vm9 = vcmp.ge.f32.partialorder %v555_v39, 0.0  ;;  %v587_v47 = vmul.f32 0.2, %v555_v39  ;;  %vm579_vm10 = vcmp.ge.f32.partialorder %v563_v40, 0.0  ;;  %v449_v49 = vpop.f32.mrf.mxu0  ;;  %v481_v50 = vpop.f32.mrf.mxu1 }
 0x103   : > { %629 = vst [vmem:[%s1066_s17 + $0x58] sm:$0xff] %v613_v44  ;;  %v595_v48 = vmul.f32 0.2, %v563_v40  ;;  %vm576_vm11 = vcmp.ge.f32.partialorder %v560_v45, 0.0  ;;  %v592_v51 = vmul.f32 0.2, %v560_v45  ;;  %v558_v55 = vadd.f32 %v1058_v14, %v449_v49 }
 0x104   : > { %vm584_vm12 = vcmp.ge.f32.partialorder %v568_v46, 0.0  ;;  %v600_v52 = vmul.f32 0.2, %v568_v46  ;;  %v603_v53 = vsel %vm571_vm9, %v555_v39, %v587_v47  ;;  %v566_v56 = vadd.f32 %v1058_v14, %v481_v50  ;;  %v798_v57 = vpop.f32.mrf.mxu0  ;;  %v806_v58 = vpop.f32.mrf.mxu1 }
 0x105   : > { %v611_v54 = vsel %vm579_vm10, %v563_v40, %v595_v48  ;;  %619 = vst [vmem:[%s1066_s17 + $0x8] sm:$0xff] %v603_v53  ;;  %v608_v59 = vsel %vm576_vm11, %v560_v45, %v592_v51  ;;  %v561_v61 = vadd.f32 %v798_v57, %v1058_v14  ;;  %v569_v62 = vadd.f32 %v806_v58, %v1058_v14 }
 0x106   : > { %627 = vst [vmem:[%s1066_s17 + $0x48] sm:$0xff] %v611_v54  ;;  %v616_v60 = vsel %vm584_vm12, %v568_v46, %v600_v52  ;;  %624 = vst [vmem:[%s1066_s17 + $0x30] sm:$0xff] %v608_v59  ;;  %vm574_vm13 = vcmp.ge.f32.partialorder %v558_v55, 0.0  ;;  %v590_v63 = vmul.f32 0.2, %v558_v55  ;;  %vm582_vm14 = vcmp.ge.f32.partialorder %v566_v56, 0.0  ;;  %v452_v1 = vpop.f32.mrf.mxu0  ;;  %v484_v2 = vpop.f32.mrf.mxu1 }
 0x107   : > { %632 = vst [vmem:[%s1066_s17 + $0x70] sm:$0xff] %v616_v60  ;;  %v598_v0 = vmul.f32 0.2, %v566_v56  ;;  %vm577_vm15 = vcmp.ge.f32.partialorder %v561_v61, 0.0  ;;  %v593_v3 = vmul.f32 0.2, %v561_v61  ;;  %v559_v7 = vadd.f32 %v1058_v14, %v452_v1 }
 0x108   : > { %vm585_vm0 = vcmp.ge.f32.partialorder %v569_v62, 0.0  ;;  %v601_v4 = vmul.f32 0.2, %v569_v62  ;;  %v606_v5 = vsel %vm574_vm13, %v558_v55, %v590_v63  ;;  %v567_v8 = vadd.f32 %v1058_v14, %v484_v2 }
 0x109   : > { %v614_v6 = vsel %vm582_vm14, %v566_v56, %v598_v0  ;;  %622 = vst [vmem:[%s1066_s17 + $0x20] sm:$0xff] %v606_v5  ;;  %v609_v9 = vsel %vm577_vm15, %v561_v61, %v593_v3  ;;  %vm575_vm1 = vcmp.ge.f32.partialorder %v559_v7, 0.0  ;;  %v591_v11 = vmul.f32 0.2, %v559_v7 }
 0x10a   : > { %630 = vst [vmem:[%s1066_s17 + $0x60] sm:$0xff] %v614_v6  ;;  %v617_v10 = vsel %vm585_vm0, %v569_v62, %v601_v4  ;;  %625 = vst [vmem:[%s1066_s17 + $0x38] sm:$0xff] %v609_v9  ;;  %vm583_vm2 = vcmp.ge.f32.partialorder %v567_v8, 0.0  ;;  %v599_v12 = vmul.f32 0.2, %v567_v8 }
 0x10b   : > { %633 = vst [vmem:[%s1066_s17 + $0x78] sm:$0xff] %v617_v10  ;;  %v607_v13 = vsel %vm575_vm1, %v559_v7, %v591_v11 }
 0x10c   : > { %v615_v15 = vsel %vm583_vm2, %v567_v8, %v599_v12  ;;  %623 = vst [vmem:[%s1066_s17 + $0x28] sm:$0xff] %v607_v13 }
 0x10d   : > { %631 = vst [vmem:[%s1066_s17 + $0x68] sm:$0xff] %v615_v15 }
 0x10e PF: > { %s15_s14 = sadd.s32 1, %s951_s14   ;;  %s1114_s12 = smov %s947_s13 }
 0x10f   : > { %p12_p3 = scmp.ge.s32.totalorder %s15_s14, 6   ;;  %s1115_s13 = smov %s1117_s16 }
 0x111   :  { %14 = sbr.rel (!%p12_p3) target bundleno = 3 (0x3), region = 81 }
 0x116   :  { %662 = vsyncpa [#allocation4], 1 }
 0x117   :  { %664 = vsyncpa [#allocation4 + $0x1], 1 }
 0x118   :  { %665 = vsyncpa [#allocation6], 1 }

// kernel: joint_adversary_forward.5
= control target key start
LH: loop header
LB: loop body
LE: loop exit
PB: predicated region body
PF: predicated region fallthrough
CT: control target
= control target key end

     0   :  { %s913_s12 = smov 0   ;;  %s915_s13 = smov 0   ;;  %s1009_s0 = inlined_call_operand.vmem [shape: bf16[256,64], index: 0, kind: input, shape index: {}]   ;;  %s1010_s1 = inlined_call_operand.vmem [shape: bf16[64,128], index: 1, kind: input, shape index: {}]   ;;  %s1011_s2 = inlined_call_operand.vmem [shape: f32[1,128], index: 2, kind: input, shape index: {}]   ;;  %s1012_s3 = inlined_call_operand.vmem [shape: f32[256,128], index: 3, kind: output, shape index: {}]  }
   0x1   :  { %s917_s14 = smov 0  }
   0x2 LB: > { %s32_s15 = sadd.s32 1, %s887_s13  ;;  %p761_p0 = scmp.ge.s32.totalorder %s891_s14, 1  ;;  %s891_s14 = sphi %s917_s14, %s13_s14   ;;  %s887_s13 = sphi %s915_s13, %s1014_s13   ;;  %s883_s12 = sphi %s913_s12, %s1013_s12  }
   0x3   : > { %p34_p1 = scmp.ge.s32.totalorder %s32_s15, 2  ;;  %p188_p2 = scmp.lt.s32.totalorder %s891_s14, 3 }
   0x5   : > { %s1016_s15 = smov (%p34_p1, %s32_s15), 0  ;;  %p189_p3 = pnand %p761_p0, %p188_p2 }
   0x6   : > { %s762_s18 = sshll.u32 (!%p189_p3), %s883_s12, 4 }
   0x7   : > { %192 = sbr.rel (%p189_p3) target bundleno = 243 (0xf3), region = 32  ;;  %p230_p4 = scmp.lt.s32.totalorder (!%p189_p3), %s762_s18, 31 }
   0xc   : > { %v857_v0 = vld [vmem:[%s1010_s1 + $0x18] sm:$0xff]   ;;  %v858_v1 = vld [vmem:[%s1010_s1 + $0x10] sm:$0xff]   ;;  %s1018_s18 = smov (!%p230_p4, %s762_s18), 31  ;;  %v859_v2 = vld [vmem:[%s1010_s1 + $0x8] sm:$0xff]   ;;  %vm384_vm0 = vcmask 523264  }
   0xd   : > { %801 = vmatprep.subr.bf16.mxu0 %v857_v0  ;;  %825 = vmatprep.subr.bf16.mxu1 %v857_v0  ;;  %s763_s23 = sshll.u32 %s1018_s18, 2  ;;  %v860_v3 = vld [vmem:[%s1010_s1] sm:$0xff]   ;;  %s765_s4 = sshll.u32 %s1018_s18, 3 }
   0xe   : > { %802 = vmatpush3.bf16.msra.mxu0 %v857_v0  ;;  %829 = vmatpush3.bf16.msra.mxu1 %v857_v0  ;;  %s236_s28 = scalar_lea.vmem %s1009_s0, %s763_s23  ;;  %v960_v12 = vld [vmem:[%s1011_s2] ss:$0 sm:$0xff]  ;;  %s968_s7 = scalar_lea.vmem %s1012_s3, %s765_s4 }
   0xf   : > { %803 = vmatprep.subr.bf16.mxu0 %v858_v1  ;;  %826 = vmatprep.subr.bf16.mxu1 %v858_v1  ;;  %v861_v4 = vld [vmem:[%s236_s28] sm:$0xff]   ;;  %v863_v6 = vld [vmem:[%s236_s28 + $0x8] sm:$0xff]   ;;  %v865_v8 = vld [vmem:[%s236_s28 + $0x10] sm:$0xff]  }
  0x10   : > { %v862_v5 = vld [vmem:[%s236_s28 + $0x20] sm:$0xff]   ;;  %809 = vmatprep.mubr.msk.bf16.mxu0 %vm384_vm0, %v861_v4  ;;  %v864_v7 = vld [vmem:[%s236_s28 + $0x28] sm:$0xff]   ;;  %v866_v9 = vld [vmem:[%s236_s28 + $0x30] sm:$0xff]  }
  0x11   : > { %817 = vmatprep.mubr.msk.bf16.mxu1 %vm384_vm0, %v862_v5  ;;  %v867_v10 = vld [vmem:[%s236_s28 + $0x18] sm:$0xff]  }
  0x12   : > { %804 = vmatpush3.bf16.msra.mxu0 %v858_v1  ;;  %830 = vmatpush3.bf16.msra.mxu1 %v858_v1  ;;  %v868_v11 = vld [vmem:[%s236_s28 + $0x38] sm:$0xff]  }
  0x13   : > { %805 = vmatprep.subr.bf16.mxu0 %v859_v2  ;;  %827 = vmatprep.subr.bf16.mxu1 %v859_v2 }
  0x16   : > { %806 = vmatpush3.bf16.msra.mxu0 %v859_v2  ;;  %831 = vmatpush3.bf16.msra.mxu1 %v859_v2 }
  0x17   : > { %807 = vmatprep.subr.bf16.mxu0 %v860_v3  ;;  %828 = vmatprep.subr.bf16.mxu1 %v860_v3 }
  0x1a   : > { %808 = vmatpush3.bf16.msra.mxu0 %v860_v3  ;;  %832 = vmatpush3.bf16.msra.mxu1 %v860_v3 }
  0x1d   : > { %810 = vmatmul.mubr.msk.bf16.vlgmr.msra.gmra.mxu0 %vm384_vm0, %v863_v6  ;;  %818 = vmatmul.mubr.msk.bf16.vlgmr.msra.gmra.mxu1 %vm384_vm0, %v864_v7 }
  0x1e   : > { %813 = vmatprep.mubr.msk.bf16.mxu0 %vm384_vm0, %v865_v8  ;;  %821 = vmatprep.mubr.msk.bf16.mxu1 %vm384_vm0, %v866_v9 }
  0x25   : > { %814 = vmatmul.mubr.msk.bf16.gmra.mxu0 %vm384_vm0, %v867_v10  ;;  %822 = vmatmul.mubr.msk.bf16.gmra.mxu1 %vm384_vm0, %v868_v11 }
  0xdd   : > { %v811_v13 = vpop.f32.mrf.mxu0  ;;  %v819_v14 = vpop.f32.mrf.mxu1 }
  0xde   : > { %v566_v15 = vadd.f32 %v811_v13, %v960_v12  ;;  %v574_v16 = vadd.f32 %v819_v14, %v960_v12 }
  0xdf   : > { %v443_v17 = vpop.f32.mrf.mxu0  ;;  %v475_v18 = vpop.f32.mrf.mxu1 }
  0xe0   : > { %vm582_vm1 = vcmp.ge.f32.partialorder %v566_v15, 0.0  ;;  %v598_v19 = vmul.f32 0.2, %v566_v15  ;;  %vm590_vm2 = vcmp.ge.f32.partialorder %v574_v16, 0.0  ;;  %v606_v20 = vmul.f32 0.2, %v574_v16 }
  0xe1   : > { %v564_v21 = vadd.f32 %v960_v12, %v443_v17  ;;  %v572_v22 = vadd.f32 %v960_v12, %v475_v18  ;;  %v812_v23 = vpop.f32.mrf.mxu0  ;;  %v820_v24 = vpop.f32.mrf.mxu1 }
  0xe2   : > { %v614_v25 = vsel %vm582_vm1, %v566_v15, %v598_v19  ;;  %v622_v26 = vsel %vm590_vm2, %v574_v16, %v606_v20  ;;  %v567_v27 = vadd.f32 %v812_v23, %v960_v12  ;;  %v575_v28 = vadd.f32 %v820_v24, %v960_v12 }
  0xe3   : > { %630 = vst [vmem:[%s968_s7 + $0x10] sm:$0xff] %v614_v25  ;;  %638 = vst [vmem:[%s968_s7 + $0x50] sm:$0xff] %v622_v26  ;;  %vm580_vm3 = vcmp.ge.f32.partialorder %v564_v21, 0.0  ;;  %v596_v29 = vmul.f32 0.2, %v564_v21  ;;  %vm588_vm4 = vcmp.ge.f32.partialorder %v572_v22, 0.0  ;;  %v446_v31 = vpop.f32.mrf.mxu0  ;;  %v478_v32 = vpop.f32.mrf.mxu1 }
  0xe4   : > { %v604_v30 = vmul.f32 0.2, %v572_v22  ;;  %vm583_vm5 = vcmp.ge.f32.partialorder %v567_v27, 0.0  ;;  %v599_v33 = vmul.f32 0.2, %v567_v27  ;;  %vm591_vm6 = vcmp.ge.f32.partialorder %v575_v28, 0.0 }
  0xe5   : > { %v607_v34 = vmul.f32 0.2, %v575_v28  ;;  %v612_v35 = vsel %vm580_vm3, %v564_v21, %v596_v29  ;;  %v565_v37 = vadd.f32 %v960_v12, %v446_v31  ;;  %v573_v38 = vadd.f32 %v960_v12, %v478_v32  ;;  %v815_v39 = vpop.f32.mrf.mxu0  ;;  %v823_v40 = vpop.f32.mrf.mxu1 }
  0xe6   : > { %v620_v36 = vsel %vm588_vm4, %v572_v22, %v604_v30  ;;  %628 = vst [vmem:[%s968_s7] sm:$0xff] %v612_v35  ;;  %v615_v41 = vsel %vm583_vm5, %v567_v27, %v599_v33  ;;  %v570_v43 = vadd.f32 %v815_v39, %v960_v12  ;;  %v578_v44 = vadd.f32 %v823_v40, %v960_v12 }
  0xe7   : > { %636 = vst [vmem:[%s968_s7 + $0x40] sm:$0xff] %v620_v36  ;;  %v623_v42 = vsel %vm591_vm6, %v575_v28, %v607_v34  ;;  %631 = vst [vmem:[%s968_s7 + $0x18] sm:$0xff] %v615_v41  ;;  %vm581_vm7 = vcmp.ge.f32.partialorder %v565_v37, 0.0  ;;  %v597_v45 = vmul.f32 0.2, %v565_v37  ;;  %vm589_vm8 = vcmp.ge.f32.partialorder %v573_v38, 0.0  ;;  %v459_v47 = vpop.f32.mrf.mxu0  ;;  %v491_v48 = vpop.f32.mrf.mxu1 }
  0xe8   : > { %639 = vst [vmem:[%s968_s7 + $0x58] sm:$0xff] %v623_v42  ;;  %v605_v46 = vmul.f32 0.2, %v573_v38  ;;  %vm586_vm9 = vcmp.ge.f32.partialorder %v570_v43, 0.0  ;;  %v602_v49 = vmul.f32 0.2, %v570_v43  ;;  %v568_v53 = vadd.f32 %v960_v12, %v459_v47 }
  0xe9   : > { %vm594_vm10 = vcmp.ge.f32.partialorder %v578_v44, 0.0  ;;  %v610_v50 = vmul.f32 0.2, %v578_v44  ;;  %v613_v51 = vsel %vm581_vm7, %v565_v37, %v597_v45  ;;  %v576_v54 = vadd.f32 %v960_v12, %v491_v48  ;;  %v816_v55 = vpop.f32.mrf.mxu0  ;;  %v824_v56 = vpop.f32.mrf.mxu1 }
  0xea   : > { %v621_v52 = vsel %vm589_vm8, %v573_v38, %v605_v46  ;;  %629 = vst [vmem:[%s968_s7 + $0x8] sm:$0xff] %v613_v51  ;;  %v618_v57 = vsel %vm586_vm9, %v570_v43, %v602_v49  ;;  %v571_v59 = vadd.f32 %v816_v55, %v960_v12  ;;  %v579_v60 = vadd.f32 %v824_v56, %v960_v12 }
  0xeb   : > { %637 = vst [vmem:[%s968_s7 + $0x48] sm:$0xff] %v621_v52  ;;  %v626_v58 = vsel %vm594_vm10, %v578_v44, %v610_v50  ;;  %634 = vst [vmem:[%s968_s7 + $0x30] sm:$0xff] %v618_v57  ;;  %vm584_vm11 = vcmp.ge.f32.partialorder %v568_v53, 0.0  ;;  %v600_v61 = vmul.f32 0.2, %v568_v53  ;;  %vm592_vm12 = vcmp.ge.f32.partialorder %v576_v54, 0.0  ;;  %v462_v63 = vpop.f32.mrf.mxu0  ;;  %v494_v0 = vpop.f32.mrf.mxu1 }
  0xec   : > { %642 = vst [vmem:[%s968_s7 + $0x70] sm:$0xff] %v626_v58  ;;  %v608_v62 = vmul.f32 0.2, %v576_v54  ;;  %vm587_vm13 = vcmp.ge.f32.partialorder %v571_v59, 0.0  ;;  %v603_v1 = vmul.f32 0.2, %v571_v59  ;;  %v569_v5 = vadd.f32 %v960_v12, %v462_v63 }
  0xed   : > { %vm595_vm14 = vcmp.ge.f32.partialorder %v579_v60, 0.0  ;;  %v611_v2 = vmul.f32 0.2, %v579_v60  ;;  %v616_v3 = vsel %vm584_vm11, %v568_v53, %v600_v61  ;;  %v577_v6 = vadd.f32 %v960_v12, %v494_v0 }
  0xee   : > { %v624_v4 = vsel %vm592_vm12, %v576_v54, %v608_v62  ;;  %632 = vst [vmem:[%s968_s7 + $0x20] sm:$0xff] %v616_v3  ;;  %v619_v7 = vsel %vm587_vm13, %v571_v59, %v603_v1  ;;  %vm585_vm15 = vcmp.ge.f32.partialorder %v569_v5, 0.0  ;;  %v601_v9 = vmul.f32 0.2, %v569_v5 }
  0xef   : > { %640 = vst [vmem:[%s968_s7 + $0x60] sm:$0xff] %v624_v4  ;;  %v627_v8 = vsel %vm595_vm14, %v579_v60, %v611_v2  ;;  %635 = vst [vmem:[%s968_s7 + $0x38] sm:$0xff] %v619_v7  ;;  %vm593_vm0 = vcmp.ge.f32.partialorder %v577_v6, 0.0  ;;  %v609_v10 = vmul.f32 0.2, %v577_v6 }
  0xf0   : > { %643 = vst [vmem:[%s968_s7 + $0x78] sm:$0xff] %v627_v8  ;;  %v617_v11 = vsel %vm585_vm15, %v569_v5, %v601_v9 }
  0xf1   : > { %v625_v13 = vsel %vm593_vm0, %v577_v6, %v609_v10  ;;  %633 = vst [vmem:[%s968_s7 + $0x28] sm:$0xff] %v617_v11 }
  0xf2   : > { %641 = vst [vmem:[%s968_s7 + $0x68] sm:$0xff] %v625_v13 }
  0xf3 PF: > { %s13_s14 = sadd.s32 1, %s891_s14   ;;  %s1013_s12 = smov %s887_s13 }
  0xf4   : > { %p10_p5 = scmp.ge.s32.totalorder %s13_s14, 4   ;;  %s1014_s13 = smov %s1016_s15 }
  0xf6   :  { %12 = sbr.rel (!%p10_p5) target bundleno = 2 (0x2), region = 76 }

// kernel: joint_adversary_forward.6
= control target key start
LH: loop header
LB: loop body
LE: loop exit
PB: predicated region body
PF: predicated region fallthrough
CT: control target
= control target key end

     0   :  { %s1297_s12 = smov 0   ;;  %s1299_s13 = smov 0   ;;  %s1461_s0 = inlined_call_operand.vmem [shape: bf16[64,1024], index: 0, kind: input, shape index: {}]   ;;  %s1462_s1 = inlined_call_operand.vmem [shape: bf16[1024,128], index: 1, kind: input, shape index: {}]   ;;  %s1463_s2 = inlined_call_operand.vmem [shape: f32[1,128], index: 2, kind: input, shape index: {}]   ;;  %s1464_s3 = inlined_call_operand.vmem [shape: f32[64,128], index: 3, kind: output, shape index: {}]  }
   0x1   :  { %s1301_s14 = smov 0   ;;  %s1303_s15 = smov 0  }
   0x2   :  { %s1305_s16 = smov 0  }
   0x3 LB: > { %s25_s17 = sadd.s32 1, %s1270_s15  ;;  %p48_p1 = scmp.ne.s32.totalorder %s1262_s13, %s1258_s12  ;;  %s1274_s16 = sphi %s1305_s16, %s13_s16   ;;  %s1270_s15 = sphi %s1303_s15, %s1468_s15   ;;  %s1266_s14 = sphi %s1301_s14, %s1467_s14   ;;  %s1262_s13 = sphi %s1299_s13, %s1466_s13   ;;  %s1258_s12 = sphi %s1297_s12, %s1465_s12  }
   0x4   : > { %p26_p0 = scmp.ge.s32.totalorder %s25_s17, 2  ;;  %p49_p2 = scmp.eq.s32.totalorder %s1274_s16, 0 }
   0x5   : > { %s41_s19 = sadd.s32 1, %s1262_s13  ;;  %p995_p5 = scmp.ge.s32.totalorder %s1274_s16, 2 }
   0x6   : > { %s1470_s17 = smov (%p26_p0, %s25_s17), 0  ;;  %p50_p3 = por %p49_p2, %p48_p1 }
   0x7   : > { %s37_s18 = ssub.s32 %s1270_s15, %s1470_s17  ;;  %162 = sbr.rel (%p995_p5) target bundleno = 24 (0x18), region = 20 }
   0x8   : > { %p39_p4 = scmp.eq.s32.totalorder %s37_s18, 0 }
   0xa   : > { %s1332_s20 = scalar_select %p39_p4, %s1262_s13, %s41_s19  }
   0xc   : > { %165 = sbr.rel (!%p50_p3) target bundleno = 24 (0x18), region = 24  ;;  %s167_s21 = sand.u32 (%p50_p3), 1, %s1262_s13  }
   0xd   : > { %s1058_s22 = sshll.u32 (%p50_p3), %s1270_s15, 4  ;;  %s996_s23 = sshll.u32 (%p50_p3), %s167_s21, 7 }
   0xe   : > { %s1340_s26 = scalar_lea.vmem (%p50_p3), %s1461_s0, %s1058_s22  ;;  %s169_s27 = scalar_lea.vmem (%p50_p3), [#allocation3], %s996_s23 }
   0xf   : > { %v188_v0 = vld [vmem:[%s1340_s26] sm:$0xff] (%p50_p3)  ;;  %v190_v1 = vld [vmem:[%s1340_s26 + $0x8] sm:$0xff] (%p50_p3) }
  0x10   : > { %v192_v2 = vld [vmem:[%s1340_s26 + $0x20] sm:$0xff] (%p50_p3)  ;;  %189 = vst [vmem:[%s169_s27] sm:$0xff] (%p50_p3), %v188_v0  ;;  %191 = vst [vmem:[%s169_s27 + $0x8] sm:$0xff] (%p50_p3), %v190_v1  ;;  %v194_v3 = vld [vmem:[%s1340_s26 + $0x28] sm:$0xff] (%p50_p3) }
  0x11   : > { %193 = vst [vmem:[%s169_s27 + $0x10] sm:$0xff] %v192_v2  ;;  %v196_v4 = vld [vmem:[%s1340_s26 + $0x40] sm:$0xff]  ;;  %v198_v5 = vld [vmem:[%s1340_s26 + $0x48] sm:$0xff]  ;;  %195 = vst [vmem:[%s169_s27 + $0x18] sm:$0xff] %v194_v3 }
  0x12   : > { %197 = vst [vmem:[%s169_s27 + $0x20] sm:$0xff] %v196_v4  ;;  %199 = vst [vmem:[%s169_s27 + $0x28] sm:$0xff] %v198_v5  ;;  %v200_v6 = vld [vmem:[%s1340_s26 + $0x60] sm:$0xff]  ;;  %v202_v7 = vld [vmem:[%s1340_s26 + $0x68] sm:$0xff] }
  0x13   : > { %v204_v8 = vld [vmem:[%s1340_s26 + $0x80] sm:$0xff]  ;;  %201 = vst [vmem:[%s169_s27 + $0x30] sm:$0xff] %v200_v6  ;;  %203 = vst [vmem:[%s169_s27 + $0x38] sm:$0xff] %v202_v7  ;;  %v206_v9 = vld [vmem:[%s1340_s26 + $0x88] sm:$0xff] }
  0x14   : > { %205 = vst [vmem:[%s169_s27 + $0x40] sm:$0xff] %v204_v8  ;;  %v208_v10 = vld [vmem:[%s1340_s26 + $0xa0] sm:$0xff]  ;;  %v210_v11 = vld [vmem:[%s1340_s26 + $0xa8] sm:$0xff]  ;;  %207 = vst [vmem:[%s169_s27 + $0x48] sm:$0xff] %v206_v9 }
  0x15   : > { %209 = vst [vmem:[%s169_s27 + $0x50] sm:$0xff] %v208_v10  ;;  %211 = vst [vmem:[%s169_s27 + $0x58] sm:$0xff] %v210_v11  ;;  %v212_v12 = vld [vmem:[%s1340_s26 + $0xc0] sm:$0xff]  ;;  %v214_v13 = vld [vmem:[%s1340_s26 + $0xc8] sm:$0xff] }
  0x16   : > { %v216_v14 = vld [vmem:[%s1340_s26 + $0xe0] sm:$0xff]  ;;  %213 = vst [vmem:[%s169_s27 + $0x60] sm:$0xff] %v212_v12  ;;  %215 = vst [vmem:[%s169_s27 + $0x68] sm:$0xff] %v214_v13  ;;  %v218_v15 = vld [vmem:[%s1340_s26 + $0xe8] sm:$0xff] }
  0x17   : > { %217 = vst [vmem:[%s169_s27 + $0x70] sm:$0xff] %v216_v14  ;;  %219 = vst [vmem:[%s169_s27 + $0x78] sm:$0xff] %v218_v15 }
  0x18 PF: > { %p999_p6 = scmp.ge.s32.totalorder %s1274_s16, 1  ;;  %p236_p7 = scmp.lt.s32.totalorder %s1274_s16, 3 }
  0x1a   : > { %p237_p8 = pnand %p999_p6, %p236_p7 }
  0x1b   : > { %s243_s28 = sand.u32 (!%p237_p8), 1, %s1258_s12   ;;  %s1001_s29 = sshll.u32 (!%p237_p8), %s1266_s14, 6 }
  0x1c   : > { %240 = sbr.rel (%p237_p8) target bundleno = 321 (0x141), region = 51  ;;  %s1000_s30 = sshll.u32 (!%p237_p8), %s243_s28, 7 }
  0x1d   : > { %p283_p9 = scmp.lt.s32.totalorder (!%p237_p8), %s1001_s29, 127  ;;  %s1367_s8 = scalar_lea.vmem (!%p237_p8), [#allocation3], %s1000_s30 }
  0x1e   : > { %p1003_p10 = scmp.ne.s32.totalorder (!%p237_p8), %s1266_s14, 0 }
  0x21   : > { %s1472_s29 = smov (!%p283_p9, %s1001_s29), 127  ;;  %307 = sbr.rel (%p1003_p10) target bundleno = 43 (0x2b), region = 59 }
  0x22   : > { %s1002_s4 = sshll.u32 %s1472_s29, 2 }
  0x23   : > { %s1365_s7 = scalar_lea.vmem %s1462_s1, %s1002_s4 }
  0x26   : > { %v1276_v16 = vmov 0.0  }
  0x27   : > { %308 = vst [vmem:[#allocation2 + $0x30] sm:$0xff] %v1276_v16  ;;  %309 = vst [vmem:[#allocation2] sm:$0xff] %v1276_v16 }
  0x28   : > { %310 = vst [vmem:[#allocation2 + $0x18] sm:$0xff] %v1276_v16  ;;  %311 = vst [vmem:[#allocation2 + $0x10] sm:$0xff] %v1276_v16 }
  0x29   : > { %312 = vst [vmem:[#allocation2 + $0x8] sm:$0xff] %v1276_v16  ;;  %313 = vst [vmem:[#allocation2 + $0x20] sm:$0xff] %v1276_v16 }
  0x2a   : > { %314 = vst [vmem:[#allocation2 + $0x28] sm:$0xff] %v1276_v16  ;;  %315 = vst [vmem:[#allocation2 + $0x38] sm:$0xff] %v1276_v16 }
  0x2b PF: > { %v1180_v17 = vld [vmem:[%s1365_s7 + $0x78] sm:$0xff]   ;;  %v1184_v21 = vld [vmem:[%s1365_s7 + $0x70] sm:$0xff]   ;;  %v1188_v25 = vld [vmem:[%s1365_s7 + $0x68] sm:$0xff]   ;;  %p1052_p11 = scmp.ne.s32.totalorder %s1266_s14, 1 }
  0x2c   : > { %v1181_v18 = vld [vmem:[%s1365_s7 + $0xf8] sm:$0xff]   ;;  %1059 = vmatprep.subr.bf16.mxu0 %v1180_v17  ;;  %v1185_v22 = vld [vmem:[%s1365_s7 + $0xf0] sm:$0xff]   ;;  %v1189_v26 = vld [vmem:[%s1365_s7 + $0xe8] sm:$0xff]  }
  0x2d   : > { %v1182_v19 = vld [vmem:[%s1365_s7 + $0x38] sm:$0xff]   ;;  %1099 = vmatprep.subr.bf16.mxu1 %v1181_v18  ;;  %v1186_v23 = vld [vmem:[%s1365_s7 + $0x30] sm:$0xff]   ;;  %v1190_v27 = vld [vmem:[%s1365_s7 + $0x28] sm:$0xff]  }
  0x2e   : > { %v1183_v20 = vld [vmem:[%s1365_s7 + $0xb8] sm:$0xff]   ;;  %1060 = vmatpush3.bf16.msra.mxu0 %v1182_v19  ;;  %v1187_v24 = vld [vmem:[%s1365_s7 + $0xb0] sm:$0xff]   ;;  %v1191_v28 = vld [vmem:[%s1365_s7 + $0xa8] sm:$0xff]  }
  0x2f   : > { %1100 = vmatpush3.bf16.msra.mxu1 %v1183_v20  ;;  %1061 = vmatprep.subr.bf16.mxu0 %v1184_v21  ;;  %v1192_v29 = vld [vmem:[%s1365_s7 + $0x60] sm:$0xff]   ;;  %v1196_v33 = vld [vmem:[%s1365_s7 + $0x58] sm:$0xff]   ;;  %v1200_v37 = vld [vmem:[%s1365_s7 + $0x50] sm:$0xff]  }
  0x30   : > { %1101 = vmatprep.subr.bf16.mxu1 %v1185_v22  ;;  %v1193_v30 = vld [vmem:[%s1365_s7 + $0xe0] sm:$0xff]   ;;  %v1197_v34 = vld [vmem:[%s1365_s7 + $0xd8] sm:$0xff]   ;;  %v1201_v38 = vld [vmem:[%s1365_s7 + $0xd0] sm:$0xff]  }
  0x31   : > { %v1194_v31 = vld [vmem:[%s1365_s7 + $0x20] sm:$0xff]   ;;  %v1198_v35 = vld [vmem:[%s1365_s7 + $0x18] sm:$0xff]   ;;  %v1202_v39 = vld [vmem:[%s1365_s7 + $0x10] sm:$0xff]  }
  0x32   : > { %1062 = vmatpush3.bf16.msra.mxu0 %v1186_v23  ;;  %v1195_v32 = vld [vmem:[%s1365_s7 + $0xa0] sm:$0xff]   ;;  %v1199_v36 = vld [vmem:[%s1365_s7 + $0x98] sm:$0xff]   ;;  %v1203_v40 = vld [vmem:[%s1365_s7 + $0x90] sm:$0xff]  }
  0x33   : > { %1102 = vmatpush3.bf16.msra.mxu1 %v1187_v24  ;;  %1063 = vmatprep.subr.bf16.mxu0 %v1188_v25  ;;  %v1204_v41 = vld [vmem:[%s1365_s7 + $0x48] sm:$0xff]   ;;  %v1208_v45 = vld [vmem:[%s1365_s7 + $0x40] sm:$0xff]   ;;  %v316_v8 = vld [vmem:[#allocation2 + $0x30] sm:$0xff] }
  0x34   : > { %1103 = vmatprep.subr.bf16.mxu1 %v1189_v26  ;;  %v1205_v42 = vld [vmem:[%s1365_s7 + $0xc8] sm:$0xff]   ;;  %v1209_v46 = vld [vmem:[%s1365_s7 + $0xc0] sm:$0xff]   ;;  %v318_v26 = vld [vmem:[#allocation2 + $0x18] sm:$0xff] }
  0x35   : > { %v1206_v43 = vld [vmem:[%s1365_s7 + $0x8] sm:$0xff]   ;;  %v1210_v47 = vld [vmem:[%s1365_s7] sm:$0xff]  }
  0x36   : > { %1064 = vmatpush3.bf16.msra.mxu0 %v1190_v27  ;;  %v1207_v44 = vld [vmem:[%s1365_s7 + $0x88] sm:$0xff]   ;;  %v1211_v48 = vld [vmem:[%s1365_s7 + $0x80] sm:$0xff]  }
  0x37   : > { %1104 = vmatpush3.bf16.msra.mxu1 %v1191_v28  ;;  %1065 = vmatprep.subr.bf16.mxu0 %v1192_v29  ;;  %v1212_v49 = vld [vmem:[%s1367_s8] ss:$16 sps:$4 sm:$0xff]   ;;  %v1214_v50 = vld [vmem:[%s1367_s8 + $0x4] ss:$16 sps:$4 sm:$0xff]   ;;  %v1215_v51 = vld [vmem:[%s1367_s8 + $0x8] ss:$16 sps:$4 sm:$0xff]  }
  0x38   : > { %1105 = vmatprep.subr.bf16.mxu1 %v1193_v30  ;;  %v1217_v52 = vld [vmem:[%s1367_s8 + $0xc] ss:$16 sps:$4 sm:$0xff]   ;;  %708 = vmatprep.mubr.bf16.mxu0 %v1214_v50  ;;  %v1218_v53 = vld [vmem:[%s1367_s8 + $0x24] ss:$16 sps:$4 sm:$0xff]   ;;  %v1222_v55 = vld [vmem:[%s1367_s8 + $0x20] ss:$16 sps:$4 sm:$0xff]  }
  0x39   : > { %773 = vmatprep.mubr.bf16.mxu1 %v1217_v52  ;;  %v1220_v54 = vld [vmem:[%s1367_s8 + $0x2c] ss:$16 sps:$4 sm:$0xff]   ;;  %v1223_v56 = vld [vmem:[%s1367_s8 + $0x28] ss:$16 sps:$4 sm:$0xff]   ;;  %v1224_v57 = vld [vmem:[%s1367_s8 + $0x44] ss:$16 sps:$4 sm:$0xff]  }
  0x3a   : > { %1066 = vmatpush3.bf16.msra.mxu0 %v1194_v31  ;;  %v1226_v58 = vld [vmem:[%s1367_s8 + $0x4c] ss:$16 sps:$4 sm:$0xff]   ;;  %v1228_v59 = vld [vmem:[%s1367_s8 + $0x40] ss:$16 sps:$4 sm:$0xff]   ;;  %v1229_v60 = vld [vmem:[%s1367_s8 + $0x48] ss:$16 sps:$4 sm:$0xff]  }
  0x3b   : > { %1106 = vmatpush3.bf16.msra.mxu1 %v1195_v32  ;;  %1067 = vmatprep.subr.bf16.mxu0 %v1196_v33  ;;  %v1230_v61 = vld [vmem:[%s1367_s8 + $0x64] ss:$16 sps:$4 sm:$0xff]   ;;  %v1232_v62 = vld [vmem:[%s1367_s8 + $0x6c] ss:$16 sps:$4 sm:$0xff]   ;;  %v1234_v63 = vld [vmem:[%s1367_s8 + $0x60] ss:$16 sps:$4 sm:$0xff]  }
  0x3c   : > { %1107 = vmatprep.subr.bf16.mxu1 %v1197_v34  ;;  %v1235_v0 = vld [vmem:[%s1367_s8 + $0x68] ss:$16 sps:$4 sm:$0xff]   ;;  %v317_v17 = vld [vmem:[#allocation2] sm:$0xff] }
  0x3e   : > { %1068 = vmatpush3.bf16.msra.mxu0 %v1198_v35  ;;  %v319_v35 = vld [vmem:[#allocation2 + $0x10] sm:$0xff] }
  0x3f   : > { %1108 = vmatpush3.bf16.msra.mxu1 %v1199_v36  ;;  %1069 = vmatprep.subr.bf16.mxu0 %v1200_v37 }
  0x40   : > { %1109 = vmatprep.subr.bf16.mxu1 %v1201_v38 }
  0x42   : > { %1070 = vmatpush3.bf16.msra.mxu0 %v1202_v39 }
  0x43   : > { %1110 = vmatpush3.bf16.msra.mxu1 %v1203_v40  ;;  %1071 = vmatprep.subr.bf16.mxu0 %v1204_v41 }
  0x44   : > { %1111 = vmatprep.subr.bf16.mxu1 %v1205_v42 }
  0x46   : > { %1072 = vmatpush3.bf16.msra.mxu0 %v1206_v43 }
  0x47   : > { %1112 = vmatpush3.bf16.msra.mxu1 %v1207_v44  ;;  %1073 = vmatprep.subr.bf16.mxu0 %v1208_v45  ;;  %v320_v44 = vld [vmem:[#allocation2 + $0x8] sm:$0xff] }
  0x48   : > { %1113 = vmatprep.subr.bf16.mxu1 %v1209_v46 }
  0x4a   : > { %1074 = vmatpush3.bf16.msra.mxu0 %v1210_v47 }
  0x4b   : > { %1114 = vmatpush3.bf16.msra.mxu1 %v1211_v48 }
  0x4d   : > { %709 = vmatmul.mubr.bf16.vlgmr.msra.gmra.mxu0 %v1212_v49 }
  0x4e   : > { %774 = vmatmul.mubr.bf16.vlgmr.msra.gmra.mxu1 %v1215_v51  ;;  %716 = vmatprep.mubr.bf16.mxu0 %v1218_v53  ;;  %v321_v53 = vld [vmem:[#allocation2 + $0x20] sm:$0xff] }
  0x4f   : > { %781 = vmatprep.mubr.bf16.mxu1 %v1220_v54 }
  0x55   : > { %717 = vmatmul.mubr.bf16.gmra.mxu0 %v1222_v55 }
  0x56   : > { %782 = vmatmul.mubr.bf16.gmra.mxu1 %v1223_v56  ;;  %724 = vmatprep.mubr.bf16.mxu0 %v1224_v57 }
  0x57   : > { %789 = vmatprep.mubr.bf16.mxu1 %v1226_v58 }
  0x5d   : > { %725 = vmatmul.mubr.bf16.gmra.mxu0 %v1228_v59 }
  0x5e   : > { %790 = vmatmul.mubr.bf16.gmra.mxu1 %v1229_v60  ;;  %732 = vmatprep.mubr.bf16.mxu0 %v1230_v61 }
  0x5f   : > { %797 = vmatprep.mubr.bf16.mxu1 %v1232_v62  ;;  %v322_v62 = vld [vmem:[#allocation2 + $0x28] sm:$0xff] }
  0x65   : > { %733 = vmatmul.mubr.bf16.gmra.mxu0 %v1234_v63 }
  0x66   : > { %798 = vmatmul.mubr.bf16.gmra.mxu1 %v1235_v0 }
 0x10d   : > { %v1075_v1 = vpop.f32.mrf.mxu0 }
 0x10e   : > { %v1115_v2 = vpop.f32.mrf.mxu1 }
 0x10f   : > { %v1076_v3 = vpop.f32.mrf.mxu0 }
 0x110   : > { %v1077_v4 = vadd.f32 %v1076_v3, %v1075_v1  ;;  %v1116_v5 = vpop.f32.mrf.mxu1 }
 0x111   : > { %v1117_v6 = vadd.f32 %v1116_v5, %v1115_v2  ;;  %v1078_v7 = vpop.f32.mrf.mxu0 }
 0x112   : > { %v1118_v9 = vpop.f32.mrf.mxu1 }
 0x113   : > { %v776_v10 = vadd.f32 %v1117_v6, %v1077_v4  ;;  %v1079_v11 = vpop.f32.mrf.mxu0  ;;  %v323_v6 = vld [vmem:[#allocation2 + $0x38] sm:$0xff] }
 0x114   : > { %v1080_v12 = vadd.f32 %v1079_v11, %v1078_v7  ;;  %v1119_v13 = vpop.f32.mrf.mxu1 }
 0x115   : > { %v806_v14 = vadd.f32 %v776_v10, %v316_v8  ;;  %v1120_v15 = vadd.f32 %v1119_v13, %v1118_v9  ;;  %v1081_v16 = vpop.f32.mrf.mxu0 }
 0x116   : > { %v1121_v18 = vpop.f32.mrf.mxu1 }
 0x117   : > { %814 = vst [vmem:[#allocation2 + $0x30] sm:$0xff] %v806_v14  ;;  %v779_v19 = vadd.f32 %v1120_v15, %v1080_v12  ;;  %v1082_v20 = vpop.f32.mrf.mxu0 }
 0x118   : > { %v1083_v21 = vadd.f32 %v1082_v20, %v1081_v16  ;;  %v1122_v22 = vpop.f32.mrf.mxu1 }
 0x119   : > { %v807_v23 = vadd.f32 %v779_v19, %v317_v17  ;;  %v1123_v24 = vadd.f32 %v1122_v22, %v1121_v18  ;;  %v1084_v25 = vpop.f32.mrf.mxu0 }
 0x11a   : > { %v1124_v27 = vpop.f32.mrf.mxu1 }
 0x11b   : > { %815 = vst [vmem:[#allocation2] sm:$0xff] %v807_v23  ;;  %v784_v28 = vadd.f32 %v1123_v24, %v1083_v21  ;;  %v1085_v29 = vpop.f32.mrf.mxu0 }
 0x11c   : > { %v1086_v30 = vadd.f32 %v1085_v29, %v1084_v25  ;;  %v1125_v31 = vpop.f32.mrf.mxu1 }
 0x11d   : > { %v808_v32 = vadd.f32 %v784_v28, %v318_v26  ;;  %v1126_v33 = vadd.f32 %v1125_v31, %v1124_v27  ;;  %v1087_v34 = vpop.f32.mrf.mxu0 }
 0x11e   : > { %v1127_v36 = vpop.f32.mrf.mxu1 }
 0x11f   : > { %816 = vst [vmem:[#allocation2 + $0x18] sm:$0xff] %v808_v32  ;;  %v787_v37 = vadd.f32 %v1126_v33, %v1086_v30  ;;  %v1088_v38 = vpop.f32.mrf.mxu0 }
 0x120   : > { %v1089_v39 = vadd.f32 %v1088_v38, %v1087_v34  ;;  %v1128_v40 = vpop.f32.mrf.mxu1 }
 0x121   : > { %v809_v41 = vadd.f32 %v787_v37, %v319_v35  ;;  %v1129_v42 = vadd.f32 %v1128_v40, %v1127_v36  ;;  %v1090_v43 = vpop.f32.mrf.mxu0 }
 0x122   : > { %v1130_v45 = vpop.f32.mrf.mxu1 }
 0x123   : > { %817 = vst [vmem:[#allocation2 + $0x10] sm:$0xff] %v809_v41  ;;  %v792_v46 = vadd.f32 %v1129_v42, %v1089_v39  ;;  %v1091_v47 = vpop.f32.mrf.mxu0 }
 0x124   : > { %v1092_v48 = vadd.f32 %v1091_v47, %v1090_v43  ;;  %v1131_v49 = vpop.f32.mrf.mxu1 }
 0x125   : > { %v810_v50 = vadd.f32 %v792_v46, %v320_v44  ;;  %v1132_v51 = vadd.f32 %v1131_v49, %v1130_v45  ;;  %v1093_v52 = vpop.f32.mrf.mxu0 }
 0x126   : > { %v1133_v54 = vpop.f32.mrf.mxu1 }
 0x127   : > { %818 = vst [vmem:[#allocation2 + $0x8] sm:$0xff] %v810_v50  ;;  %v795_v55 = vadd.f32 %v1132_v51, %v1092_v48  ;;  %v1094_v56 = vpop.f32.mrf.mxu0 }
 0x128   : > { %v1095_v57 = vadd.f32 %v1094_v56, %v1093_v52  ;;  %v1134_v58 = vpop.f32.mrf.mxu1 }
 0x129   : > { %v811_v59 = vadd.f32 %v795_v55, %v321_v53  ;;  %v1135_v60 = vadd.f32 %v1134_v58, %v1133_v54  ;;  %v1096_v61 = vpop.f32.mrf.mxu0 }
 0x12a   : > { %v1136_v63 = vpop.f32.mrf.mxu1 }
 0x12b   : > { %819 = vst [vmem:[#allocation2 + $0x20] sm:$0xff] %v811_v59  ;;  %v800_v0 = vadd.f32 %v1135_v60, %v1095_v57  ;;  %v1097_v1 = vpop.f32.mrf.mxu0 }
 0x12c   : > { %v1098_v2 = vadd.f32 %v1097_v1, %v1096_v61  ;;  %v1137_v3 = vpop.f32.mrf.mxu1 }
 0x12d   : > { %v812_v4 = vadd.f32 %v800_v0, %v322_v62  ;;  %v1138_v5 = vadd.f32 %v1137_v3, %v1136_v63 }
 0x12f   : > { %820 = vst [vmem:[#allocation2 + $0x28] sm:$0xff] %v812_v4  ;;  %v803_v7 = vadd.f32 %v1138_v5, %v1098_v2  ;;  %825 = sbr.rel (%p1052_p11) target bundleno = 321 (0x141), region = 63 }
 0x131   : > { %v813_v8 = vadd.f32 %v803_v7, %v323_v6 }
 0x133   : > { %821 = vst [vmem:[#allocation2 + $0x38] sm:$0xff] %v813_v8 }
 0x134   : > { %v826_v9 = vld [vmem:[#allocation2 + $0x30] sm:$0xff]  ;;  %v1053_v10 = vld [vmem:[%s1463_s2] ss:$0 sm:$0xff]  ;;  %v828_v14 = vld [vmem:[#allocation2 + $0x18] sm:$0xff] }
 0x135   : > { %v827_v11 = vld [vmem:[#allocation2] sm:$0xff]  ;;  %v841_v12 = vadd.f32 %v1053_v10, %v826_v9  ;;  %v829_v15 = vld [vmem:[#allocation2 + $0x10] sm:$0xff]  ;;  %v830_v16 = vld [vmem:[#allocation2 + $0x8] sm:$0xff]  ;;  %v843_v17 = vadd.f32 %v1053_v10, %v828_v14 }
 0x136   : > { %v842_v13 = vadd.f32 %v1053_v10, %v827_v11  ;;  %v844_v18 = vadd.f32 %v1053_v10, %v829_v15  ;;  %v845_v19 = vadd.f32 %v1053_v10, %v830_v16  ;;  %v831_v20 = vld [vmem:[#allocation2 + $0x20] sm:$0xff]  ;;  %v832_v21 = vld [vmem:[#allocation2 + $0x28] sm:$0xff] }
 0x137   : > { %vm849_vm0 = vcmp.ge.f32.partialorder %v841_v12, 0.0  ;;  %v857_v23 = vmul.f32 0.2, %v841_v12  ;;  %vm851_vm2 = vcmp.ge.f32.partialorder %v843_v17, 0.0  ;;  %v859_v25 = vmul.f32 0.2, %v843_v17 }
 0x138   : > { %vm850_vm1 = vcmp.ge.f32.partialorder %v842_v13, 0.0  ;;  %v858_v24 = vmul.f32 0.2, %v842_v13  ;;  %vm852_vm3 = vcmp.ge.f32.partialorder %v844_v18, 0.0  ;;  %v860_v26 = vmul.f32 0.2, %v844_v18 }
 0x139   : > { %v865_v27 = vsel %vm849_vm0, %v841_v12, %v857_v23  ;;  %vm853_vm4 = vcmp.ge.f32.partialorder %v845_v19, 0.0  ;;  %v861_v29 = vmul.f32 0.2, %v845_v19  ;;  %v867_v30 = vsel %vm851_vm2, %v843_v17, %v859_v25 }
 0x13a   : > { %v833_v22 = vld [vmem:[#allocation2 + $0x38] sm:$0xff]  ;;  %v866_v28 = vsel %vm850_vm1, %v842_v13, %v858_v24  ;;  %873 = vst [vmem:[%s1464_s3] sm:$0xff] %v865_v27  ;;  %v868_v31 = vsel %vm852_vm3, %v844_v18, %v860_v26  ;;  %v846_v32 = vadd.f32 %v1053_v10, %v831_v20  ;;  %v847_v33 = vadd.f32 %v1053_v10, %v832_v21 }
 0x13b   : > { %874 = vst [vmem:[%s1464_s3 + $0x8] sm:$0xff] %v866_v28  ;;  %875 = vst [vmem:[%s1464_s3 + $0x10] sm:$0xff] %v867_v30  ;;  %v869_v34 = vsel %vm853_vm4, %v845_v19, %v861_v29  ;;  %v848_v35 = vadd.f32 %v1053_v10, %v833_v22 }
 0x13c   : > { %876 = vst [vmem:[%s1464_s3 + $0x18] sm:$0xff] %v868_v31  ;;  %877 = vst [vmem:[%s1464_s3 + $0x20] sm:$0xff] %v869_v34  ;;  %vm854_vm5 = vcmp.ge.f32.partialorder %v846_v32, 0.0  ;;  %v862_v36 = vmul.f32 0.2, %v846_v32  ;;  %vm855_vm6 = vcmp.ge.f32.partialorder %v847_v33, 0.0 }
 0x13d   : > { %v863_v37 = vmul.f32 0.2, %v847_v33  ;;  %vm856_vm7 = vcmp.ge.f32.partialorder %v848_v35, 0.0  ;;  %v864_v38 = vmul.f32 0.2, %v848_v35 }
 0x13e   : > { %v870_v39 = vsel %vm854_vm5, %v846_v32, %v862_v36 }
 0x13f   : > { %v871_v40 = vsel %vm855_vm6, %v847_v33, %v863_v37  ;;  %878 = vst [vmem:[%s1464_s3 + $0x28] sm:$0xff] %v870_v39  ;;  %v872_v41 = vsel %vm856_vm7, %v848_v35, %v864_v38 }
 0x140   : > { %879 = vst [vmem:[%s1464_s3 + $0x30] sm:$0xff] %v871_v40  ;;  %880 = vst [vmem:[%s1464_s3 + $0x38] sm:$0xff] %v872_v41 }
 0x141 PF: > { %s13_s16 = sadd.s32 1, %s1274_s16   ;;  %s1465_s12 = smov %s1262_s13 }
 0x142   : > { %p10_p12 = scmp.ge.s32.totalorder %s13_s16, 4   ;;  %s1466_s13 = smov %s1332_s20 }
 0x143   : > { %s1467_s14 = smov %s1270_s15  ;;  %s1468_s15 = smov %s1470_s17 }
 0x144   :  { %12 = sbr.rel (!%p10_p12) target bundleno = 3 (0x3), region = 104 }

// kernel: joint_adversary_forward.7
= control target key start
LH: loop header
LB: loop body
LE: loop exit
PB: predicated region body
PF: predicated region fallthrough
CT: control target
= control target key end

     0   :  { %s3505_s18 = smov 0   ;;  %s4039_s0 = inlined_call_operand.vmem [shape: bf16[4,2048], index: 0, kind: input, shape index: {}]   ;;  %s4040_s1 = inlined_call_operand.vmem [shape: bf16[2048,1024], index: 1, kind: input, shape index: {}]   ;;  %s4041_s2 = inlined_call_operand.vmem [shape: f32[1,1024], index: 2, kind: input, shape index: {}]   ;;  %s4042_s3 = inlined_call_operand.vmem [shape: bf16[1024,128], index: 3, kind: input, shape index: {}]   ;;  %s4043_s4 = inlined_call_operand.vmem [shape: f32[1,128], index: 4, kind: input, shape index: {}]   ;;  %s4044_s5 = inlined_call_operand.vmem [shape: f32[4,128], index: 5, kind: output, shape index: {}]  }
   0x1 LB: > { %s3511_s19 = sadd.s32 4294967295, %s3471_s18   ;;  %p2970_p0 = scmp.ge.s32.totalorder %s3471_s18, 1  ;;  %s3471_s18 = sphi %s3505_s18, %s15_s18  }
   0x2   : > { %p195_p1 = scmp.lt.s32.totalorder %s3471_s18, 5 }
   0x4   : > { %p196_p2 = pnand %p2970_p0, %p195_p1 }
   0x5   : > { %s2971_s20 = sshll.u32 (!%p196_p2), %s3511_s19, 2  ;;  %s2973_s21 = sshll.u32 (!%p196_p2), %s3511_s19, 6 }
   0x6   : > { %199 = sbr.rel (%p196_p2) target bundleno = 755 (0x2f3), region = 40  ;;  %p225_p3 = scmp.lt.s32.totalorder (!%p196_p2), %s2971_s20, 15 }
   0x7   : > { %p231_p4 = scmp.lt.s32.totalorder (!%p196_p2), %s2973_s21, 255  ;;  %p2976_p5 = scmp.ne.s32.totalorder (!%p196_p2), %s3511_s19, 0 }
   0xb   : > { %s4046_s20 = smov (!%p225_p3, %s2971_s20), 15  ;;  %s4048_s21 = smov (!%p231_p4, %s2973_s21), 255 }
   0xc   : > { %s2972_s22 = sshll.u32 %s4046_s20, 1  ;;  %s3301_s26 = sshll.u32 %s4048_s21, 5 }
   0xd   : > { %s3520_s25 = scalar_lea.vmem %s4039_s0, %s2972_s22  ;;  %s3525_s29 = scalar_lea.vmem %s4040_s1, %s3301_s26 }
   0xe   : > { %241 = sbr.rel (%p2976_p5) target bundleno = 22 (0x16), region = 44 }
  0x13   : > { %v3473_v0 = vmov 0.0  }
  0x14   : > { %242 = vst [vmem:[#allocation2 + $0x10] sm:$0xff] %v3473_v0  ;;  %243 = vst [vmem:[#allocation2] sm:$0xff] %v3473_v0 }
  0x15   : > { %244 = vst [vmem:[#allocation2 + $0x18] sm:$0xff] %v3473_v0  ;;  %245 = vst [vmem:[#allocation2 + $0x8] sm:$0xff] %v3473_v0 }
  0x16 PF: > { %v307_v1 = vld [vmem:[%s3525_s29 + $0x1c0] sm:$0xff]  ;;  %v3474_v33 = vmov 1983009808   ;;  %v512_v35 = vlaneseq  ;;  %p3233_p6 = scmp.ne.s32.totalorder %s3511_s19, 3 }
  0x17   : > { %v311_v2 = vld [vmem:[%s3525_s29 + $0x1e0] sm:$0xff]  ;;  %v510_v34 = vunpack.c.l.s4 %v3474_v33 }
  0x18   : > { %v435_v3 = vld [vmem:[%s3525_s29 + $0x5c0] sm:$0xff]  ;;  %v3034_v4 = vcombine.high %v307_v1, %v311_v2  ;;  %v3033_v6 = vcombine.low %v307_v1, %v311_v2  ;;  %v3550_v45 = vshrl.u32 %v512_v35, 7 }
  0x19   : > { %v439_v5 = vld [vmem:[%s3525_s29 + $0x5e0] sm:$0xff]  ;;  %v511_v44 = vunpack.c.0.s8 %v510_v34 }
  0x1a   : > { %v299_v7 = vld [vmem:[%s3525_s29 + $0x180] sm:$0xff]  ;;  %v3162_v9 = vcombine.high %v435_v3, %v439_v5  ;;  %v3161_v10 = vcombine.low %v435_v3, %v439_v5  ;;  %1809 = vmatprep.subr.bf16.mxu0 %v3034_v4 }
  0x1b   : > { %v303_v8 = vld [vmem:[%s3525_s29 + $0x1a0] sm:$0xff]  ;;  %1810 = vmatpush1.bf16.msra.mxu0 %v3033_v6  ;;  %v514_v54 = vsub.s32 %v511_v44, %v3550_v45 }
  0x1c   : > { %v3026_v11 = vcombine.high %v299_v7, %v303_v8  ;;  %v427_v12 = vld [vmem:[%s3525_s29 + $0x580] sm:$0xff]  ;;  %1850 = vmatprep.subr.bf16.mxu1 %v3162_v9  ;;  %v3025_v19 = vcombine.low %v299_v7, %v303_v8 }
  0x1d   : > { %v431_v13 = vld [vmem:[%s3525_s29 + $0x5a0] sm:$0xff]  ;;  %1851 = vmatpush1.bf16.msra.mxu1 %v3161_v10 }
  0x1e   : > { %v291_v14 = vld [vmem:[%s3525_s29 + $0x140] sm:$0xff]  ;;  %v3154_v15 = vcombine.high %v427_v12, %v431_v13  ;;  %1811 = vmatprep.subr.bf16.mxu0 %v3026_v11  ;;  %v3153_v20 = vcombine.low %v427_v12, %v431_v13 }
  0x1f   : > { %v295_v16 = vld [vmem:[%s3525_s29 + $0x160] sm:$0xff]  ;;  %1812 = vmatpush1.bf16.msra.mxu0 %v3025_v19 }
  0x20   : > { %v419_v17 = vld [vmem:[%s3525_s29 + $0x540] sm:$0xff]  ;;  %v3018_v21 = vcombine.high %v291_v14, %v295_v16  ;;  %1852 = vmatprep.subr.bf16.mxu1 %v3154_v15  ;;  %v3017_v27 = vcombine.low %v291_v14, %v295_v16 }
  0x21   : > { %v423_v18 = vld [vmem:[%s3525_s29 + $0x560] sm:$0xff]  ;;  %1853 = vmatpush1.bf16.msra.mxu1 %v3153_v20 }
  0x22   : > { %v3146_v22 = vcombine.high %v419_v17, %v423_v18  ;;  %v283_v23 = vld [vmem:[%s3525_s29 + $0x100] sm:$0xff]  ;;  %1813 = vmatprep.subr.bf16.mxu0 %v3018_v21  ;;  %v3145_v28 = vcombine.low %v419_v17, %v423_v18 }
  0x23   : > { %v287_v24 = vld [vmem:[%s3525_s29 + $0x120] sm:$0xff]  ;;  %1814 = vmatpush1.bf16.msra.mxu0 %v3017_v27 }
  0x24   : > { %v411_v25 = vld [vmem:[%s3525_s29 + $0x500] sm:$0xff]  ;;  %v3010_v29 = vcombine.high %v283_v23, %v287_v24  ;;  %1854 = vmatprep.subr.bf16.mxu1 %v3146_v22  ;;  %v3009_v38 = vcombine.low %v283_v23, %v287_v24 }
  0x25   : > { %v415_v26 = vld [vmem:[%s3525_s29 + $0x520] sm:$0xff]  ;;  %1855 = vmatpush1.bf16.msra.mxu1 %v3145_v28 }
  0x26   : > { %v3138_v30 = vcombine.high %v411_v25, %v415_v26  ;;  %v275_v31 = vld [vmem:[%s3525_s29 + $0xc0] sm:$0xff]  ;;  %1815 = vmatprep.subr.bf16.mxu0 %v3010_v29  ;;  %v3137_v39 = vcombine.low %v411_v25, %v415_v26 }
  0x27   : > { %v279_v32 = vld [vmem:[%s3525_s29 + $0xe0] sm:$0xff]  ;;  %1816 = vmatpush1.bf16.msra.mxu0 %v3009_v38 }
  0x28   : > { %v403_v36 = vld [vmem:[%s3525_s29 + $0x4c0] sm:$0xff]  ;;  %v3002_v40 = vcombine.high %v275_v31, %v279_v32  ;;  %1856 = vmatprep.subr.bf16.mxu1 %v3138_v30  ;;  %v3001_v48 = vcombine.low %v275_v31, %v279_v32 }
  0x29   : > { %v407_v37 = vld [vmem:[%s3525_s29 + $0x4e0] sm:$0xff]  ;;  %1857 = vmatpush1.bf16.msra.mxu1 %v3137_v39 }
  0x2a   : > { %v3130_v41 = vcombine.high %v403_v36, %v407_v37  ;;  %v267_v42 = vld [vmem:[%s3525_s29 + $0x80] sm:$0xff]  ;;  %1817 = vmatprep.subr.bf16.mxu0 %v3002_v40  ;;  %v3129_v49 = vcombine.low %v403_v36, %v407_v37 }
  0x2b   : > { %v271_v43 = vld [vmem:[%s3525_s29 + $0xa0] sm:$0xff]  ;;  %1818 = vmatpush1.bf16.msra.mxu0 %v3001_v48 }
  0x2c   : > { %v395_v46 = vld [vmem:[%s3525_s29 + $0x480] sm:$0xff]  ;;  %v2994_v50 = vcombine.high %v267_v42, %v271_v43  ;;  %1858 = vmatprep.subr.bf16.mxu1 %v3130_v41  ;;  %v2993_v57 = vcombine.low %v267_v42, %v271_v43 }
  0x2d   : > { %v399_v47 = vld [vmem:[%s3525_s29 + $0x4a0] sm:$0xff]  ;;  %1859 = vmatpush1.bf16.msra.mxu1 %v3129_v49 }
  0x2e   : > { %v3122_v51 = vcombine.high %v395_v46, %v399_v47  ;;  %v259_v52 = vld [vmem:[%s3525_s29 + $0x40] sm:$0xff]  ;;  %1819 = vmatprep.subr.bf16.mxu0 %v2994_v50  ;;  %v3121_v58 = vcombine.low %v395_v46, %v399_v47 }
  0x2f   : > { %v263_v53 = vld [vmem:[%s3525_s29 + $0x60] sm:$0xff]  ;;  %1820 = vmatpush1.bf16.msra.mxu0 %v2993_v57 }
  0x30   : > { %v387_v55 = vld [vmem:[%s3525_s29 + $0x440] sm:$0xff]  ;;  %v2986_v59 = vcombine.high %v259_v52, %v263_v53  ;;  %1860 = vmatprep.subr.bf16.mxu1 %v3122_v51  ;;  %v2985_v4 = vcombine.low %v259_v52, %v263_v53 }
  0x31   : > { %v391_v56 = vld [vmem:[%s3525_s29 + $0x460] sm:$0xff]  ;;  %1861 = vmatpush1.bf16.msra.mxu1 %v3121_v58 }
  0x32   : > { %v250_v60 = vld [vmem:[%s3520_s25] sm:$0xff]  ;;  %v3114_v61 = vcombine.high %v387_v55, %v391_v56  ;;  %1821 = vmatprep.subr.bf16.mxu0 %v2986_v59  ;;  %v3113_v7 = vcombine.low %v387_v55, %v391_v56 }
  0x33   : > { %v251_v62 = vld [vmem:[%s3525_s29] sm:$0xff]  ;;  %v3562_v0 = vrot.slane %v250_v60, %v514_v54  ;;  %v508_v1 = vcombine.high %v250_v60, %v250_v60  ;;  %1822 = vmatpush1.bf16.msra.mxu0 %v2985_v4 }
  0x34   : > { %v255_v63 = vld [vmem:[%s3525_s29 + $0x20] sm:$0xff]  ;;  %1862 = vmatprep.subr.bf16.mxu1 %v3114_v61 }
  0x35   : > { %v379_v2 = vld [vmem:[%s3525_s29 + $0x400] sm:$0xff]  ;;  %v3568_v5 = vcombine.high %v3562_v0, %v3562_v0  ;;  %v3570_v6 = vrot.slane %v508_v1, %v514_v54  ;;  %v2978_v8 = vcombine.high %v251_v62, %v255_v63  ;;  %v2977_v15 = vcombine.low %v251_v62, %v255_v63  ;;  %1863 = vmatpush1.bf16.msra.mxu1 %v3113_v7 }
  0x36   : > { %v383_v3 = vld [vmem:[%s3525_s29 + $0x420] sm:$0xff] }
  0x37   : > { %v3106_v9 = vcombine.high %v379_v2, %v383_v3  ;;  %v371_v10 = vld [vmem:[%s3525_s29 + $0x3c0] sm:$0xff]  ;;  %1841 = vmatprep.mubr.bf16.mxu0 %v3568_v5  ;;  %v3577_v12 = vcombine.high %v3570_v6, %v3570_v6  ;;  %1823 = vmatprep.subr.bf16.mxu0 %v2978_v8  ;;  %v3105_v16 = vcombine.low %v379_v2, %v383_v3 }
  0x38   : > { %v375_v11 = vld [vmem:[%s3525_s29 + $0x3e0] sm:$0xff]  ;;  %1824 = vmatpush1.bf16.msra.mxu0 %v2977_v15 }
  0x39   : > { %v499_v13 = vld [vmem:[%s3525_s29 + $0x7c0] sm:$0xff]  ;;  %1882 = vmatprep.mubr.bf16.mxu1 %v3577_v12  ;;  %v3098_v17 = vcombine.high %v371_v10, %v375_v11  ;;  %1864 = vmatprep.subr.bf16.mxu1 %v3106_v9  ;;  %v3097_v23 = vcombine.low %v371_v10, %v375_v11 }
  0x3a   : > { %v503_v14 = vld [vmem:[%s3525_s29 + $0x7e0] sm:$0xff]  ;;  %1865 = vmatpush1.bf16.msra.mxu1 %v3105_v16  ;;  %v308_v16 = vld [vmem:[%s3525_s29 + $0x1c8] sm:$0xff] }
  0x3b   : > { %v3226_v18 = vcombine.high %v499_v13, %v503_v14  ;;  %v363_v19 = vld [vmem:[%s3525_s29 + $0x380] sm:$0xff]  ;;  %1825 = vmatprep.subr.bf16.mxu0 %v3098_v17  ;;  %v3225_v24 = vcombine.low %v499_v13, %v503_v14  ;;  %v312_v17 = vld [vmem:[%s3525_s29 + $0x1e8] sm:$0xff] }
  0x3c   : > { %v367_v20 = vld [vmem:[%s3525_s29 + $0x3a0] sm:$0xff]  ;;  %1826 = vmatpush2.bf16.msra.mxu0 %v3097_v23 }
  0x3d   : > { %v491_v21 = vld [vmem:[%s3525_s29 + $0x780] sm:$0xff]  ;;  %v3090_v25 = vcombine.high %v363_v19, %v367_v20  ;;  %1866 = vmatprep.subr.bf16.mxu1 %v3226_v18  ;;  %v3089_v31 = vcombine.low %v363_v19, %v367_v20  ;;  %v436_v18 = vld [vmem:[%s3525_s29 + $0x5c8] sm:$0xff] }
  0x3e   : > { %v495_v22 = vld [vmem:[%s3525_s29 + $0x7a0] sm:$0xff]  ;;  %1867 = vmatpush2.bf16.msra.mxu1 %v3225_v24  ;;  %v440_v19 = vld [vmem:[%s3525_s29 + $0x5e8] sm:$0xff] }
  0x3f   : > { %v3218_v26 = vcombine.high %v491_v21, %v495_v22  ;;  %v355_v27 = vld [vmem:[%s3525_s29 + $0x340] sm:$0xff]  ;;  %1827 = vmatprep.subr.bf16.mxu0 %v3090_v25  ;;  %v3217_v32 = vcombine.low %v491_v21, %v495_v22  ;;  %v3036_v22 = vcombine.high %v308_v16, %v312_v17  ;;  %v3164_v23 = vcombine.high %v436_v18, %v440_v19  ;;  %v300_v24 = vld [vmem:[%s3525_s29 + $0x188] sm:$0xff] }
  0x40   : > { %v359_v28 = vld [vmem:[%s3525_s29 + $0x360] sm:$0xff]  ;;  %1828 = vmatpush2.bf16.msra.mxu0 %v3089_v31  ;;  %v304_v25 = vld [vmem:[%s3525_s29 + $0x1a8] sm:$0xff] }
  0x41   : > { %v483_v29 = vld [vmem:[%s3525_s29 + $0x740] sm:$0xff]  ;;  %v3082_v33 = vcombine.high %v355_v27, %v359_v28  ;;  %1868 = vmatprep.subr.bf16.mxu1 %v3218_v26  ;;  %v3081_v39 = vcombine.low %v355_v27, %v359_v28  ;;  %v428_v26 = vld [vmem:[%s3525_s29 + $0x588] sm:$0xff]  ;;  %v3035_v28 = vcombine.low %v308_v16, %v312_v17 }
  0x42   : > { %v487_v30 = vld [vmem:[%s3525_s29 + $0x760] sm:$0xff]  ;;  %1869 = vmatpush2.bf16.msra.mxu1 %v3217_v32  ;;  %v432_v27 = vld [vmem:[%s3525_s29 + $0x5a8] sm:$0xff] }
  0x43   : > { %v3210_v34 = vcombine.high %v483_v29, %v487_v30  ;;  %v347_v35 = vld [vmem:[%s3525_s29 + $0x300] sm:$0xff]  ;;  %1829 = vmatprep.subr.bf16.mxu0 %v3082_v33  ;;  %v3209_v40 = vcombine.low %v483_v29, %v487_v30  ;;  %v3163_v29 = vcombine.low %v436_v18, %v440_v19  ;;  %v3028_v30 = vcombine.high %v300_v24, %v304_v25  ;;  %v292_v32 = vld [vmem:[%s3525_s29 + $0x148] sm:$0xff] }
  0x44   : > { %v351_v36 = vld [vmem:[%s3525_s29 + $0x320] sm:$0xff]  ;;  %1830 = vmatpush2.bf16.msra.mxu0 %v3081_v39  ;;  %v3156_v31 = vcombine.high %v428_v26, %v432_v27  ;;  %v296_v33 = vld [vmem:[%s3525_s29 + $0x168] sm:$0xff] }
  0x45   : > { %v475_v37 = vld [vmem:[%s3525_s29 + $0x700] sm:$0xff]  ;;  %v3074_v41 = vcombine.high %v347_v35, %v351_v36  ;;  %1870 = vmatprep.subr.bf16.mxu1 %v3210_v34  ;;  %v3073_v48 = vcombine.low %v347_v35, %v351_v36  ;;  %v420_v34 = vld [vmem:[%s3525_s29 + $0x548] sm:$0xff]  ;;  %v3027_v36 = vcombine.low %v300_v24, %v304_v25 }
  0x46   : > { %v479_v38 = vld [vmem:[%s3525_s29 + $0x720] sm:$0xff]  ;;  %1871 = vmatpush2.bf16.msra.mxu1 %v3209_v40  ;;  %v424_v35 = vld [vmem:[%s3525_s29 + $0x568] sm:$0xff] }
  0x47   : > { %v3202_v42 = vcombine.high %v475_v37, %v479_v38  ;;  %v339_v43 = vld [vmem:[%s3525_s29 + $0x2c0] sm:$0xff]  ;;  %1831 = vmatprep.subr.bf16.mxu0 %v3074_v41  ;;  %v3201_v49 = vcombine.low %v475_v37, %v479_v38  ;;  %v3155_v37 = vcombine.low %v428_v26, %v432_v27  ;;  %v3020_v38 = vcombine.high %v292_v32, %v296_v33  ;;  %v284_v40 = vld [vmem:[%s3525_s29 + $0x108] sm:$0xff] }
  0x48   : > { %v343_v44 = vld [vmem:[%s3525_s29 + $0x2e0] sm:$0xff]  ;;  %1832 = vmatpush2.bf16.msra.mxu0 %v3073_v48  ;;  %v3148_v39 = vcombine.high %v420_v34, %v424_v35  ;;  %v288_v41 = vld [vmem:[%s3525_s29 + $0x128] sm:$0xff] }
  0x49   : > { %v467_v46 = vld [vmem:[%s3525_s29 + $0x6c0] sm:$0xff]  ;;  %v3066_v50 = vcombine.high %v339_v43, %v343_v44  ;;  %1872 = vmatprep.subr.bf16.mxu1 %v3202_v42  ;;  %v3065_v56 = vcombine.low %v339_v43, %v343_v44  ;;  %v412_v42 = vld [vmem:[%s3525_s29 + $0x508] sm:$0xff]  ;;  %v3019_v44 = vcombine.low %v292_v32, %v296_v33 }
  0x4a   : > { %v471_v47 = vld [vmem:[%s3525_s29 + $0x6e0] sm:$0xff]  ;;  %1873 = vmatpush2.bf16.msra.mxu1 %v3201_v49  ;;  %v416_v43 = vld [vmem:[%s3525_s29 + $0x528] sm:$0xff] }
  0x4b   : > { %v3194_v51 = vcombine.high %v467_v46, %v471_v47  ;;  %v331_v52 = vld [vmem:[%s3525_s29 + $0x280] sm:$0xff]  ;;  %1833 = vmatprep.subr.bf16.mxu0 %v3066_v50  ;;  %v3193_v57 = vcombine.low %v467_v46, %v471_v47  ;;  %v3147_v46 = vcombine.low %v420_v34, %v424_v35  ;;  %v3012_v47 = vcombine.high %v284_v40, %v288_v41  ;;  %v276_v49 = vld [vmem:[%s3525_s29 + $0xc8] sm:$0xff] }
  0x4c   : > { %v335_v53 = vld [vmem:[%s3525_s29 + $0x2a0] sm:$0xff]  ;;  %1834 = vmatpush2.bf16.msra.mxu0 %v3065_v56  ;;  %v3140_v48 = vcombine.high %v412_v42, %v416_v43  ;;  %v280_v50 = vld [vmem:[%s3525_s29 + $0xe8] sm:$0xff] }
  0x4d   : > { %v459_v54 = vld [vmem:[%s3525_s29 + $0x680] sm:$0xff]  ;;  %v3058_v58 = vcombine.high %v331_v52, %v335_v53  ;;  %1874 = vmatprep.subr.bf16.mxu1 %v3194_v51  ;;  %v3057_v1 = vcombine.low %v331_v52, %v335_v53  ;;  %v404_v51 = vld [vmem:[%s3525_s29 + $0x4c8] sm:$0xff]  ;;  %v3011_v53 = vcombine.low %v284_v40, %v288_v41 }
  0x4e   : > { %v463_v55 = vld [vmem:[%s3525_s29 + $0x6a0] sm:$0xff]  ;;  %1875 = vmatpush2.bf16.msra.mxu1 %v3193_v57  ;;  %v408_v52 = vld [vmem:[%s3525_s29 + $0x4e8] sm:$0xff] }
  0x4f   : > { %v3186_v59 = vcombine.high %v459_v54, %v463_v55  ;;  %v323_v60 = vld [vmem:[%s3525_s29 + $0x240] sm:$0xff]  ;;  %1835 = vmatprep.subr.bf16.mxu0 %v3058_v58  ;;  %v3185_v2 = vcombine.low %v459_v54, %v463_v55  ;;  %v3139_v54 = vcombine.low %v412_v42, %v416_v43  ;;  %v3004_v55 = vcombine.high %v276_v49, %v280_v50  ;;  %v268_v57 = vld [vmem:[%s3525_s29 + $0x88] sm:$0xff] }
  0x50   : > { %v327_v61 = vld [vmem:[%s3525_s29 + $0x260] sm:$0xff]  ;;  %1836 = vmatpush2.bf16.msra.mxu0 %v3057_v1  ;;  %v3132_v56 = vcombine.high %v404_v51, %v408_v52  ;;  %v272_v58 = vld [vmem:[%s3525_s29 + $0xa8] sm:$0xff] }
  0x51   : > { %v451_v62 = vld [vmem:[%s3525_s29 + $0x640] sm:$0xff]  ;;  %v3050_v3 = vcombine.high %v323_v60, %v327_v61  ;;  %1876 = vmatprep.subr.bf16.mxu1 %v3186_v59  ;;  %v3049_v11 = vcombine.low %v323_v60, %v327_v61  ;;  %v396_v59 = vld [vmem:[%s3525_s29 + $0x488] sm:$0xff]  ;;  %v3003_v61 = vcombine.low %v276_v49, %v280_v50 }
  0x52   : > { %v455_v63 = vld [vmem:[%s3525_s29 + $0x660] sm:$0xff]  ;;  %1877 = vmatpush2.bf16.msra.mxu1 %v3185_v2  ;;  %v400_v60 = vld [vmem:[%s3525_s29 + $0x4a8] sm:$0xff] }
  0x53   : > { %v3178_v4 = vcombine.high %v451_v62, %v455_v63  ;;  %v315_v7 = vld [vmem:[%s3525_s29 + $0x200] sm:$0xff]  ;;  %1837 = vmatprep.subr.bf16.mxu0 %v3050_v3  ;;  %v3177_v13 = vcombine.low %v451_v62, %v455_v63  ;;  %v3131_v62 = vcombine.low %v404_v51, %v408_v52  ;;  %v2996_v63 = vcombine.high %v268_v57, %v272_v58  ;;  %v260_v2 = vld [vmem:[%s3525_s29 + $0x48] sm:$0xff] }
  0x54   : > { %v319_v8 = vld [vmem:[%s3525_s29 + $0x220] sm:$0xff]  ;;  %1838 = vmatpush2.bf16.msra.mxu0 %v3049_v11  ;;  %v3124_v1 = vcombine.high %v396_v59, %v400_v60  ;;  %v264_v3 = vld [vmem:[%s3525_s29 + $0x68] sm:$0xff] }
  0x55   : > { %v443_v9 = vld [vmem:[%s3525_s29 + $0x600] sm:$0xff]  ;;  %v3042_v14 = vcombine.high %v315_v7, %v319_v8  ;;  %1878 = vmatprep.subr.bf16.mxu1 %v3178_v4  ;;  %v3041_v20 = vcombine.low %v315_v7, %v319_v8  ;;  %v388_v4 = vld [vmem:[%s3525_s29 + $0x448] sm:$0xff]  ;;  %v2995_v8 = vcombine.low %v268_v57, %v272_v58  ;;  %v2987_v17 = vcombine.low %v260_v2, %v264_v3 }
  0x56   : > { %v447_v10 = vld [vmem:[%s3525_s29 + $0x620] sm:$0xff]  ;;  %1879 = vmatpush2.bf16.msra.mxu1 %v3177_v13  ;;  %v392_v7 = vld [vmem:[%s3525_s29 + $0x468] sm:$0xff] }
  0x57   : > { %v3170_v15 = vcombine.high %v443_v9, %v447_v10  ;;  %1839 = vmatprep.subr.bf16.mxu0 %v3042_v14  ;;  %v3169_v21 = vcombine.low %v443_v9, %v447_v10  ;;  %v3123_v9 = vcombine.low %v396_v59, %v400_v60  ;;  %v2988_v10 = vcombine.high %v260_v2, %v264_v3  ;;  %v252_v13 = vld [vmem:[%s3525_s29 + $0x8] sm:$0xff] }
  0x58   : > { %1840 = vmatpush2.bf16.msra.mxu0 %v3041_v20  ;;  %v3116_v11 = vcombine.high %v388_v4, %v392_v7  ;;  %v256_v14 = vld [vmem:[%s3525_s29 + $0x28] sm:$0xff]  ;;  %v3115_v18 = vcombine.low %v388_v4, %v392_v7 }
  0x59   : > { %1880 = vmatprep.subr.bf16.mxu1 %v3170_v15  ;;  %1891 = vmatprep.subr.bf16.mxu0 %v3036_v22  ;;  %v380_v15 = vld [vmem:[%s3525_s29 + $0x408] sm:$0xff]  ;;  %v2980_v19 = vcombine.high %v252_v13, %v256_v14  ;;  %v2979_v25 = vcombine.low %v252_v13, %v256_v14 }
  0x5a   : > { %1881 = vmatpush2.bf16.msra.mxu1 %v3169_v21  ;;  %v384_v16 = vld [vmem:[%s3525_s29 + $0x428] sm:$0xff] }
  0x5b   : > { %1932 = vmatprep.subr.bf16.mxu1 %v3164_v23  ;;  %1842 = vmatmul.mubr.bf16.vlgmr.msra.gmra.mxu0 %v3562_v0  ;;  %v3108_v20 = vcombine.high %v380_v15, %v384_v16  ;;  %v372_v21 = vld [vmem:[%s3525_s29 + $0x3c8] sm:$0xff]  ;;  %v3107_v26 = vcombine.low %v380_v15, %v384_v16 }
  0x5c   : > { %1892 = vmatpush1.bf16.msra.mxu0 %v3035_v28  ;;  %1923 = vmatprep.mubr.bf16.mxu0 %v3568_v5  ;;  %v376_v22 = vld [vmem:[%s3525_s29 + $0x3e8] sm:$0xff] }
  0x5d   : > { %1883 = vmatmul.mubr.bf16.vlgmr.msra.gmra.mxu1 %v3570_v6  ;;  %1893 = vmatprep.subr.bf16.mxu0 %v3028_v30  ;;  %v500_v23 = vld [vmem:[%s3525_s29 + $0x7c8] sm:$0xff]  ;;  %v3100_v27 = vcombine.high %v372_v21, %v376_v22  ;;  %v3099_v33 = vcombine.low %v372_v21, %v376_v22 }
  0x5e   : > { %1933 = vmatpush1.bf16.msra.mxu1 %v3163_v29  ;;  %1964 = vmatprep.mubr.bf16.mxu1 %v3577_v12  ;;  %v504_v24 = vld [vmem:[%s3525_s29 + $0x7e8] sm:$0xff] }
  0x5f   : > { %1934 = vmatprep.subr.bf16.mxu1 %v3156_v31  ;;  %v3228_v28 = vcombine.high %v500_v23, %v504_v24  ;;  %v364_v29 = vld [vmem:[%s3525_s29 + $0x388] sm:$0xff]  ;;  %v3227_v34 = vcombine.low %v500_v23, %v504_v24 }
  0x60   : > { %1894 = vmatpush1.bf16.msra.mxu0 %v3027_v36  ;;  %v368_v30 = vld [vmem:[%s3525_s29 + $0x3a8] sm:$0xff] }
  0x61   : > { %1895 = vmatprep.subr.bf16.mxu0 %v3020_v38  ;;  %v492_v31 = vld [vmem:[%s3525_s29 + $0x788] sm:$0xff]  ;;  %v3092_v35 = vcombine.high %v364_v29, %v368_v30  ;;  %v3091_v41 = vcombine.low %v364_v29, %v368_v30  ;;  %v441_v29 = vld [vmem:[%s3525_s29 + $0x5f0] sm:$0xff] }
  0x62   : > { %1935 = vmatpush1.bf16.msra.mxu1 %v3155_v37  ;;  %v496_v32 = vld [vmem:[%s3525_s29 + $0x7a8] sm:$0xff] }
  0x63   : > { %1936 = vmatprep.subr.bf16.mxu1 %v3148_v39  ;;  %v3220_v36 = vcombine.high %v492_v31, %v496_v32  ;;  %v356_v37 = vld [vmem:[%s3525_s29 + $0x348] sm:$0xff]  ;;  %v3219_v42 = vcombine.low %v492_v31, %v496_v32 }
  0x64   : > { %1896 = vmatpush1.bf16.msra.mxu0 %v3019_v44  ;;  %v360_v38 = vld [vmem:[%s3525_s29 + $0x368] sm:$0xff] }
  0x65   : > { %1897 = vmatprep.subr.bf16.mxu0 %v3012_v47  ;;  %v484_v39 = vld [vmem:[%s3525_s29 + $0x748] sm:$0xff]  ;;  %v3084_v43 = vcombine.high %v356_v37, %v360_v38  ;;  %v3083_v50 = vcombine.low %v356_v37, %v360_v38  ;;  %v433_v37 = vld [vmem:[%s3525_s29 + $0x5b0] sm:$0xff] }
  0x66   : > { %1937 = vmatpush1.bf16.msra.mxu1 %v3147_v46  ;;  %v488_v40 = vld [vmem:[%s3525_s29 + $0x768] sm:$0xff] }
  0x67   : > { %1938 = vmatprep.subr.bf16.mxu1 %v3140_v48  ;;  %v3212_v44 = vcombine.high %v484_v39, %v488_v40  ;;  %v348_v46 = vld [vmem:[%s3525_s29 + $0x308] sm:$0xff]  ;;  %v3211_v51 = vcombine.low %v484_v39, %v488_v40 }
  0x68   : > { %1898 = vmatpush1.bf16.msra.mxu0 %v3011_v53  ;;  %v352_v47 = vld [vmem:[%s3525_s29 + $0x328] sm:$0xff] }
  0x69   : > { %1899 = vmatprep.subr.bf16.mxu0 %v3004_v55  ;;  %v476_v48 = vld [vmem:[%s3525_s29 + $0x708] sm:$0xff]  ;;  %v3076_v52 = vcombine.high %v348_v46, %v352_v47  ;;  %v3075_v58 = vcombine.low %v348_v46, %v352_v47  ;;  %v425_v46 = vld [vmem:[%s3525_s29 + $0x570] sm:$0xff] }
  0x6a   : > { %1939 = vmatpush1.bf16.msra.mxu1 %v3139_v54  ;;  %v480_v49 = vld [vmem:[%s3525_s29 + $0x728] sm:$0xff] }
  0x6b   : > { %1940 = vmatprep.subr.bf16.mxu1 %v3132_v56  ;;  %v3204_v53 = vcombine.high %v476_v48, %v480_v49  ;;  %v340_v54 = vld [vmem:[%s3525_s29 + $0x2c8] sm:$0xff]  ;;  %v3203_v59 = vcombine.low %v476_v48, %v480_v49 }
  0x6c   : > { %1900 = vmatpush1.bf16.msra.mxu0 %v3003_v61  ;;  %v344_v55 = vld [vmem:[%s3525_s29 + $0x2e8] sm:$0xff] }
  0x6d   : > { %1901 = vmatprep.subr.bf16.mxu0 %v2996_v63  ;;  %v468_v56 = vld [vmem:[%s3525_s29 + $0x6c8] sm:$0xff]  ;;  %v3068_v60 = vcombine.high %v340_v54, %v344_v55  ;;  %v3067_v3 = vcombine.low %v340_v54, %v344_v55  ;;  %v417_v54 = vld [vmem:[%s3525_s29 + $0x530] sm:$0xff] }
  0x6e   : > { %1941 = vmatpush1.bf16.msra.mxu1 %v3131_v62  ;;  %v472_v57 = vld [vmem:[%s3525_s29 + $0x6e8] sm:$0xff] }
  0x6f   : > { %1942 = vmatprep.subr.bf16.mxu1 %v3124_v1  ;;  %v3196_v61 = vcombine.high %v468_v56, %v472_v57  ;;  %v332_v62 = vld [vmem:[%s3525_s29 + $0x288] sm:$0xff]  ;;  %v3195_v4 = vcombine.low %v468_v56, %v472_v57 }
  0x70   : > { %1902 = vmatpush1.bf16.msra.mxu0 %v2995_v8  ;;  %v336_v63 = vld [vmem:[%s3525_s29 + $0x2a8] sm:$0xff] }
  0x71   : > { %1903 = vmatprep.subr.bf16.mxu0 %v2988_v10  ;;  %v460_v1 = vld [vmem:[%s3525_s29 + $0x688] sm:$0xff]  ;;  %v3060_v7 = vcombine.high %v332_v62, %v336_v63  ;;  %v3059_v14 = vcombine.low %v332_v62, %v336_v63  ;;  %v409_v62 = vld [vmem:[%s3525_s29 + $0x4f0] sm:$0xff] }
  0x72   : > { %1943 = vmatpush1.bf16.msra.mxu1 %v3123_v9  ;;  %v464_v2 = vld [vmem:[%s3525_s29 + $0x6a8] sm:$0xff] }
  0x73   : > { %1944 = vmatprep.subr.bf16.mxu1 %v3116_v11  ;;  %v3188_v8 = vcombine.high %v460_v1, %v464_v2  ;;  %v324_v9 = vld [vmem:[%s3525_s29 + $0x248] sm:$0xff]  ;;  %v3187_v15 = vcombine.low %v460_v1, %v464_v2 }
  0x74   : > { %1904 = vmatpush1.bf16.msra.mxu0 %v2987_v17  ;;  %v328_v10 = vld [vmem:[%s3525_s29 + $0x268] sm:$0xff] }
  0x75   : > { %1905 = vmatprep.subr.bf16.mxu0 %v2980_v19  ;;  %v452_v11 = vld [vmem:[%s3525_s29 + $0x648] sm:$0xff]  ;;  %v3052_v16 = vcombine.high %v324_v9, %v328_v10  ;;  %v3051_v22 = vcombine.low %v324_v9, %v328_v10  ;;  %v401_v9 = vld [vmem:[%s3525_s29 + $0x4b0] sm:$0xff] }
  0x76   : > { %1945 = vmatpush1.bf16.msra.mxu1 %v3115_v18  ;;  %v456_v13 = vld [vmem:[%s3525_s29 + $0x668] sm:$0xff] }
  0x77   : > { %1946 = vmatprep.subr.bf16.mxu1 %v3108_v20  ;;  %v3180_v17 = vcombine.high %v452_v11, %v456_v13  ;;  %v316_v18 = vld [vmem:[%s3525_s29 + $0x208] sm:$0xff]  ;;  %v3179_v23 = vcombine.low %v452_v11, %v456_v13 }
  0x78   : > { %1906 = vmatpush1.bf16.msra.mxu0 %v2979_v25  ;;  %v320_v19 = vld [vmem:[%s3525_s29 + $0x228] sm:$0xff] }
  0x79   : > { %1907 = vmatprep.subr.bf16.mxu0 %v3100_v27  ;;  %v444_v20 = vld [vmem:[%s3525_s29 + $0x608] sm:$0xff]  ;;  %v3044_v24 = vcombine.high %v316_v18, %v320_v19  ;;  %v313_v27 = vld [vmem:[%s3525_s29 + $0x1f0] sm:$0xff]  ;;  %v3043_v30 = vcombine.low %v316_v18, %v320_v19 }
  0x7a   : > { %1947 = vmatpush1.bf16.msra.mxu1 %v3107_v26  ;;  %v448_v21 = vld [vmem:[%s3525_s29 + $0x628] sm:$0xff]  ;;  %v309_v26 = vld [vmem:[%s3525_s29 + $0x1d0] sm:$0xff] }
  0x7b   : > { %1948 = vmatprep.subr.bf16.mxu1 %v3228_v28  ;;  %v3172_v25 = vcombine.high %v444_v20, %v448_v21  ;;  %v437_v28 = vld [vmem:[%s3525_s29 + $0x5d0] sm:$0xff]  ;;  %v3171_v31 = vcombine.low %v444_v20, %v448_v21  ;;  %v3038_v32 = vcombine.high %v309_v26, %v313_v27  ;;  %v3037_v38 = vcombine.low %v309_v26, %v313_v27 }
  0x7c   : > { %1908 = vmatpush2.bf16.msra.mxu0 %v3099_v33  ;;  %v3166_v33 = vcombine.high %v437_v28, %v441_v29  ;;  %v3165_v39 = vcombine.low %v437_v28, %v441_v29  ;;  %v393_v18 = vld [vmem:[%s3525_s29 + $0x470] sm:$0xff] }
  0x7d   : > { %1909 = vmatprep.subr.bf16.mxu0 %v3092_v35  ;;  %v305_v35 = vld [vmem:[%s3525_s29 + $0x1b0] sm:$0xff] }
  0x7e   : > { %1949 = vmatpush2.bf16.msra.mxu1 %v3227_v34  ;;  %v301_v34 = vld [vmem:[%s3525_s29 + $0x190] sm:$0xff] }
  0x7f   : > { %1950 = vmatprep.subr.bf16.mxu1 %v3220_v36  ;;  %v429_v36 = vld [vmem:[%s3525_s29 + $0x590] sm:$0xff]  ;;  %v3030_v40 = vcombine.high %v301_v34, %v305_v35  ;;  %v3029_v47 = vcombine.low %v301_v34, %v305_v35 }
  0x80   : > { %1910 = vmatpush2.bf16.msra.mxu0 %v3091_v41  ;;  %v3158_v41 = vcombine.high %v429_v36, %v433_v37  ;;  %v3157_v48 = vcombine.low %v429_v36, %v433_v37  ;;  %v385_v26 = vld [vmem:[%s3525_s29 + $0x430] sm:$0xff] }
  0x81   : > { %1911 = vmatprep.subr.bf16.mxu0 %v3084_v43  ;;  %v297_v43 = vld [vmem:[%s3525_s29 + $0x170] sm:$0xff] }
  0x82   : > { %1951 = vmatpush2.bf16.msra.mxu1 %v3219_v42  ;;  %v293_v42 = vld [vmem:[%s3525_s29 + $0x150] sm:$0xff] }
  0x83   : > { %1952 = vmatprep.subr.bf16.mxu1 %v3212_v44  ;;  %v421_v44 = vld [vmem:[%s3525_s29 + $0x550] sm:$0xff]  ;;  %v3022_v49 = vcombine.high %v293_v42, %v297_v43  ;;  %v3021_v55 = vcombine.low %v293_v42, %v297_v43 }
  0x84   : > { %1912 = vmatpush2.bf16.msra.mxu0 %v3083_v50  ;;  %v3150_v50 = vcombine.high %v421_v44, %v425_v46  ;;  %v3149_v56 = vcombine.low %v421_v44, %v425_v46  ;;  %v505_v34 = vld [vmem:[%s3525_s29 + $0x7f0] sm:$0xff] }
  0x85   : > { %1913 = vmatprep.subr.bf16.mxu0 %v3076_v52  ;;  %v289_v52 = vld [vmem:[%s3525_s29 + $0x130] sm:$0xff] }
  0x86   : > { %1953 = vmatpush2.bf16.msra.mxu1 %v3211_v51  ;;  %v285_v51 = vld [vmem:[%s3525_s29 + $0x110] sm:$0xff] }
  0x87   : > { %1954 = vmatprep.subr.bf16.mxu1 %v3204_v53  ;;  %v413_v53 = vld [vmem:[%s3525_s29 + $0x510] sm:$0xff]  ;;  %v3014_v57 = vcombine.high %v285_v51, %v289_v52  ;;  %v3013_v63 = vcombine.low %v285_v51, %v289_v52 }
  0x88   : > { %1914 = vmatpush2.bf16.msra.mxu0 %v3075_v58  ;;  %v3142_v58 = vcombine.high %v413_v53, %v417_v54  ;;  %v3141_v1 = vcombine.low %v413_v53, %v417_v54  ;;  %v497_v42 = vld [vmem:[%s3525_s29 + $0x7b0] sm:$0xff] }
  0x89   : > { %1915 = vmatprep.subr.bf16.mxu0 %v3068_v60  ;;  %v281_v60 = vld [vmem:[%s3525_s29 + $0xf0] sm:$0xff] }
  0x8a   : > { %1955 = vmatpush2.bf16.msra.mxu1 %v3203_v59  ;;  %v277_v59 = vld [vmem:[%s3525_s29 + $0xd0] sm:$0xff] }
  0x8b   : > { %1956 = vmatprep.subr.bf16.mxu1 %v3196_v61  ;;  %v405_v61 = vld [vmem:[%s3525_s29 + $0x4d0] sm:$0xff]  ;;  %v3006_v2 = vcombine.high %v277_v59, %v281_v60  ;;  %v3005_v10 = vcombine.low %v277_v59, %v281_v60 }
  0x8c   : > { %1916 = vmatpush2.bf16.msra.mxu0 %v3067_v3  ;;  %v3134_v3 = vcombine.high %v405_v61, %v409_v62  ;;  %v3133_v11 = vcombine.low %v405_v61, %v409_v62  ;;  %v489_v51 = vld [vmem:[%s3525_s29 + $0x770] sm:$0xff] }
  0x8d   : > { %1917 = vmatprep.subr.bf16.mxu0 %v3060_v7  ;;  %v273_v7 = vld [vmem:[%s3525_s29 + $0xb0] sm:$0xff] }
  0x8e   : > { %1957 = vmatpush2.bf16.msra.mxu1 %v3195_v4  ;;  %v269_v4 = vld [vmem:[%s3525_s29 + $0x90] sm:$0xff] }
  0x8f   : > { %1958 = vmatprep.subr.bf16.mxu1 %v3188_v8  ;;  %v397_v8 = vld [vmem:[%s3525_s29 + $0x490] sm:$0xff]  ;;  %v2998_v13 = vcombine.high %v269_v4, %v273_v7  ;;  %v2997_v19 = vcombine.low %v269_v4, %v273_v7 }
  0x90   : > { %1918 = vmatpush2.bf16.msra.mxu0 %v3059_v14  ;;  %v3126_v14 = vcombine.high %v397_v8, %v401_v9  ;;  %v3125_v20 = vcombine.low %v397_v8, %v401_v9  ;;  %v481_v59 = vld [vmem:[%s3525_s29 + $0x730] sm:$0xff] }
  0x91   : > { %1919 = vmatprep.subr.bf16.mxu0 %v3052_v16  ;;  %v265_v16 = vld [vmem:[%s3525_s29 + $0x70] sm:$0xff] }
  0x92   : > { %1959 = vmatpush2.bf16.msra.mxu1 %v3187_v15  ;;  %v261_v15 = vld [vmem:[%s3525_s29 + $0x50] sm:$0xff] }
  0x93   : > { %1960 = vmatprep.subr.bf16.mxu1 %v3180_v17  ;;  %v389_v17 = vld [vmem:[%s3525_s29 + $0x450] sm:$0xff]  ;;  %v2990_v21 = vcombine.high %v261_v15, %v265_v16  ;;  %v2989_v27 = vcombine.low %v261_v15, %v265_v16 }
  0x94   : > { %1920 = vmatpush2.bf16.msra.mxu0 %v3051_v22  ;;  %v3118_v22 = vcombine.high %v389_v17, %v393_v18  ;;  %v3117_v28 = vcombine.low %v389_v17, %v393_v18  ;;  %v473_v4 = vld [vmem:[%s3525_s29 + $0x6f0] sm:$0xff] }
  0x95   : > { %1921 = vmatprep.subr.bf16.mxu0 %v3044_v24  ;;  %v257_v24 = vld [vmem:[%s3525_s29 + $0x30] sm:$0xff] }
  0x96   : > { %1961 = vmatpush2.bf16.msra.mxu1 %v3179_v23  ;;  %v253_v23 = vld [vmem:[%s3525_s29 + $0x10] sm:$0xff] }
  0x97   : > { %1962 = vmatprep.subr.bf16.mxu1 %v3172_v25  ;;  %v381_v25 = vld [vmem:[%s3525_s29 + $0x410] sm:$0xff]  ;;  %v2982_v29 = vcombine.high %v253_v23, %v257_v24  ;;  %v2981_v35 = vcombine.low %v253_v23, %v257_v24 }
  0x98   : > { %1922 = vmatpush2.bf16.msra.mxu0 %v3043_v30  ;;  %v3110_v30 = vcombine.high %v381_v25, %v385_v26  ;;  %v3109_v36 = vcombine.low %v381_v25, %v385_v26  ;;  %v465_v15 = vld [vmem:[%s3525_s29 + $0x6b0] sm:$0xff] }
  0x99   : > { %1973 = vmatprep.subr.bf16.mxu0 %v3038_v32  ;;  %v377_v32 = vld [vmem:[%s3525_s29 + $0x3f0] sm:$0xff] }
  0x9a   : > { %1963 = vmatpush2.bf16.msra.mxu1 %v3171_v31  ;;  %v373_v31 = vld [vmem:[%s3525_s29 + $0x3d0] sm:$0xff] }
  0x9b   : > { %2014 = vmatprep.subr.bf16.mxu1 %v3166_v33  ;;  %1924 = vmatmul.mubr.bf16.vlgmr.msra.gmra.mxu0 %v3562_v0  ;;  %v501_v33 = vld [vmem:[%s3525_s29 + $0x7d0] sm:$0xff]  ;;  %v3102_v37 = vcombine.high %v373_v31, %v377_v32  ;;  %v3101_v43 = vcombine.low %v373_v31, %v377_v32 }
  0x9c   : > { %1974 = vmatpush1.bf16.msra.mxu0 %v3037_v38  ;;  %2005 = vmatprep.mubr.bf16.mxu0 %v3568_v5  ;;  %v3230_v38 = vcombine.high %v501_v33, %v505_v34  ;;  %v3229_v44 = vcombine.low %v501_v33, %v505_v34  ;;  %v457_v23 = vld [vmem:[%s3525_s29 + $0x670] sm:$0xff] }
  0x9d   : > { %1965 = vmatmul.mubr.bf16.vlgmr.msra.gmra.mxu1 %v3570_v6  ;;  %1975 = vmatprep.subr.bf16.mxu0 %v3030_v40  ;;  %v369_v40 = vld [vmem:[%s3525_s29 + $0x3b0] sm:$0xff] }
  0x9e   : > { %2015 = vmatpush1.bf16.msra.mxu1 %v3165_v39  ;;  %2046 = vmatprep.mubr.bf16.mxu1 %v3577_v12  ;;  %v365_v39 = vld [vmem:[%s3525_s29 + $0x390] sm:$0xff] }
  0x9f   : > { %2016 = vmatprep.subr.bf16.mxu1 %v3158_v41  ;;  %v493_v41 = vld [vmem:[%s3525_s29 + $0x790] sm:$0xff]  ;;  %v3094_v46 = vcombine.high %v365_v39, %v369_v40  ;;  %v3093_v52 = vcombine.low %v365_v39, %v369_v40  ;;  %v442_v39 = vld [vmem:[%s3525_s29 + $0x5f8] sm:$0xff] }
  0xa0   : > { %1976 = vmatpush1.bf16.msra.mxu0 %v3029_v47  ;;  %v3222_v47 = vcombine.high %v493_v41, %v497_v42  ;;  %v3221_v53 = vcombine.low %v493_v41, %v497_v42  ;;  %v449_v31 = vld [vmem:[%s3525_s29 + $0x630] sm:$0xff] }
  0xa1   : > { %1977 = vmatprep.subr.bf16.mxu0 %v3022_v49  ;;  %v361_v49 = vld [vmem:[%s3525_s29 + $0x370] sm:$0xff] }
  0xa2   : > { %2017 = vmatpush1.bf16.msra.mxu1 %v3157_v48  ;;  %v357_v48 = vld [vmem:[%s3525_s29 + $0x350] sm:$0xff] }
  0xa3   : > { %2018 = vmatprep.subr.bf16.mxu1 %v3150_v50  ;;  %v485_v50 = vld [vmem:[%s3525_s29 + $0x750] sm:$0xff]  ;;  %v3086_v54 = vcombine.high %v357_v48, %v361_v49  ;;  %v3085_v60 = vcombine.low %v357_v48, %v361_v49  ;;  %v434_v48 = vld [vmem:[%s3525_s29 + $0x5b8] sm:$0xff] }
  0xa4   : > { %1978 = vmatpush1.bf16.msra.mxu0 %v3021_v55  ;;  %v3214_v55 = vcombine.high %v485_v50, %v489_v51  ;;  %v3213_v61 = vcombine.low %v485_v50, %v489_v51 }
  0xa5   : > { %1979 = vmatprep.subr.bf16.mxu0 %v3014_v57  ;;  %v353_v57 = vld [vmem:[%s3525_s29 + $0x330] sm:$0xff] }
  0xa6   : > { %2019 = vmatpush1.bf16.msra.mxu1 %v3149_v56  ;;  %v349_v56 = vld [vmem:[%s3525_s29 + $0x310] sm:$0xff] }
  0xa7   : > { %2020 = vmatprep.subr.bf16.mxu1 %v3142_v58  ;;  %v477_v58 = vld [vmem:[%s3525_s29 + $0x710] sm:$0xff]  ;;  %v3078_v62 = vcombine.high %v349_v56, %v353_v57  ;;  %v3077_v7 = vcombine.low %v349_v56, %v353_v57  ;;  %v426_v56 = vld [vmem:[%s3525_s29 + $0x578] sm:$0xff] }
  0xa8   : > { %1980 = vmatpush1.bf16.msra.mxu0 %v3013_v63  ;;  %v3206_v63 = vcombine.high %v477_v58, %v481_v59  ;;  %v3205_v8 = vcombine.low %v477_v58, %v481_v59 }
  0xa9   : > { %1981 = vmatprep.subr.bf16.mxu0 %v3006_v2  ;;  %v345_v2 = vld [vmem:[%s3525_s29 + $0x2f0] sm:$0xff] }
  0xaa   : > { %2021 = vmatpush1.bf16.msra.mxu1 %v3141_v1  ;;  %v341_v1 = vld [vmem:[%s3525_s29 + $0x2d0] sm:$0xff] }
  0xab   : > { %2022 = vmatprep.subr.bf16.mxu1 %v3134_v3  ;;  %v469_v3 = vld [vmem:[%s3525_s29 + $0x6d0] sm:$0xff]  ;;  %v3070_v9 = vcombine.high %v341_v1, %v345_v2  ;;  %v3069_v16 = vcombine.low %v341_v1, %v345_v2  ;;  %v418_v1 = vld [vmem:[%s3525_s29 + $0x538] sm:$0xff] }
  0xac   : > { %1982 = vmatpush1.bf16.msra.mxu0 %v3005_v10  ;;  %v3198_v10 = vcombine.high %v469_v3, %v473_v4  ;;  %v3197_v17 = vcombine.low %v469_v3, %v473_v4 }
  0xad   : > { %1983 = vmatprep.subr.bf16.mxu0 %v2998_v13  ;;  %v337_v13 = vld [vmem:[%s3525_s29 + $0x2b0] sm:$0xff] }
  0xae   : > { %2023 = vmatpush1.bf16.msra.mxu1 %v3133_v11  ;;  %v333_v11 = vld [vmem:[%s3525_s29 + $0x290] sm:$0xff] }
  0xaf   : > { %2024 = vmatprep.subr.bf16.mxu1 %v3126_v14  ;;  %v461_v14 = vld [vmem:[%s3525_s29 + $0x690] sm:$0xff]  ;;  %v3062_v18 = vcombine.high %v333_v11, %v337_v13  ;;  %v3061_v24 = vcombine.low %v333_v11, %v337_v13 }
  0xb0   : > { %1984 = vmatpush1.bf16.msra.mxu0 %v2997_v19  ;;  %v3190_v19 = vcombine.high %v461_v14, %v465_v15  ;;  %v3189_v25 = vcombine.low %v461_v14, %v465_v15  ;;  %v270_v15 = vld [vmem:[%s3525_s29 + $0x98] sm:$0xff] }
  0xb1   : > { %1985 = vmatprep.subr.bf16.mxu0 %v2990_v21  ;;  %v329_v21 = vld [vmem:[%s3525_s29 + $0x270] sm:$0xff] }
  0xb2   : > { %2025 = vmatpush1.bf16.msra.mxu1 %v3125_v20  ;;  %v325_v20 = vld [vmem:[%s3525_s29 + $0x250] sm:$0xff] }
  0xb3   : > { %2026 = vmatprep.subr.bf16.mxu1 %v3118_v22  ;;  %v453_v22 = vld [vmem:[%s3525_s29 + $0x650] sm:$0xff]  ;;  %v3054_v26 = vcombine.high %v325_v20, %v329_v21  ;;  %v3053_v32 = vcombine.low %v325_v20, %v329_v21 }
  0xb4   : > { %1986 = vmatpush1.bf16.msra.mxu0 %v2989_v27  ;;  %v3182_v27 = vcombine.high %v453_v22, %v457_v23  ;;  %v3181_v33 = vcombine.low %v453_v22, %v457_v23  ;;  %v262_v23 = vld [vmem:[%s3525_s29 + $0x58] sm:$0xff] }
  0xb5   : > { %1987 = vmatprep.subr.bf16.mxu0 %v2982_v29  ;;  %v321_v29 = vld [vmem:[%s3525_s29 + $0x230] sm:$0xff] }
  0xb6   : > { %2027 = vmatpush1.bf16.msra.mxu1 %v3117_v28  ;;  %v317_v28 = vld [vmem:[%s3525_s29 + $0x210] sm:$0xff] }
  0xb7   : > { %2028 = vmatprep.subr.bf16.mxu1 %v3110_v30  ;;  %v445_v30 = vld [vmem:[%s3525_s29 + $0x610] sm:$0xff]  ;;  %v3046_v34 = vcombine.high %v317_v28, %v321_v29  ;;  %v3045_v40 = vcombine.low %v317_v28, %v321_v29 }
  0xb8   : > { %1988 = vmatpush1.bf16.msra.mxu0 %v2981_v35  ;;  %v3174_v35 = vcombine.high %v445_v30, %v449_v31  ;;  %v3173_v41 = vcombine.low %v445_v30, %v449_v31  ;;  %v254_v31 = vld [vmem:[%s3525_s29 + $0x18] sm:$0xff] }
  0xb9   : > { %1989 = vmatprep.subr.bf16.mxu0 %v3102_v37  ;;  %v314_v37 = vld [vmem:[%s3525_s29 + $0x1f8] sm:$0xff] }
  0xba   : > { %2029 = vmatpush1.bf16.msra.mxu1 %v3109_v36  ;;  %v310_v36 = vld [vmem:[%s3525_s29 + $0x1d8] sm:$0xff] }
  0xbb   : > { %2030 = vmatprep.subr.bf16.mxu1 %v3230_v38  ;;  %v438_v38 = vld [vmem:[%s3525_s29 + $0x5d8] sm:$0xff]  ;;  %v3040_v42 = vcombine.high %v310_v36, %v314_v37  ;;  %v3039_v49 = vcombine.low %v310_v36, %v314_v37 }
  0xbc   : > { %1990 = vmatpush2.bf16.msra.mxu0 %v3101_v43  ;;  %v3168_v43 = vcombine.high %v438_v38, %v442_v39  ;;  %v3167_v50 = vcombine.low %v438_v38, %v442_v39  ;;  %v374_v39 = vld [vmem:[%s3525_s29 + $0x3d8] sm:$0xff] }
  0xbd   : > { %1991 = vmatprep.subr.bf16.mxu0 %v3094_v46  ;;  %v306_v46 = vld [vmem:[%s3525_s29 + $0x1b8] sm:$0xff] }
  0xbe   : > { %2031 = vmatpush2.bf16.msra.mxu1 %v3229_v44  ;;  %v302_v44 = vld [vmem:[%s3525_s29 + $0x198] sm:$0xff] }
  0xbf   : > { %2032 = vmatprep.subr.bf16.mxu1 %v3222_v47  ;;  %v430_v47 = vld [vmem:[%s3525_s29 + $0x598] sm:$0xff]  ;;  %v3032_v51 = vcombine.high %v302_v44, %v306_v46  ;;  %v3031_v57 = vcombine.low %v302_v44, %v306_v46 }
  0xc0   : > { %1992 = vmatpush2.bf16.msra.mxu0 %v3093_v52  ;;  %v3160_v52 = vcombine.high %v430_v47, %v434_v48  ;;  %v3159_v58 = vcombine.low %v430_v47, %v434_v48  ;;  %v366_v48 = vld [vmem:[%s3525_s29 + $0x398] sm:$0xff] }
  0xc1   : > { %1993 = vmatprep.subr.bf16.mxu0 %v3086_v54  ;;  %v298_v54 = vld [vmem:[%s3525_s29 + $0x178] sm:$0xff] }
  0xc2   : > { %2033 = vmatpush2.bf16.msra.mxu1 %v3221_v53  ;;  %v294_v53 = vld [vmem:[%s3525_s29 + $0x158] sm:$0xff] }
  0xc3   : > { %2034 = vmatprep.subr.bf16.mxu1 %v3214_v55  ;;  %v422_v55 = vld [vmem:[%s3525_s29 + $0x558] sm:$0xff]  ;;  %v3024_v59 = vcombine.high %v294_v53, %v298_v54  ;;  %v3023_v2 = vcombine.low %v294_v53, %v298_v54 }
  0xc4   : > { %1994 = vmatpush2.bf16.msra.mxu0 %v3085_v60  ;;  %v3152_v60 = vcombine.high %v422_v55, %v426_v56  ;;  %v3151_v3 = vcombine.low %v422_v55, %v426_v56  ;;  %v358_v56 = vld [vmem:[%s3525_s29 + $0x358] sm:$0xff] }
  0xc5   : > { %1995 = vmatprep.subr.bf16.mxu0 %v3078_v62  ;;  %v290_v62 = vld [vmem:[%s3525_s29 + $0x138] sm:$0xff] }
  0xc6   : > { %2035 = vmatpush2.bf16.msra.mxu1 %v3213_v61  ;;  %v286_v61 = vld [vmem:[%s3525_s29 + $0x118] sm:$0xff] }
  0xc7   : > { %2036 = vmatprep.subr.bf16.mxu1 %v3206_v63  ;;  %v414_v63 = vld [vmem:[%s3525_s29 + $0x518] sm:$0xff]  ;;  %v3016_v4 = vcombine.high %v286_v61, %v290_v62  ;;  %v3015_v11 = vcombine.low %v286_v61, %v290_v62 }
  0xc8   : > { %1996 = vmatpush2.bf16.msra.mxu0 %v3077_v7  ;;  %v3144_v7 = vcombine.high %v414_v63, %v418_v1 }
  0xc9   : > { %1997 = vmatprep.subr.bf16.mxu0 %v3070_v9  ;;  %v282_v9 = vld [vmem:[%s3525_s29 + $0xf8] sm:$0xff] }
  0xca   : > { %2037 = vmatpush2.bf16.msra.mxu1 %v3205_v8  ;;  %v278_v8 = vld [vmem:[%s3525_s29 + $0xd8] sm:$0xff] }
  0xcb   : > { %2038 = vmatprep.subr.bf16.mxu1 %v3198_v10  ;;  %v406_v10 = vld [vmem:[%s3525_s29 + $0x4d8] sm:$0xff]  ;;  %v3008_v13 = vcombine.high %v278_v8, %v282_v9 }
  0xcc   : > { %1998 = vmatpush2.bf16.msra.mxu0 %v3069_v16  ;;  %v274_v16 = vld [vmem:[%s3525_s29 + $0xb8] sm:$0xff] }
  0xcd   : > { %1999 = vmatprep.subr.bf16.mxu0 %v3062_v18  ;;  %v402_v18 = vld [vmem:[%s3525_s29 + $0x4b8] sm:$0xff]  ;;  %v3000_v21 = vcombine.high %v270_v15, %v274_v16 }
  0xce   : > { %2039 = vmatpush2.bf16.msra.mxu1 %v3197_v17  ;;  %v398_v17 = vld [vmem:[%s3525_s29 + $0x498] sm:$0xff] }
  0xcf   : > { %2040 = vmatprep.subr.bf16.mxu1 %v3190_v19  ;;  %v3007_v19 = vcombine.low %v278_v8, %v282_v9  ;;  %v3128_v22 = vcombine.high %v398_v17, %v402_v18  ;;  %v3127_v28 = vcombine.low %v398_v17, %v402_v18  ;;  %v334_v18 = vld [vmem:[%s3525_s29 + $0x298] sm:$0xff] }
  0xd0   : > { %2000 = vmatpush2.bf16.msra.mxu0 %v3061_v24  ;;  %v266_v24 = vld [vmem:[%s3525_s29 + $0x78] sm:$0xff] }
  0xd1   : > { %2001 = vmatprep.subr.bf16.mxu0 %v3054_v26  ;;  %v394_v26 = vld [vmem:[%s3525_s29 + $0x478] sm:$0xff]  ;;  %v2992_v29 = vcombine.high %v262_v23, %v266_v24 }
  0xd2   : > { %2041 = vmatpush2.bf16.msra.mxu1 %v3189_v25  ;;  %v390_v25 = vld [vmem:[%s3525_s29 + $0x458] sm:$0xff] }
  0xd3   : > { %2042 = vmatprep.subr.bf16.mxu1 %v3182_v27  ;;  %v2999_v27 = vcombine.low %v270_v15, %v274_v16  ;;  %v3120_v30 = vcombine.high %v390_v25, %v394_v26  ;;  %v3119_v36 = vcombine.low %v390_v25, %v394_v26  ;;  %v326_v26 = vld [vmem:[%s3525_s29 + $0x258] sm:$0xff] }
  0xd4   : > { %2002 = vmatpush2.bf16.msra.mxu0 %v3053_v32  ;;  %v258_v32 = vld [vmem:[%s3525_s29 + $0x38] sm:$0xff] }
  0xd5   : > { %2003 = vmatprep.subr.bf16.mxu0 %v3046_v34  ;;  %v386_v34 = vld [vmem:[%s3525_s29 + $0x438] sm:$0xff]  ;;  %v2984_v37 = vcombine.high %v254_v31, %v258_v32 }
  0xd6   : > { %2043 = vmatpush2.bf16.msra.mxu1 %v3181_v33  ;;  %v382_v33 = vld [vmem:[%s3525_s29 + $0x418] sm:$0xff] }
  0xd7   : > { %2044 = vmatprep.subr.bf16.mxu1 %v3174_v35  ;;  %v2991_v35 = vcombine.low %v262_v23, %v266_v24  ;;  %v3112_v38 = vcombine.high %v382_v33, %v386_v34  ;;  %v3111_v44 = vcombine.low %v382_v33, %v386_v34  ;;  %v318_v34 = vld [vmem:[%s3525_s29 + $0x218] sm:$0xff] }
  0xd8   : > { %2004 = vmatpush2.bf16.msra.mxu0 %v3045_v40  ;;  %v378_v40 = vld [vmem:[%s3525_s29 + $0x3f8] sm:$0xff] }
  0xd9   : > { %2055 = vmatprep.subr.bf16.mxu0 %v3040_v42  ;;  %v506_v42 = vld [vmem:[%s3525_s29 + $0x7f8] sm:$0xff]  ;;  %v3104_v46 = vcombine.high %v374_v39, %v378_v40 }
  0xda   : > { %2045 = vmatpush2.bf16.msra.mxu1 %v3173_v41  ;;  %v502_v41 = vld [vmem:[%s3525_s29 + $0x7d8] sm:$0xff] }
  0xdb   : > { %2096 = vmatprep.subr.bf16.mxu1 %v3168_v43  ;;  %2006 = vmatmul.mubr.bf16.vlgmr.msra.gmra.mxu0 %v3562_v0  ;;  %v2983_v43 = vcombine.low %v254_v31, %v258_v32  ;;  %v3232_v47 = vcombine.high %v502_v41, %v506_v42  ;;  %v3231_v53 = vcombine.low %v502_v41, %v506_v42 }
  0xdc   : > { %2056 = vmatpush1.bf16.msra.mxu0 %v3039_v49  ;;  %2087 = vmatprep.mubr.bf16.mxu0 %v3568_v5  ;;  %v410_v5 = vld [vmem:[%s3525_s29 + $0x4f8] sm:$0xff] }
  0xdd   : > { %2047 = vmatmul.mubr.bf16.vlgmr.msra.gmra.mxu1 %v3570_v6  ;;  %2057 = vmatprep.subr.bf16.mxu0 %v3032_v51  ;;  %v3136_v14 = vcombine.high %v406_v10, %v410_v5  ;;  %v3135_v20 = vcombine.low %v406_v10, %v410_v5  ;;  %v370_v49 = vld [vmem:[%s3525_s29 + $0x3b8] sm:$0xff] }
  0xde   : > { %2097 = vmatpush1.bf16.msra.mxu1 %v3167_v50  ;;  %2128 = vmatprep.mubr.bf16.mxu1 %v3577_v12  ;;  %v3143_v12 = vcombine.low %v414_v63, %v418_v1  ;;  %v494_v50 = vld [vmem:[%s3525_s29 + $0x798] sm:$0xff]  ;;  %v3096_v54 = vcombine.high %v366_v48, %v370_v49 }
  0xdf   : > { %2098 = vmatprep.subr.bf16.mxu1 %v3160_v52  ;;  %v498_v51 = vld [vmem:[%s3525_s29 + $0x7b8] sm:$0xff]  ;;  %v3103_v52 = vcombine.low %v374_v39, %v378_v40 }
  0xe0   : > { %2058 = vmatpush1.bf16.msra.mxu0 %v3031_v57  ;;  %v3224_v55 = vcombine.high %v494_v50, %v498_v51  ;;  %v362_v57 = vld [vmem:[%s3525_s29 + $0x378] sm:$0xff]  ;;  %v3223_v61 = vcombine.low %v494_v50, %v498_v51 }
  0xe1   : > { %2059 = vmatprep.subr.bf16.mxu0 %v3024_v59  ;;  %v490_v59 = vld [vmem:[%s3525_s29 + $0x778] sm:$0xff]  ;;  %v3088_v62 = vcombine.high %v358_v56, %v362_v57 }
  0xe2   : > { %2099 = vmatpush1.bf16.msra.mxu1 %v3159_v58  ;;  %v486_v58 = vld [vmem:[%s3525_s29 + $0x758] sm:$0xff] }
  0xe3   : > { %2100 = vmatprep.subr.bf16.mxu1 %v3152_v60  ;;  %v3095_v60 = vcombine.low %v366_v48, %v370_v49  ;;  %v3216_v63 = vcombine.high %v486_v58, %v490_v59  ;;  %v350_v1 = vld [vmem:[%s3525_s29 + $0x318] sm:$0xff]  ;;  %v3215_v8 = vcombine.low %v486_v58, %v490_v59 }
  0xe4   : > { %2060 = vmatpush1.bf16.msra.mxu0 %v3023_v2  ;;  %v354_v2 = vld [vmem:[%s3525_s29 + $0x338] sm:$0xff] }
  0xe5   : > { %2061 = vmatprep.subr.bf16.mxu0 %v3016_v4  ;;  %v482_v4 = vld [vmem:[%s3525_s29 + $0x738] sm:$0xff]  ;;  %v3080_v9 = vcombine.high %v350_v1, %v354_v2 }
  0xe6   : > { %2101 = vmatpush1.bf16.msra.mxu1 %v3151_v3  ;;  %v478_v3 = vld [vmem:[%s3525_s29 + $0x718] sm:$0xff] }
  0xe7   : > { %2102 = vmatprep.subr.bf16.mxu1 %v3144_v7  ;;  %v3087_v7 = vcombine.low %v358_v56, %v362_v57  ;;  %v3208_v10 = vcombine.high %v478_v3, %v482_v4  ;;  %v342_v5 = vld [vmem:[%s3525_s29 + $0x2d8] sm:$0xff]  ;;  %v3207_v15 = vcombine.low %v478_v3, %v482_v4 }
  0xe8   : > { %2062 = vmatpush1.bf16.msra.mxu0 %v3015_v11  ;;  %v346_v11 = vld [vmem:[%s3525_s29 + $0x2f8] sm:$0xff] }
  0xe9   : > { %2063 = vmatprep.subr.bf16.mxu0 %v3008_v13  ;;  %v474_v13 = vld [vmem:[%s3525_s29 + $0x6f8] sm:$0xff]  ;;  %v3072_v16 = vcombine.high %v342_v5, %v346_v11 }
  0xea   : > { %2103 = vmatpush1.bf16.msra.mxu1 %v3143_v12  ;;  %v470_v12 = vld [vmem:[%s3525_s29 + $0x6d8] sm:$0xff] }
  0xeb   : > { %2104 = vmatprep.subr.bf16.mxu1 %v3136_v14  ;;  %v3079_v14 = vcombine.low %v350_v1, %v354_v2  ;;  %v3200_v17 = vcombine.high %v470_v12, %v474_v13  ;;  %v3199_v23 = vcombine.low %v470_v12, %v474_v13 }
  0xec   : > { %2064 = vmatpush1.bf16.msra.mxu0 %v3007_v19  ;;  %v338_v19 = vld [vmem:[%s3525_s29 + $0x2b8] sm:$0xff] }
  0xed   : > { %2065 = vmatprep.subr.bf16.mxu0 %v3000_v21  ;;  %v466_v21 = vld [vmem:[%s3525_s29 + $0x6b8] sm:$0xff]  ;;  %v3064_v24 = vcombine.high %v334_v18, %v338_v19 }
  0xee   : > { %2105 = vmatpush1.bf16.msra.mxu1 %v3135_v20  ;;  %v462_v20 = vld [vmem:[%s3525_s29 + $0x698] sm:$0xff] }
  0xef   : > { %2106 = vmatprep.subr.bf16.mxu1 %v3128_v22  ;;  %v3071_v22 = vcombine.low %v342_v5, %v346_v11  ;;  %v3192_v25 = vcombine.high %v462_v20, %v466_v21  ;;  %v3191_v31 = vcombine.low %v462_v20, %v466_v21 }
  0xf0   : > { %2066 = vmatpush1.bf16.msra.mxu0 %v2999_v27  ;;  %v330_v27 = vld [vmem:[%s3525_s29 + $0x278] sm:$0xff] }
  0xf1   : > { %2067 = vmatprep.subr.bf16.mxu0 %v2992_v29  ;;  %v458_v29 = vld [vmem:[%s3525_s29 + $0x678] sm:$0xff]  ;;  %v3056_v32 = vcombine.high %v326_v26, %v330_v27 }
  0xf2   : > { %2107 = vmatpush1.bf16.msra.mxu1 %v3127_v28  ;;  %v454_v28 = vld [vmem:[%s3525_s29 + $0x658] sm:$0xff] }
  0xf3   : > { %2108 = vmatprep.subr.bf16.mxu1 %v3120_v30  ;;  %v3063_v30 = vcombine.low %v334_v18, %v338_v19  ;;  %v3184_v33 = vcombine.high %v454_v28, %v458_v29  ;;  %v3183_v39 = vcombine.low %v454_v28, %v458_v29 }
  0xf4   : > { %2068 = vmatpush1.bf16.msra.mxu0 %v2991_v35  ;;  %v322_v35 = vld [vmem:[%s3525_s29 + $0x238] sm:$0xff] }
  0xf5   : > { %2069 = vmatprep.subr.bf16.mxu0 %v2984_v37  ;;  %v450_v37 = vld [vmem:[%s3525_s29 + $0x638] sm:$0xff]  ;;  %v3048_v40 = vcombine.high %v318_v34, %v322_v35  ;;  %v3047_v42 = vcombine.low %v318_v34, %v322_v35 }
  0xf6   : > { %2109 = vmatpush1.bf16.msra.mxu1 %v3119_v36  ;;  %v446_v36 = vld [vmem:[%s3525_s29 + $0x618] sm:$0xff] }
  0xf7   : > { %2110 = vmatprep.subr.bf16.mxu1 %v3112_v38  ;;  %v3055_v38 = vcombine.low %v326_v26, %v330_v27  ;;  %v3176_v41 = vcombine.high %v446_v36, %v450_v37  ;;  %v249_v27 = vld [vmem:[#allocation2 + $0x8] sm:$0xff] }
  0xf8   : > { %2070 = vmatpush1.bf16.msra.mxu0 %v2983_v43  ;;  %v3175_v43 = vcombine.low %v446_v36, %v450_v37 }
  0xf9   : > { %2071 = vmatprep.subr.bf16.mxu0 %v3104_v46 }
  0xfa   : > { %2111 = vmatpush1.bf16.msra.mxu1 %v3111_v44 }
  0xfb   : > { %2112 = vmatprep.subr.bf16.mxu1 %v3232_v47 }
  0xfc   : > { %2072 = vmatpush2.bf16.msra.mxu0 %v3103_v52  ;;  %v246_v52 = vld [vmem:[#allocation2 + $0x10] sm:$0xff] }
  0xfd   : > { %2073 = vmatprep.subr.bf16.mxu0 %v3096_v54 }
  0xfe   : > { %2113 = vmatpush2.bf16.msra.mxu1 %v3231_v53 }
  0xff   : > { %2114 = vmatprep.subr.bf16.mxu1 %v3224_v55 }
 0x100   : > { %2074 = vmatpush2.bf16.msra.mxu0 %v3095_v60 }
 0x101   : > { %2075 = vmatprep.subr.bf16.mxu0 %v3088_v62 }
 0x102   : > { %2115 = vmatpush2.bf16.msra.mxu1 %v3223_v61 }
 0x103   : > { %2116 = vmatprep.subr.bf16.mxu1 %v3216_v63 }
 0x104   : > { %2076 = vmatpush2.bf16.msra.mxu0 %v3087_v7 }
 0x105   : > { %2077 = vmatprep.subr.bf16.mxu0 %v3080_v9 }
 0x106   : > { %2117 = vmatpush2.bf16.msra.mxu1 %v3215_v8 }
 0x107   : > { %2118 = vmatprep.subr.bf16.mxu1 %v3208_v10 }
 0x108   : > { %2078 = vmatpush2.bf16.msra.mxu0 %v3079_v14  ;;  %v248_v14 = vld [vmem:[#allocation2 + $0x18] sm:$0xff] }
 0x109   : > { %2079 = vmatprep.subr.bf16.mxu0 %v3072_v16 }
 0x10a   : > { %2119 = vmatpush2.bf16.msra.mxu1 %v3207_v15 }
 0x10b   : > { %2120 = vmatprep.subr.bf16.mxu1 %v3200_v17 }
 0x10c   : > { %2080 = vmatpush2.bf16.msra.mxu0 %v3071_v22 }
 0x10d   : > { %2081 = vmatprep.subr.bf16.mxu0 %v3064_v24 }
 0x10e   : > { %2121 = vmatpush2.bf16.msra.mxu1 %v3199_v23 }
 0x10f   : > { %2122 = vmatprep.subr.bf16.mxu1 %v3192_v25 }
 0x110   : > { %2082 = vmatpush2.bf16.msra.mxu0 %v3063_v30 }
 0x111   : > { %2083 = vmatprep.subr.bf16.mxu0 %v3056_v32 }
 0x112   : > { %2123 = vmatpush2.bf16.msra.mxu1 %v3191_v31 }
 0x113   : > { %2124 = vmatprep.subr.bf16.mxu1 %v3184_v33 }
 0x114   : > { %2084 = vmatpush2.bf16.msra.mxu0 %v3055_v38 }
 0x115   : > { %2085 = vmatprep.subr.bf16.mxu0 %v3048_v40 }
 0x116   : > { %2125 = vmatpush2.bf16.msra.mxu1 %v3183_v39 }
 0x117   : > { %2126 = vmatprep.subr.bf16.mxu1 %v3176_v41 }
 0x118   : > { %2086 = vmatpush2.bf16.msra.mxu0 %v3047_v42 }
 0x11a   : > { %2127 = vmatpush2.bf16.msra.mxu1 %v3175_v43 }
 0x11b   : > { %v1843_v44 = vpop.f32.mrf.mxu0  ;;  %2088 = vmatmul.mubr.bf16.vlgmr.msra.gmra.mxu0 %v3562_v0 }
 0x11d   : > { %v1884_v46 = vpop.f32.mrf.mxu1  ;;  %2129 = vmatmul.mubr.bf16.vlgmr.msra.gmra.mxu1 %v3570_v6  ;;  %v1845_v48 = vpop.f32.mrf.mxu0  ;;  %v247_v6 = vld [vmem:[#allocation2] sm:$0xff] }
 0x11e   : > { %v1885_v47 = vadd.f32 %v1884_v46, %v1843_v44 }
 0x11f   : > { %v1886_v49 = vpop.f32.mrf.mxu1  ;;  %v1847_v51 = vpop.f32.mrf.mxu0 }
 0x120   : > { %v1887_v50 = vadd.f32 %v1886_v49, %v1845_v48 }
 0x121   : > { %v1888_v53 = vpop.f32.mrf.mxu1  ;;  %v1848_v55 = vpop.f32.mrf.mxu0 }
 0x122   : > { %v2145_v54 = vcombine.low %v1885_v47, %v1887_v50 }
 0x123   : > { %v1889_v56 = vpop.f32.mrf.mxu1 }
 0x124   : > { %v2153_v57 = vadd.f32 %v2145_v54, %v246_v52 }
 0x126   : > { %2157 = vst [vmem:[#allocation2 + $0x10] sm:$0xff] %v2153_v57 }
 0x15b   : > { %v1925_v58 = vpop.f32.mrf.mxu0 }
 0x15d   : > { %v1966_v59 = vpop.f32.mrf.mxu1  ;;  %v1927_v61 = vpop.f32.mrf.mxu0 }
 0x15e   : > { %v1967_v60 = vadd.f32 %v1966_v59, %v1925_v58 }
 0x15f   : > { %v1968_v0 = vpop.f32.mrf.mxu1  ;;  %v1929_v63 = vpop.f32.mrf.mxu0 }
 0x160   : > { %v1969_v62 = vadd.f32 %v1968_v0, %v1927_v61 }
 0x161   : > { %v1970_v1 = vpop.f32.mrf.mxu1  ;;  %v1930_v3 = vpop.f32.mrf.mxu0 }
 0x162   : > { %v2146_v2 = vcombine.low %v1967_v60, %v1969_v62 }
 0x163   : > { %v1971_v4 = vpop.f32.mrf.mxu1 }
 0x164   : > { %v2154_v7 = vadd.f32 %v2146_v2, %v247_v6 }
 0x166   : > { %2158 = vst [vmem:[#allocation2] sm:$0xff] %v2154_v7 }
 0x19b   : > { %v2007_v8 = vpop.f32.mrf.mxu0 }
 0x19d   : > { %v2048_v9 = vpop.f32.mrf.mxu1  ;;  %v2009_v5 = vpop.f32.mrf.mxu0 }
 0x19e   : > { %v2049_v10 = vadd.f32 %v2048_v9, %v2007_v8 }
 0x19f   : > { %v2050_v11 = vpop.f32.mrf.mxu1  ;;  %v2011_v13 = vpop.f32.mrf.mxu0 }
 0x1a0   : > { %v2051_v12 = vadd.f32 %v2050_v11, %v2009_v5 }
 0x1a1   : > { %v2052_v15 = vpop.f32.mrf.mxu1  ;;  %v2012_v17 = vpop.f32.mrf.mxu0 }
 0x1a2   : > { %v2147_v16 = vcombine.low %v2049_v10, %v2051_v12 }
 0x1a3   : > { %v2053_v18 = vpop.f32.mrf.mxu1 }
 0x1a4   : > { %v2155_v19 = vadd.f32 %v2147_v16, %v248_v14 }
 0x1a6   : > { %2159 = vst [vmem:[#allocation2 + $0x18] sm:$0xff] %v2155_v19 }
 0x1db   : > { %v2089_v20 = vpop.f32.mrf.mxu0 }
 0x1dd   : > { %v2130_v21 = vpop.f32.mrf.mxu1  ;;  %v2091_v22 = vpop.f32.mrf.mxu0 }
 0x1de   : > { %v2131_v24 = vadd.f32 %v2130_v21, %v2089_v20 }
 0x1df   : > { %v2132_v23 = vpop.f32.mrf.mxu1  ;;  %v2093_v26 = vpop.f32.mrf.mxu0 }
 0x1e0   : > { %v2133_v25 = vadd.f32 %v2132_v23, %v2091_v22 }
 0x1e1   : > { %v2134_v28 = vpop.f32.mrf.mxu1  ;;  %v2094_v30 = vpop.f32.mrf.mxu0 }
 0x1e2   : > { %v2148_v29 = vcombine.low %v2131_v24, %v2133_v25  ;;  %2164 = sbr.rel (%p3233_p6) target bundleno = 755 (0x2f3), region = 48 }
 0x1e3   : > { %v2135_v31 = vpop.f32.mrf.mxu1 }
 0x1e4   : > { %v2156_v32 = vadd.f32 %v2148_v29, %v249_v27 }
 0x1e6   : > { %2160 = vst [vmem:[#allocation2 + $0x8] sm:$0xff] %v2156_v32 }
 0x1e7   : > { %v3401_v33 = vld [vmem:[%s4042_s3 + $0x78] sm:$0xff]   ;;  %v3405_v37 = vld [vmem:[%s4042_s3 + $0x70] sm:$0xff]   ;;  %v3409_v41 = vld [vmem:[%s4042_s3 + $0x68] sm:$0xff]   ;;  %v2173_v61 = vsub.s32 0, %v3550_v45  ;;  %v2177_v62 = vsub.s32 1, %v3550_v45  ;;  %v2181_v6 = vsub.s32 2, %v3550_v45 }
 0x1e8   : > { %v3402_v34 = vld [vmem:[%s4042_s3 + $0xf8] sm:$0xff]   ;;  %3302 = vmatprep.subr.bf16.mxu0 %v3401_v33  ;;  %v3406_v38 = vld [vmem:[%s4042_s3 + $0xf0] sm:$0xff]   ;;  %v3410_v42 = vld [vmem:[%s4042_s3 + $0xe8] sm:$0xff]   ;;  %v2185_v2 = vsub.s32 3, %v3550_v45 }
 0x1e9   : > { %v3403_v35 = vld [vmem:[%s4042_s3 + $0x38] sm:$0xff]   ;;  %3324 = vmatprep.subr.bf16.mxu1 %v3402_v34  ;;  %v3407_v39 = vld [vmem:[%s4042_s3 + $0x30] sm:$0xff]   ;;  %v3411_v43 = vld [vmem:[%s4042_s3 + $0x28] sm:$0xff]  }
 0x1ea   : > { %v3404_v36 = vld [vmem:[%s4042_s3 + $0xb8] sm:$0xff]   ;;  %3303 = vmatpush3.bf16.msra.mxu0 %v3403_v35  ;;  %v3408_v40 = vld [vmem:[%s4042_s3 + $0xb0] sm:$0xff]   ;;  %v3412_v44 = vld [vmem:[%s4042_s3 + $0xa8] sm:$0xff]  }
 0x1eb   : > { %3325 = vmatpush3.bf16.msra.mxu1 %v3404_v36  ;;  %3304 = vmatprep.subr.bf16.mxu0 %v3405_v37  ;;  %v3413_v46 = vld [vmem:[%s4042_s3 + $0x60] sm:$0xff]   ;;  %v3417_v50 = vld [vmem:[%s4042_s3 + $0x58] sm:$0xff]   ;;  %v3421_v54 = vld [vmem:[%s4042_s3 + $0x50] sm:$0xff]  }
 0x1ec   : > { %3326 = vmatprep.subr.bf16.mxu1 %v3406_v38  ;;  %v3414_v47 = vld [vmem:[%s4042_s3 + $0xe0] sm:$0xff]   ;;  %v3418_v51 = vld [vmem:[%s4042_s3 + $0xd8] sm:$0xff]   ;;  %v3422_v55 = vld [vmem:[%s4042_s3 + $0xd0] sm:$0xff]  }
 0x1ed   : > { %v3415_v48 = vld [vmem:[%s4042_s3 + $0x20] sm:$0xff]   ;;  %v3419_v52 = vld [vmem:[%s4042_s3 + $0x18] sm:$0xff]   ;;  %v3423_v56 = vld [vmem:[%s4042_s3 + $0x10] sm:$0xff]  }
 0x1ee   : > { %3305 = vmatpush3.bf16.msra.mxu0 %v3407_v39  ;;  %v3416_v49 = vld [vmem:[%s4042_s3 + $0xa0] sm:$0xff]   ;;  %v3420_v53 = vld [vmem:[%s4042_s3 + $0x98] sm:$0xff]   ;;  %v3424_v57 = vld [vmem:[%s4042_s3 + $0x90] sm:$0xff]  }
 0x1ef   : > { %3327 = vmatpush3.bf16.msra.mxu1 %v3408_v40  ;;  %3306 = vmatprep.subr.bf16.mxu0 %v3409_v41  ;;  %v3425_v58 = vld [vmem:[%s4042_s3 + $0x48] sm:$0xff]   ;;  %v3429_v63 = vld [vmem:[%s4042_s3 + $0x40] sm:$0xff]   ;;  %v2165_v7 = vld [vmem:[#allocation2 + $0x10] sm:$0xff]  ;;  %v2189_v40 = vsub.s32 4, %v3550_v45 }
 0x1f0   : > { %3328 = vmatprep.subr.bf16.mxu1 %v3410_v42  ;;  %v3426_v59 = vld [vmem:[%s4042_s3 + $0xc8] sm:$0xff]   ;;  %v3430_v1 = vld [vmem:[%s4042_s3 + $0xc0] sm:$0xff]   ;;  %v3433_v13 = vld [vmem:[%s4042_s3 + $0x178] sm:$0xff]   ;;  %v2193_v42 = vsub.s32 5, %v3550_v45 }
 0x1f1   : > { %v3427_v60 = vld [vmem:[%s4042_s3 + $0x8] sm:$0xff]   ;;  %v3431_v3 = vld [vmem:[%s4042_s3] sm:$0xff]   ;;  %v3434_v14 = vld [vmem:[%s4042_s3 + $0x1f8] sm:$0xff]  }
 0x1f2   : > { %3307 = vmatpush3.bf16.msra.mxu0 %v3411_v43  ;;  %v3428_v0 = vld [vmem:[%s4042_s3 + $0x88] sm:$0xff]   ;;  %v3432_v4 = vld [vmem:[%s4042_s3 + $0x80] sm:$0xff]   ;;  %v3435_v25 = vld [vmem:[%s4042_s3 + $0x138] sm:$0xff]  }
 0x1f3   : > { %3329 = vmatpush3.bf16.msra.mxu1 %v3412_v44  ;;  %3308 = vmatprep.subr.bf16.mxu0 %v3413_v46  ;;  %v3920_v8 = vld [vmem:[%s4041_s2] sm:$0xff]  ;;  %v3436_v28 = vld [vmem:[%s4042_s3 + $0x1b8] sm:$0xff]   ;;  %v3437_v31 = vld [vmem:[%s4042_s3 + $0x170] sm:$0xff]   ;;  %v2197_v44 = vsub.s32 6, %v3550_v45 }
 0x1f4   : > { %3330 = vmatprep.subr.bf16.mxu1 %v3414_v47  ;;  %v2166_v9 = vld [vmem:[#allocation2] sm:$0xff]  ;;  %v2174_v10 = vrot.slane %v3920_v8, %v2173_v61  ;;  %v2178_v5 = vrot.slane %v3920_v8, %v2177_v62  ;;  %v2182_v11 = vrot.slane %v3920_v8, %v2181_v6  ;;  %v2186_v12 = vrot.slane %v3920_v8, %v2185_v2  ;;  %v3438_v32 = vld [vmem:[%s4042_s3 + $0x1f0] sm:$0xff]   ;;  %v3441_v35 = vld [vmem:[%s4042_s3 + $0x168] sm:$0xff]  }
 0x1f5   : > { %v3439_v33 = vld [vmem:[%s4042_s3 + $0x130] sm:$0xff]   ;;  %v3442_v36 = vld [vmem:[%s4042_s3 + $0x1e8] sm:$0xff]   ;;  %v3445_v39 = vld [vmem:[%s4042_s3 + $0x160] sm:$0xff]   ;;  %v2201_v47 = vsub.s32 7, %v3550_v45 }
 0x1f6   : > { %3309 = vmatpush3.bf16.msra.mxu0 %v3415_v48  ;;  %v2203_v15 = vcombine.low %v2174_v10, %v2178_v5  ;;  %v2204_v16 = vcombine.low %v2182_v11, %v2186_v12  ;;  %v3440_v34 = vld [vmem:[%s4042_s3 + $0x1b0] sm:$0xff]   ;;  %v3443_v37 = vld [vmem:[%s4042_s3 + $0x128] sm:$0xff]   ;;  %v3446_v41 = vld [vmem:[%s4042_s3 + $0x1e0] sm:$0xff]  }
 0x1f7   : > { %3331 = vmatpush3.bf16.msra.mxu1 %v3416_v49  ;;  %3310 = vmatprep.subr.bf16.mxu0 %v3417_v50  ;;  %v3444_v38 = vld [vmem:[%s4042_s3 + $0x1a8] sm:$0xff]   ;;  %v3447_v43 = vld [vmem:[%s4042_s3 + $0x120] sm:$0xff]   ;;  %v3449_v48 = vld [vmem:[%s4042_s3 + $0x158] sm:$0xff]  }
 0x1f8   : > { %3332 = vmatprep.subr.bf16.mxu1 %v3418_v51  ;;  %v2211_v17 = vadd.f32 %v2203_v15, %v2165_v7  ;;  %v2212_v18 = vadd.f32 %v2204_v16, %v2166_v9  ;;  %v3448_v46 = vld [vmem:[%s4042_s3 + $0x1a0] sm:$0xff]   ;;  %v3450_v49 = vld [vmem:[%s4042_s3 + $0x1d8] sm:$0xff]   ;;  %v2190_v51 = vrot.slane %v3920_v8, %v2189_v40  ;;  %v3457_v61 = vld [vmem:[%s4042_s3 + $0x148] sm:$0xff]  }
 0x1f9   : > { %v3451_v50 = vld [vmem:[%s4042_s3 + $0x118] sm:$0xff]   ;;  %v3459_v6 = vld [vmem:[%s4042_s3 + $0x108] sm:$0xff]   ;;  %v3462_v7 = vld [vmem:[%s4042_s3 + $0x1c0] sm:$0xff]  }
 0x1fa   : > { %3311 = vmatpush3.bf16.msra.mxu0 %v3419_v52  ;;  %vm2215_vm0 = vcmp.ge.f32.partialorder %v2211_v17, 0.0  ;;  %v2219_v19 = vmul.f32 0.2, %v2211_v17  ;;  %vm2216_vm1 = vcmp.ge.f32.partialorder %v2212_v18, 0.0  ;;  %v2220_v20 = vmul.f32 0.2, %v2212_v18 }
 0x1fb   : > { %3333 = vmatpush3.bf16.msra.mxu1 %v3420_v53  ;;  %3312 = vmatprep.subr.bf16.mxu0 %v3421_v54  ;;  %v3452_v45 = vld [vmem:[%s4042_s3 + $0x198] sm:$0xff]   ;;  %v2194_v52 = vrot.slane %v3920_v8, %v2193_v42  ;;  %v2198_v53 = vrot.slane %v3920_v8, %v2197_v44  ;;  %v2202_v54 = vrot.slane %v3920_v8, %v2201_v47  ;;  %v3463_v11 = vld [vmem:[%s4042_s3 + $0x100] sm:$0xff]  }
 0x1fc   : > { %3334 = vmatprep.subr.bf16.mxu1 %v3422_v55  ;;  %v2223_v21 = vsel %vm2215_vm0, %v2211_v17, %v2219_v19  ;;  %v2224_v22 = vsel %vm2216_vm1, %v2212_v18, %v2220_v20  ;;  %v3453_v55 = vld [vmem:[%s4042_s3 + $0x150] sm:$0xff]   ;;  %v2167_v62 = vld [vmem:[#allocation2 + $0x18] sm:$0xff]  ;;  %v3464_v12 = vld [vmem:[%s4042_s3 + $0x180] sm:$0xff]  }
 0x1fd   : > { %v2231_v23 = vcombine.high %v2223_v21, %v2223_v21  ;;  %v2232_v24 = vcombine.high %v2224_v22, %v2224_v22  ;;  %v2239_v26 = vpack.c.bf16 %v2223_v21, %v2223_v21  ;;  %v2241_v27 = vpack.c.bf16 %v2224_v22, %v2224_v22 }
 0x1fe   : > { %3313 = vmatpush3.bf16.msra.mxu0 %v3423_v56  ;;  %v3454_v56 = vld [vmem:[%s4042_s3 + $0x1d0] sm:$0xff]  }
 0x1ff   : > { %3335 = vmatpush3.bf16.msra.mxu1 %v3424_v57  ;;  %3314 = vmatprep.subr.bf16.mxu0 %v3425_v58  ;;  %v2240_v29 = vpack.c.bf16 %v2231_v23, %v2231_v23  ;;  %v2242_v30 = vpack.c.bf16 %v2232_v24, %v2232_v24  ;;  %v3455_v57 = vld [vmem:[%s4042_s3 + $0x110] sm:$0xff]  }
 0x200   : > { %3336 = vmatprep.subr.bf16.mxu1 %v3426_v59  ;;  %v3456_v58 = vld [vmem:[%s4042_s3 + $0x190] sm:$0xff]   ;;  %v2205_v59 = vcombine.low %v2190_v51, %v2194_v52 }
 0x201   : > { %2798 = vmatprep.mubr.bf16.mxu0 %v2240_v29  ;;  %2838 = vmatprep.mubr.bf16.mxu1 %v2242_v30 }
 0x202   : > { %3315 = vmatpush3.bf16.msra.mxu0 %v3427_v60  ;;  %v2206_v60 = vcombine.low %v2198_v53, %v2202_v54 }
 0x203   : > { %3337 = vmatpush3.bf16.msra.mxu1 %v3428_v0  ;;  %3316 = vmatprep.subr.bf16.mxu0 %v3429_v63  ;;  %v3458_v0 = vld [vmem:[%s4042_s3 + $0x1c8] sm:$0xff]  }
 0x204   : > { %3338 = vmatprep.subr.bf16.mxu1 %v3430_v1  ;;  %v2168_v63 = vld [vmem:[#allocation2 + $0x8] sm:$0xff]  ;;  %v2213_v1 = vadd.f32 %v2205_v59, %v2167_v62 }
 0x205   : > { %v2214_v2 = vadd.f32 %v2206_v60, %v2168_v63 }
 0x206   : > { %3317 = vmatpush3.bf16.msra.mxu0 %v3431_v3  ;;  %v3460_v3 = vld [vmem:[%s4042_s3 + $0x188] sm:$0xff]   ;;  %vm2217_vm2 = vcmp.ge.f32.partialorder %v2213_v1, 0.0  ;;  %v2221_v8 = vmul.f32 0.2, %v2213_v1 }
 0x207   : > { %3339 = vmatpush3.bf16.msra.mxu1 %v3432_v4  ;;  %3346 = vmatprep.subr.bf16.mxu0 %v3433_v13  ;;  %v3461_v4 = vld [vmem:[%s4042_s3 + $0x140] sm:$0xff]   ;;  %vm2218_vm3 = vcmp.ge.f32.partialorder %v2214_v2, 0.0  ;;  %v2222_v9 = vmul.f32 0.2, %v2214_v2 }
 0x208   : > { %3368 = vmatprep.subr.bf16.mxu1 %v3434_v14  ;;  %v2225_v10 = vsel %vm2217_vm2, %v2213_v1, %v2221_v8 }
 0x209   : > { %2799 = vmatmul.mubr.bf16.vlgmr.msra.gmra.mxu0 %v2239_v26  ;;  %v2226_v5 = vsel %vm2218_vm3, %v2214_v2, %v2222_v9  ;;  %v2233_v13 = vcombine.high %v2225_v10, %v2225_v10  ;;  %v2243_v17 = vpack.c.bf16 %v2225_v10, %v2225_v10 }
 0x20a   : > { %2839 = vmatmul.mubr.bf16.vlgmr.msra.gmra.mxu1 %v2241_v27  ;;  %3347 = vmatpush3.bf16.msra.mxu0 %v3435_v25  ;;  %v2234_v14 = vcombine.high %v2226_v5, %v2226_v5  ;;  %v2245_v18 = vpack.c.bf16 %v2226_v5, %v2226_v5 }
 0x20b   : > { %3369 = vmatpush3.bf16.msra.mxu1 %v3436_v28  ;;  %3348 = vmatprep.subr.bf16.mxu0 %v3437_v31  ;;  %v2244_v15 = vpack.c.bf16 %v2233_v13, %v2233_v13  ;;  %v3234_v28 = vld [vmem:[%s4043_s4] ss:$0 sm:$0xff] }
 0x20c   : > { %3370 = vmatprep.subr.bf16.mxu1 %v3438_v32  ;;  %v2246_v16 = vpack.c.bf16 %v2234_v14, %v2234_v14 }
 0x20d   : > { %2878 = vmatprep.mubr.bf16.mxu0 %v2244_v15 }
 0x20e   : > { %3349 = vmatpush3.bf16.msra.mxu0 %v3439_v33  ;;  %2918 = vmatprep.mubr.bf16.mxu1 %v2246_v16 }
 0x20f   : > { %3371 = vmatpush3.bf16.msra.mxu1 %v3440_v34  ;;  %3350 = vmatprep.subr.bf16.mxu0 %v3441_v35 }
 0x210   : > { %3372 = vmatprep.subr.bf16.mxu1 %v3442_v36 }
 0x212   : > { %3351 = vmatpush3.bf16.msra.mxu0 %v3443_v37 }
 0x213   : > { %3373 = vmatpush3.bf16.msra.mxu1 %v3444_v38  ;;  %3352 = vmatprep.subr.bf16.mxu0 %v3445_v39 }
 0x214   : > { %3374 = vmatprep.subr.bf16.mxu1 %v3446_v41 }
 0x216   : > { %3353 = vmatpush3.bf16.msra.mxu0 %v3447_v43 }
 0x217   : > { %3375 = vmatpush3.bf16.msra.mxu1 %v3448_v46  ;;  %3354 = vmatprep.subr.bf16.mxu0 %v3449_v48 }
 0x218   : > { %3376 = vmatprep.subr.bf16.mxu1 %v3450_v49 }
 0x21a   : > { %3355 = vmatpush3.bf16.msra.mxu0 %v3451_v50 }
 0x21b   : > { %3377 = vmatpush3.bf16.msra.mxu1 %v3452_v45  ;;  %3356 = vmatprep.subr.bf16.mxu0 %v3453_v55 }
 0x21c   : > { %3378 = vmatprep.subr.bf16.mxu1 %v3454_v56 }
 0x21e   : > { %3357 = vmatpush3.bf16.msra.mxu0 %v3455_v57 }
 0x21f   : > { %3379 = vmatpush3.bf16.msra.mxu1 %v3456_v58  ;;  %3358 = vmatprep.subr.bf16.mxu0 %v3457_v61 }
 0x220   : > { %3380 = vmatprep.subr.bf16.mxu1 %v3458_v0 }
 0x222   : > { %3359 = vmatpush3.bf16.msra.mxu0 %v3459_v6 }
 0x223   : > { %3381 = vmatpush3.bf16.msra.mxu1 %v3460_v3  ;;  %3360 = vmatprep.subr.bf16.mxu0 %v3461_v4 }
 0x224   : > { %3382 = vmatprep.subr.bf16.mxu1 %v3462_v7 }
 0x226   : > { %3361 = vmatpush3.bf16.msra.mxu0 %v3463_v11 }
 0x227   : > { %3383 = vmatpush3.bf16.msra.mxu1 %v3464_v12 }
 0x229   : > { %2879 = vmatmul.mubr.bf16.vlgmr.msra.gmra.mxu0 %v2243_v17 }
 0x22a   : > { %2919 = vmatmul.mubr.bf16.vlgmr.msra.gmra.mxu1 %v2245_v18 }
 0x2c9   : > { %v3318_v19 = vpop.f32.mrf.mxu0 }
 0x2ca   : > { %v3340_v20 = vpop.f32.mrf.mxu1 }
 0x2cb   : > { %v3319_v21 = vpop.f32.mrf.mxu0 }
 0x2cc   : > { %v3341_v22 = vpop.f32.mrf.mxu1  ;;  %v3320_v27 = vadd.f32 %v3319_v21, %v3318_v19 }
 0x2cd   : > { %v3321_v23 = vpop.f32.mrf.mxu0  ;;  %v3342_v30 = vadd.f32 %v3341_v22, %v3340_v20 }
 0x2ce   : > { %v3343_v24 = vpop.f32.mrf.mxu1  ;;  %v2801_v29 = vadd.f32 %v3320_v27, %v3234_v28 }
 0x2cf   : > { %v3322_v25 = vpop.f32.mrf.mxu0 }
 0x2d0   : > { %v3344_v26 = vpop.f32.mrf.mxu1  ;;  %v2841_v35 = vadd.f32 %v3342_v30, %v2801_v29 }
 0x2e9   : > { %v3362_v31 = vpop.f32.mrf.mxu0 }
 0x2ea   : > { %v3384_v32 = vpop.f32.mrf.mxu1 }
 0x2eb   : > { %v3363_v33 = vpop.f32.mrf.mxu0 }
 0x2ec   : > { %v3385_v34 = vpop.f32.mrf.mxu1  ;;  %v3364_v36 = vadd.f32 %v3363_v33, %v3362_v31 }
 0x2ed   : > { %v3365_v37 = vpop.f32.mrf.mxu0  ;;  %v3386_v40 = vadd.f32 %v3385_v34, %v3384_v32 }
 0x2ee   : > { %v3387_v38 = vpop.f32.mrf.mxu1  ;;  %v2881_v39 = vadd.f32 %v3364_v36, %v2841_v35 }
 0x2ef   : > { %v3366_v41 = vpop.f32.mrf.mxu0 }
 0x2f0   : > { %v3388_v42 = vpop.f32.mrf.mxu1  ;;  %v2921_v43 = vadd.f32 %v3386_v40, %v2881_v39 }
 0x2f2   : > { %2926 = vst [vmem:[%s4044_s5] sm:$0xf] %v2921_v43 }
 0x2f3 PF: > { %s15_s18 = sadd.s32 1, %s3471_s18  }
 0x2f4   : > { %p12_p7 = scmp.ge.s32.totalorder %s15_s18, 6  }
 0x2f6   :  { %14 = sbr.rel (!%p12_p7) target bundleno = 1 (0x1), region = 77 }

</bundles_post_ra>
